<compile_context>
chip_gen: v7x
topology: tpu7x:2x2x1
jax: 0.10.0
libtpu: 0.0.40
codegen_flags: <defaults>
</compile_context>

<pallas_src>
import jax
import jax.numpy as jnp
from jax.experimental import pallas as pl
from jax.experimental.pallas import tpu as pltpu


_MAX_TILE_ROWS = 1024                   # rows per tile (per input, per buffer)
_TILE_BYTES_BUDGET = 2 * 1024 * 1024    # ~2 MiB per input per pipeline buffer
_FAST_PATH_ELEMS = 1 << 16              # below this, skip the pallas_call


def _cdiv(a, b):
    return -(-a // b)


def _ceil_to(x, m):
    return ((x + m - 1) // m) * m


def _make_kernel(rows_g, width_g, rows_c, width_c, tile_rows, tiles_per_core):
    """Accumulate raw per-input sums into resident (8, width) output blocks."""

    def _accumulate(x_ref, acc_ref, t, rows_total, width):
        full_tiles = rows_total // tile_rows
        n_tiles = _cdiv(rows_total, tile_rows)
        groups = tile_rows // 8

        def _add(valid_rows=None):
            x = x_ref[...].astype(jnp.float32)
            if valid_rows is not None:
                # Only the ragged tail tile pays for the row mask.
                row_ids = jax.lax.broadcasted_iota(
                    jnp.int32, (tile_rows, width), 0)
                x = jnp.where(row_ids < valid_rows, x, 0.0)
            # Sublane-group reduction: plain vreg adds on the VALU, no XLU.
            acc_ref[...] += x.reshape(groups, 8, width).sum(axis=0)

        if full_tiles > 0:
            @pl.when(t < full_tiles)
            def _():
                _add()

        tail_rows = rows_total - full_tiles * tile_rows
        if tail_rows > 0:
            @pl.when(t == n_tiles - 1)
            def _():
                _add(tail_rows)

    def kernel(gen_ref, cart_ref, out_g_ref, out_c_ref):
        p = pl.program_id(0)          # "parallel" axis (core split on v7x)
        i = pl.program_id(1)          # "arbitrary" reduction axis
        t = p * tiles_per_core + i    # global tile index

        @pl.when(i == 0)
        def _init():
            out_g_ref[...] = jnp.zeros_like(out_g_ref)
            out_c_ref[...] = jnp.zeros_like(out_c_ref)

        _accumulate(gen_ref, out_g_ref, t, rows_g, width_g)
        _accumulate(cart_ref, out_c_ref, t, rows_c, width_c)

    return kernel


def _clamped_index_map(n_tiles, tiles_per_core):
    last = n_tiles - 1

    def index_map(p, i):
        t = p * tiles_per_core + i
        # Past this input's last tile: repeated block index => no re-DMA;
        # the kernel's pl.when gate skips the accumulate for those steps.
        return (jnp.minimum(t, last), 0)

    return index_map


def discriminator_loss(d_out_for_generated, d_out_for_cartoon,
                       current_epoch=0, tb_writer=None):
    """Returns 0.01 * (-mean(D_cartoon) + mean(D_generated)) as an f32 scalar."""
    del current_epoch
    # TODO(synk): tb_writer scalar logging is host-side TensorBoard I/O; no Pallas equivalent.

    g = jnp.asarray(d_out_for_generated)
    c = jnp.asarray(d_out_for_cartoon)
    n_gen = int(g.size)
    n_cart = int(c.size)

    # Fast path: for tiny (or degenerate-rank) inputs the launch cost dominates.
    if (n_gen + n_cart <= _FAST_PATH_ELEMS) or g.ndim < 2 or c.ndim < 2:
        return 0.01 * (jnp.mean(g.astype(jnp.float32))
                       - jnp.mean(c.astype(jnp.float32)))

    # Free reshape (row-major collapse, no pad, no HBM copy).
    g2 = g.reshape(-1, g.shape[-1])
    c2 = c.reshape(-1, c.shape[-1])
    rows_g, width_g = g2.shape
    rows_c, width_c = c2.shape

    # One common tile_rows, sized to ~2 MiB per input per pipeline buffer.
    bytes_per_row = max(width_g * g2.dtype.itemsize, width_c * c2.dtype.itemsize)
    rows_by_budget = max(8, (_TILE_BYTES_BUDGET // bytes_per_row) // 8 * 8)
    rows_needed = _ceil_to(max(rows_g, rows_c), 8)
    tile_rows = min(_MAX_TILE_ROWS, rows_by_budget, rows_needed)

    tiles_g = _cdiv(rows_g, tile_rows)
    tiles_c = _cdiv(rows_c, tile_rows)
    total_tiles = max(tiles_g, tiles_c)
    num_cores = 2 if total_tiles >= 2 else 1      # v7x: both TensorCores
    tiles_per_core = _cdiv(total_tiles, num_cores)

    kernel = _make_kernel(rows_g, width_g, rows_c, width_c,
                          tile_rows, tiles_per_core)

    out_g, out_c = pl.pallas_call(
        kernel,
        out_shape=(
            jax.ShapeDtypeStruct((8 * num_cores, width_g), jnp.float32),
            jax.ShapeDtypeStruct((8 * num_cores, width_c), jnp.float32),
        ),
        grid_spec=pltpu.PrefetchScalarGridSpec(
            num_scalar_prefetch=0,
            grid=(num_cores, tiles_per_core),
            in_specs=[
                pl.BlockSpec((tile_rows, width_g),
                             _clamped_index_map(tiles_g, tiles_per_core)),
                pl.BlockSpec((tile_rows, width_c),
                             _clamped_index_map(tiles_c, tiles_per_core)),
            ],
            out_specs=[
                pl.BlockSpec((8, width_g), lambda p, i: (p, 0)),
                pl.BlockSpec((8, width_c), lambda p, i: (p, 0)),
            ],
        ),
        compiler_params=pltpu.CompilerParams(
            dimension_semantics=("parallel", "arbitrary")),
    )(g2, c2)

    # Tiny final combine: scales + cross-lane reduce on (8*num_cores, width).
    return 0.01 * (jnp.sum(out_g) / n_gen - jnp.sum(out_c) / n_cart)


if __name__ == "__main__":
    key = jax.random.PRNGKey(0)
    k1, k2, k3, k4 = jax.random.split(key, 4)

    # 1) Small patch-discriminator style outputs, NCHW, f32 (fast path).
    g_small = jax.random.normal(k1, (2, 1, 16, 16), dtype=jnp.float32)
    c_small = jax.random.normal(k2, (2, 1, 16, 16), dtype=jnp.float32)
    loss_small = jax.block_until_ready(
        discriminator_loss(g_small, c_small, current_epoch=0))
    ref_small = 0.01 * (-jnp.mean(c_small) + jnp.mean(g_small))
    assert jnp.allclose(loss_small, ref_small, atol=1e-6, rtol=1e-5), (
        loss_small, ref_small)

    # 2) Larger, unequal-size bf16 inputs: exercises the Pallas kernel
    #    (multi-tile grid, ragged tail mask, unequal per-input tile counts,
    #    clamped index_map, bf16 -> f32 in-kernel cast, dual-core split).
    g_big = jax.random.normal(k3, (4, 3, 256, 384), dtype=jnp.bfloat16)
    c_big = jax.random.normal(k4, (2, 3, 256, 384), dtype=jnp.bfloat16)
    loss_big = jax.block_until_ready(
        discriminator_loss(g_big, c_big, current_epoch=1))
    ref_big = 0.01 * (-jnp.mean(c_big.astype(jnp.float32))
                      + jnp.mean(g_big.astype(jnp.float32)))
    assert jnp.allclose(loss_big, ref_big, atol=1e-5, rtol=1e-4), (
        loss_big, ref_big)

    print("KERNEL_OK")
</pallas_src>

<mosaic_0001>
module attributes {stable_mosaic.version = 11 : i64} {
  func.func @kernel(%arg0: i32, %arg1: i32, %arg2: memref<1024x384xbf16, #tpu.memory_space<vmem>>, %arg3: memref<1024x384xbf16, #tpu.memory_space<vmem>>, %arg4: memref<8x384xf32, #tpu.memory_space<vmem>>, %arg5: memref<8x384xf32, #tpu.memory_space<vmem>>) attributes {dimension_semantics = [#tpu.dimension_semantics<parallel>, #tpu.dimension_semantics<arbitrary>], iteration_bounds = array<i64: 2, 2>, scalar_prefetch = 0 : i64, scratch_operands = 0 : i64, tpu.core_type = #tpu.core_type<tc>, window_params = [{transform_indices = @transform_0, window_bounds = array<i64: 1024, 384>}, {transform_indices = @transform_1, window_bounds = array<i64: 1024, 384>}, {transform_indices = @transform_2, window_bounds = array<i64: 8, 384>}, {transform_indices = @transform_3, window_bounds = array<i64: 8, 384>}]} {
    %c2_i32 = arith.constant 2 : i32
    %0 = arith.muli %arg0, %c2_i32 : i32
    %1 = arith.addi %0, %arg1 : i32
    %c0_i32 = arith.constant 0 : i32
    %2 = arith.cmpi eq, %arg1, %c0_i32 : i32
    %3 = arith.extui %2 : i1 to i32
    %c0_i32_0 = arith.constant 0 : i32
    %4 = arith.cmpi ne, %3, %c0_i32_0 : i32
    scf.if %4 {
      %cst = arith.constant 0.000000e+00 : f32
      %14 = vector.broadcast %cst : f32 to vector<8x384xf32>
      %c0 = arith.constant 0 : index
      %c0_5 = arith.constant 0 : index
      %15 = vector.load %arg4[%c0, %c0_5] : memref<8x384xf32, #tpu.memory_space<vmem>>, vector<8x384xf32>
      tpu.vector_store %arg4[%c0, %c0_5], %14 {strides = array<i32>} : memref<8x384xf32, #tpu.memory_space<vmem>>, vector<8x384xf32>,
      %cst_6 = arith.constant 0.000000e+00 : f32
      %16 = vector.broadcast %cst_6 : f32 to vector<8x384xf32>
      %c0_7 = arith.constant 0 : index
      %c0_8 = arith.constant 0 : index
      %17 = vector.load %arg5[%c0_7, %c0_8] : memref<8x384xf32, #tpu.memory_space<vmem>>, vector<8x384xf32>
      tpu.vector_store %arg5[%c0_7, %c0_8], %16 {strides = array<i32>} : memref<8x384xf32, #tpu.memory_space<vmem>>, vector<8x384xf32>,
    } else {
    }
    %c3_i32 = arith.constant 3 : i32
    %5 = arith.cmpi slt, %1, %c3_i32 : i32
    %6 = arith.extui %5 : i1 to i32
    %c0_i32_1 = arith.constant 0 : i32
    %7 = arith.cmpi ne, %6, %c0_i32_1 : i32
    scf.if %7 {
      %c0 = arith.constant 0 : index
      %c0_5 = arith.constant 0 : index
      %14 = vector.load %arg2[%c0, %c0_5] : memref<1024x384xbf16, #tpu.memory_space<vmem>>, vector<1024x384xbf16>
      %15 = arith.extf %14 : vector<1024x384xbf16> to vector<1024x384xf32>
      %c0_6 = arith.constant 0 : index
      %c0_7 = arith.constant 0 : index
      %16 = vector.load %arg4[%c0_6, %c0_7] : memref<8x384xf32, #tpu.memory_space<vmem>>, vector<8x384xf32>
      %17 = vector.shape_cast %15 : vector<1024x384xf32> to vector<128x8x384xf32>
      %cst = arith.constant dense<0.000000e+00> : vector<8x384xf32>
      %18 = vector.multi_reduction <add>, %17, %cst [0] : vector<128x8x384xf32> to vector<8x384xf32>
      %19 = arith.addf %16, %18 : vector<8x384xf32>
      %c0_8 = arith.constant 0 : index
      %c0_9 = arith.constant 0 : index
      %20 = vector.load %arg4[%c0_8, %c0_9] : memref<8x384xf32, #tpu.memory_space<vmem>>, vector<8x384xf32>
      tpu.vector_store %arg4[%c0_8, %c0_9], %19 {strides = array<i32>} : memref<8x384xf32, #tpu.memory_space<vmem>>, vector<8x384xf32>,
    } else {
    }
    %c1_i32 = arith.constant 1 : i32
    %8 = arith.cmpi slt, %1, %c1_i32 : i32
    %9 = arith.extui %8 : i1 to i32
    %c0_i32_2 = arith.constant 0 : i32
    %10 = arith.cmpi ne, %9, %c0_i32_2 : i32
    scf.if %10 {
      %c0 = arith.constant 0 : index
      %c0_5 = arith.constant 0 : index
      %14 = vector.load %arg3[%c0, %c0_5] : memref<1024x384xbf16, #tpu.memory_space<vmem>>, vector<1024x384xbf16>
      %15 = arith.extf %14 : vector<1024x384xbf16> to vector<1024x384xf32>
      %c0_6 = arith.constant 0 : index
      %c0_7 = arith.constant 0 : index
      %16 = vector.load %arg5[%c0_6, %c0_7] : memref<8x384xf32, #tpu.memory_space<vmem>>, vector<8x384xf32>
      %17 = vector.shape_cast %15 : vector<1024x384xf32> to vector<128x8x384xf32>
      %cst = arith.constant dense<0.000000e+00> : vector<8x384xf32>
      %18 = vector.multi_reduction <add>, %17, %cst [0] : vector<128x8x384xf32> to vector<8x384xf32>
      %19 = arith.addf %16, %18 : vector<8x384xf32>
      %c0_8 = arith.constant 0 : index
      %c0_9 = arith.constant 0 : index
      %20 = vector.load %arg5[%c0_8, %c0_9] : memref<8x384xf32, #tpu.memory_space<vmem>>, vector<8x384xf32>
      tpu.vector_store %arg5[%c0_8, %c0_9], %19 {strides = array<i32>} : memref<8x384xf32, #tpu.memory_space<vmem>>, vector<8x384xf32>,
    } else {
    }
    %c1_i32_3 = arith.constant 1 : i32
    %11 = arith.cmpi eq, %1, %c1_i32_3 : i32
    %12 = arith.extui %11 : i1 to i32
    %c0_i32_4 = arith.constant 0 : i32
    %13 = arith.cmpi ne, %12, %c0_i32_4 : i32
    scf.if %13 {
      %c0 = arith.constant 0 : index
      %c0_5 = arith.constant 0 : index
      %14 = vector.load %arg3[%c0, %c0_5] : memref<1024x384xbf16, #tpu.memory_space<vmem>>, vector<1024x384xbf16>
      %15 = arith.extf %14 : vector<1024x384xbf16> to vector<1024x384xf32>
      %16 = tpu.iota {dimensions = array<i32: 0>} : vector<1024x384xi32>
      %c512_i32 = arith.constant 512 : i32
      %17 = vector.broadcast %c512_i32 : i32 to vector<1024x384xi32>
      %18 = arith.cmpi slt, %16, %17 : vector<1024x384xi32>
      %cst = arith.constant 0.000000e+00 : f32
      %19 = vector.broadcast %cst : f32 to vector<1024x384xf32>
      %20 = arith.select %18, %15, %19 : vector<1024x384xi1>, vector<1024x384xf32>
      %c0_6 = arith.constant 0 : index
      %c0_7 = arith.constant 0 : index
      %21 = vector.load %arg5[%c0_6, %c0_7] : memref<8x384xf32, #tpu.memory_space<vmem>>, vector<8x384xf32>
      %22 = vector.shape_cast %20 : vector<1024x384xf32> to vector<128x8x384xf32>
      %cst_8 = arith.constant dense<0.000000e+00> : vector<8x384xf32>
      %23 = vector.multi_reduction <add>, %22, %cst_8 [0] : vector<128x8x384xf32> to vector<8x384xf32>
      %24 = arith.addf %21, %23 : vector<8x384xf32>
      %c0_9 = arith.constant 0 : index
      %c0_10 = arith.constant 0 : index
      %25 = vector.load %arg5[%c0_9, %c0_10] : memref<8x384xf32, #tpu.memory_space<vmem>>, vector<8x384xf32>
      tpu.vector_store %arg5[%c0_9, %c0_10], %24 {strides = array<i32>} : memref<8x384xf32, #tpu.memory_space<vmem>>, vector<8x384xf32>,
    } else {
    }
    return
  }
  func.func @transform_0(%arg0: i32, %arg1: i32) -> (i32, i32) {
    %c2_i32 = arith.constant 2 : i32
    %0 = arith.muli %arg0, %c2_i32 : i32
    %1 = arith.addi %0, %arg1 : i32
    %c2_i32_0 = arith.constant 2 : i32
    %2 = arith.minsi %1, %c2_i32_0 : i32
    %c0_i32 = arith.constant 0 : i32
    %c0_i32_1 = arith.constant 0 : i32
    return %2, %c0_i32 : i32, i32
  }
  func.func @transform_1(%arg0: i32, %arg1: i32) -> (i32, i32) {
    %c2_i32 = arith.constant 2 : i32
    %0 = arith.muli %arg0, %c2_i32 : i32
    %1 = arith.addi %0, %arg1 : i32
    %c1_i32 = arith.constant 1 : i32
    %2 = arith.minsi %1, %c1_i32 : i32
    %c0_i32 = arith.constant 0 : i32
    %c0_i32_0 = arith.constant 0 : i32
    return %2, %c0_i32 : i32, i32
  }
  func.func @transform_2(%arg0: i32, %arg1: i32) -> (i32, i32) {
    %c0_i32 = arith.constant 0 : i32
    %c0_i32_0 = arith.constant 0 : i32
    return %arg0, %c0_i32 : i32, i32
  }
  func.func @transform_3(%arg0: i32, %arg1: i32) -> (i32, i32) {
    %c0_i32 = arith.constant 0 : i32
    %c0_i32_0 = arith.constant 0 : i32
    return %arg0, %c0_i32 : i32, i32
  }
}

</mosaic_0001>

<bundles_post_ra>
// kernel: tpu_custom_call.1
= control target key start
LH: loop header
LB: loop body
LE: loop exit
PB: predicated region body
PF: predicated region fallthrough
CT: control target
= control target key end

     0   :  { %s5542_s0 = inlined_call_operand.hbm [shape: bf16[3072,384], index: 0, kind: input, shape index: {}]   ;;  %s5543_s1 = inlined_call_operand.hbm [shape: bf16[1536,384], index: 1, kind: input, shape index: {}]   ;;  %s5544_s2 = inlined_call_operand.hbm [shape: f32[16,384], index: 2, kind: output, shape index: {0}]   ;;  %s5545_s3 = inlined_call_operand.hbm [shape: f32[16,384], index: 3, kind: output, shape index: {1}]  }
   0x1   :  { %5556 = sst [smem:[#allocation22_spill]] %s5545_s3 }
   0x2   :  { %9 = vsyncpa [#allocation3], 0 }
   0x3   :  { %11 = vsyncpa [#allocation3 + $0x1], 0 }
   0x4   :  { %12 = vsyncpa [#allocation6], 0 }
   0x5   :  { %14 = vsyncpa [#allocation6 + $0x1], 0 }
   0x6   :  { %15 = vsyncpa [#allocation4], 0 }
   0x7   :  { %17 = vsyncpa [#allocation4 + $0x1], 0 }
   0x8   :  { %18 = vsyncpa [#allocation9], 0 }
   0x9   :  { %20 = vsyncpa [#allocation9 + $0x1], 0  ;;  %s4665_s12 = smov 0   ;;  %s4667_s13 = smov 0  }
   0xa   :  { %s4669_s14 = smov 0   ;;  %s4671_s15 = smov 0  }
   0xb   :  { %s4673_s16 = smov 0   ;;  %s4675_s17 = smov 0  }
   0xc   :  { %s4677_s18 = smov 0   ;;  %s4679_s19 = smov 0  }
   0xd   :  { %s4681_s20 = smov 0   ;;  %s4683_s21 = smov 0  }
   0xe   :  { %s4685_s22 = smov 0   ;;  %s4687_s23 = smov 0  }
   0xf   :  { %s4689_s24 = smov 0   ;;  %s4691_s25 = smov 0  }
  0x10 LB: > { %5557 = sst [smem:[#allocation14_spill]] %s4614_s20  ;;  %s5546_s26 = sadd.s32 4294967295, %s4634_s25   ;;  %s4634_s25 = sphi %s4691_s25, %s26_s25   ;;  %s4630_s24 = sphi %s4689_s24, %s5587_s24   ;;  %s4626_s23 = sphi %s4687_s23, %s5586_s23   ;;  %s4622_s22 = sphi %s4685_s22, %s5585_s22   ;;  %s4618_s21 = sphi %s4683_s21, %s5584_s21   ;;  %s4614_s20 = sphi %s4681_s20, %s5583_s20   ;;  %s4610_s19 = sphi %s4679_s19, %s5595_s19   ;;  %s4606_s18 = sphi %s4677_s18, %s5594_s18   ;;  %s4602_s17 = sphi %s4675_s17, %s5593_s17   ;;  %s4598_s16 = sphi %s4673_s16, %s5592_s16   ;;  %s4594_s15 = sphi %s4671_s15, %s5591_s15   ;;  %s4590_s14 = sphi %s4669_s14, %s5590_s14   ;;  %s4586_s13 = sphi %s4667_s13, %s5589_s13   ;;  %s4582_s12 = sphi %s4665_s12, %s5588_s12  }
  0x11   : > { %5558 = sst [smem:[#allocation15_spill]] %s4626_s23  ;;  %s35_s28 = sadd.s32 1, %s4626_s23 }
  0x12   : > { %5559 = sst [smem:[#allocation16_spill]] %s4630_s24  ;;  %s38_s29 = sadd.s32 1, %s4630_s24 }
  0x13   : > { %p36_p0 = scmp.ge.s32.totalorder %s35_s28, 2  ;;  %s4227_s30 = sshll.u32 %s4630_s24, 1 }
  0x14   : > { %s43_s4 = sadd.s32 %s4626_s23, %s4227_s30  ;;  %s53_s5 = sadd.s32 1, %s4614_s20 }
  0x15   : > { %s5597_s28 = smov (%p36_p0, %s35_s28), 0  ;;  %s5599_s29 = smov (!%p36_p0, %s38_s29), %s4630_s24 }
  0x16   : > { %5560 = sst [smem:[#allocation17_spill]] %s5597_s28  ;;  %p44_p1 = scmp.lt.s32.totalorder %s43_s4, 2 }
  0x17   : > { %p60_p2 = scmp.ne.s32.totalorder %s4614_s20, %s4610_s19  ;;  %p40_p3 = scmp.ge.s32.totalorder %s5599_s29, 2 }
  0x18   : > { %p61_p4 = scmp.eq.s32.totalorder %s4634_s25, 0  ;;  %p66_p6 = scmp.ne.s32.totalorder %s4610_s19, %s4606_s18 }
  0x19   : > { %s4748_s6 = scalar_select %p44_p1, %s43_s4, 2 }
  0x1a   : > { %s5601_s29 = smov (%p40_p3, %s5599_s29), 0  ;;  %p4754_p5 = por %p61_p4, %p60_p2 }
  0x1b   : > { %5561 = sst [smem:[#allocation18_spill]] %s5601_s29  ;;  %s4228_s8 = sshll.u32 %s5601_s29, 1 }
  0x1c   : > { %p4763_p7 = scmp.eq.s32.totalorder %s5546_s26, 0  ;;  %s47_s10 = sadd.s32 %s4228_s8, %s5597_s28 }
  0x1d   : > { %p78_p8 = scmp.lt.s32.totalorder %s43_s4, 1  ;;  %p48_p9 = scmp.lt.s32.totalorder %s47_s10, 2 }
  0x1e   : > { %p4770_p10 = por %p4763_p7, %p66_p6  ;;  %p82_p11 = scmp.lt.s32.totalorder %s47_s10, 1 }
  0x1f   : > { %s5603_s4 = smov (!%p78_p8, %s43_s4), 1  ;;  %s87_s30 = sadd.s32 1, %s4602_s17 }
  0x20   : > { %s5564_s11 = scalar_select %p4770_p10, 1, 0 }
  0x21   : > { %s49_s18 = scalar_select %p48_p9, %s47_s10, 2 }
  0x22   : > { %p94_p12 = scmp.ne.s32.totalorder %s4602_s17, %s4598_s16  ;;  %p100_p0 = scmp.ne.s32.totalorder %s4598_s16, %s4594_s15 }
  0x23   : > { %s50_s8 = ssub.s32 %s4748_s6, %s49_s18  ;;  %s5605_s10 = smov (!%p82_p11, %s47_s10), 1 }
  0x24   : > { %p51_p13 = scmp.eq.s32.totalorder %s50_s8, 0  ;;  %s84_s26 = ssub.s32 %s5603_s4, %s5605_s10 }
  0x25   : > { %p4788_p1 = por %p94_p12, %p61_p4  ;;  %p85_p2 = scmp.eq.s32.totalorder %s84_s26, 0 }
  0x26   : > { %s4783_s27 = scalar_select %p51_p13, %s4614_s20, %s53_s5  }
  0x27   : > { %p4794_p3 = por %p100_p0, %p4763_p7  ;;  %s110_s23 = ssub.s32 %s4630_s24, %s5601_s29 }
  0x28   : > { %5565 = sst [smem:[#allocation19_spill]] %s4783_s27  ;;  %s113_s3 = sadd.s32 1, %s4590_s14 }
  0x29   : > { %s5567_s18 = scalar_select %p4794_p3, 1, 0 }
  0x2a   : > { %s4802_s8 = scalar_select %p85_p2, %s4602_s17, %s87_s30  }
  0x2b   : > { %p111_p6 = scmp.eq.s32.totalorder %s110_s23, 0  ;;  %p123_p8 = scmp.ne.s32.totalorder %s4590_s14, %s4586_s13 }
  0x2c   : > { %5568 = sst [smem:[#allocation20_spill]] %s4802_s8  ;;  %s5569_s15 = sadd.s32 4294967295, %s4634_s25  }
  0x2d   : > { %p124_p9 = scmp.eq.s32.totalorder %s5569_s15, 3  ;;  %p129_p11 = scmp.ne.s32.totalorder %s4586_s13, %s4582_s12 }
  0x2e   : > { %s4811_s5 = scalar_select %p111_p6, %s4590_s14, %s113_s3  }
  0x2f   : > { %p4813_p4 = por %p124_p9, %p123_p8  ;;  %s5572_s26 = sadd.s32 4294967294, %s4634_s25  }
  0x30   : > { %5570 = sst [smem:[#allocation21_spill]] %s4811_s5  ;;  %p130_p7 = scmp.eq.s32.totalorder %s5572_s26, 3 }
  0x31   : > { %s5571_s10 = scalar_select %p4813_p4, 1, 0 }
  0x32   : > { %p4819_p12 = por %p130_p7, %p129_p11  ;;  %p4232_p13 = scmp.ge.s32.totalorder %s4634_s25, 4 }
  0x33   : > { %s176_s23 = sand.u32 (!%p4232_p13), 1, %s4614_s20   ;;  %s4256_s30 = smul.u32 (!%p4232_p13), 24576, %s4748_s6 }
  0x34   : > { %s5573_s9 = scalar_select %p4819_p12, 1, 0 }
  0x35   : > { %172 = sbr.rel (%p4232_p13) target bundleno = 115 (0x73), region = 16  ;;  %s4829_s24 = scalar_lea.hbm (!%p4232_p13), %s5542_s0, %s4256_s30 }
  0x36   : > { %s4255_s3 = smul.u32 (!%p4232_p13), 1536, %s176_s23  ;;  %s4833_s8 = scalar_lea.sflag (!%p4232_p13), [#allocation3], %s176_s23 }
  0x37   : > { %s4396_s5 = scalar_lea.hbm (!%p4232_p13), %s4829_s24, 24576  ;;  %s4400_s29 = scalar_lea.hbm (!%p4232_p13), %s5542_s0, 73728 }
  0x38   : > { %s180_s26 = scalar_lea.vmem (!%p4232_p13), [#allocation2], %s4255_s3  ;;  %p4397_p0 = scmp.ne.s32.totalorder (!%p4232_p13), %s4829_s24, %s4396_s5 }
  0x39   : > { %s192_s27 = sshll.u32 (!%p4232_p13), %s180_s26, 4  ;;  %p4401_p8 = scmp.lt.u32.totalorder (!%p4232_p13), %s4829_s24, %s5542_s0  ;;  %s4831_s27 = int_to_ptr.vmem [resolvable:$true] %s192_s27 }
  0x3a   : > { %p4398_p2 = pnand (!%p4232_p13), %p4397_p0, %p4754_p5  ;;  %p4402_p9 = scmp.lt.u32.totalorder (!%p4232_p13), %s4400_s29, %s4396_s5 }
  0x3b   : > { %p4404_p7 = scmp.lt.u32.totalorder (!%p4232_p13), %s4396_s5, %s4829_s24 }
  0x3c   : > { %p4399_p6 = pneg %p4398_p2  ;;  %p4403_p11 = por %p4402_p9, %p4401_p8 }
  0x3e   : > { %p4405_p13 = por %p4404_p7, %p4403_p11 }
  0x40   : > { %p4406_p12 = pnand %p4405_p13, %p4399_p6 }
  0x42   : > { %4409 = shalt.err (!%p4406_p12)
}
  0x43   : > { %s4410_s23 = scalar_lea.vmem %s4831_s27, 24576  ;;  %s4636_s20 = smov [#allocation2]  }
  0x44   : > { %p4411_p0 = scmp.ne.s32.totalorder %s4831_s27, %s4410_s23  ;;  %s4414_s3 = sshll.u32 %s4636_s20, 4  ;;  %s4415_s3 = int_to_ptr.vmem [resolvable:$false] %s4414_s3 }
  0x45   : > { %s4416_s26 = scalar_lea.vmem %s4415_s3, 49152  ;;  %p4417_p3 = scmp.lt.s32.totalorder %s4831_s27, %s4415_s3 }
  0x46   : > { %p4412_p2 = pnand %p4411_p0, %p4754_p5  ;;  %p4418_p10 = scmp.lt.s32.totalorder %s4416_s26, %s4410_s23 }
  0x48   : > { %p4413_p4 = pneg %p4412_p2  ;;  %p4419_p8 = por %p4418_p10, %p4417_p3 }
  0x4a   : > { %p4420_p9 = pnand %p4419_p8, %p4413_p4 }
  0x4c   : > { %4423 = shalt.err (!%p4420_p9)
}
  0x4d   : > { %s4637_s5 = smov 192   ;;  %s4638_s6 = smov 12  }
  0x4e   : > { %4264 = dma.hbm_to_vmem [thread:$0]  (%p4754_p5), %s4829_s24, 24576, %s4831_s27, %s4833_s8, %s4637_s5, %s4637_s5, %s4638_s6  }
  0x4f   : > { %201 = sbr.rel (!%p4788_p1) target bundleno = 115 (0x73), region = 24  ;;  %s202_s29 = sand.u32 (%p4788_p1), 1, %s4602_s17  }
  0x50   : > { %s4238_s30 = sshll.u32 (%p4788_p1), %s5603_s4, 7  ;;  %s4257_s15 = smul.u32 (%p4788_p1), 1536, %s202_s29 }
  0x51   : > { %s212_s23 = ssub.s32 (%p4788_p1), 192, %s4238_s30  ;;  %s4864_s26 = scalar_lea.sflag (%p4788_p1), [#allocation6], %s202_s29 }
  0x52   : > { %p213_p10 = scmp.lt.s32.totalorder (%p4788_p1), %s212_s23, 128  ;;  %s206_s7 = scalar_lea.vmem (%p4788_p1), [#allocation5], %s4257_s15 }
  0x56   : > { %s5607_s23 = smov (!%p213_p10, %s212_s23), 128 }
  0x57   : > { %s4861_s20 = smul.u32 192, %s5607_s23 }
  0x59   : > { %s218_s3 = ssub.s32 24576, %s4861_s20 }
  0x5a   : > { %219 = vsyncadd %s4864_s26, %s218_s3  ;;  %p4241_p5 = scmp.ne.s32.totalorder %s4861_s20, 0  ;;  %s4258_s24 = smul.u32 24576, %s5603_s4 }
  0x5b   : > { %s225_s27 = sshll.u32 %s206_s7, 4  ;;  %s4428_s4 = scalar_lea.hbm %s5543_s1, 36864  ;;  %s4874_s27 = int_to_ptr.vmem [resolvable:$true] %s225_s27 }
  0x5c   : > { %s4872_s5 = scalar_lea.hbm %s5543_s1, %s4258_s24 }
  0x5d   : > { %s4424_s6 = scalar_lea.hbm %s4872_s5, %s4861_s20  ;;  %p4429_p12 = scmp.lt.u32.totalorder %s4872_s5, %s5543_s1 }
  0x5e   : > { %p4425_p1 = scmp.ne.s32.totalorder %s4872_s5, %s4424_s6  ;;  %p4430_p6 = scmp.lt.u32.totalorder %s4428_s4, %s4424_s6 }
  0x5f   : > { %p4432_p7 = scmp.lt.u32.totalorder %s4424_s6, %s4872_s5 }
  0x60   : > { %p4426_p3 = pnand %p4425_p1, %p4241_p5  ;;  %p4431_p11 = por %p4430_p6, %p4429_p12 }
  0x62   : > { %p4427_p4 = pneg %p4426_p3  ;;  %p4433_p13 = por %p4432_p7, %p4431_p11 }
  0x64   : > { %p4434_p0 = pnand %p4433_p13, %p4427_p4 }
  0x66   : > { %4437 = shalt.err (!%p4434_p0)
}
  0x67   : > { %s4438_s3 = scalar_lea.vmem %s4874_s27, %s4861_s20  ;;  %s4639_s7 = smov [#allocation5]  }
  0x68   : > { %p4439_p2 = scmp.ne.s32.totalorder %s4874_s27, %s4438_s3  ;;  %s4442_s24 = sshll.u32 %s4639_s7, 4  ;;  %s4443_s24 = int_to_ptr.vmem [resolvable:$false] %s4442_s24 }
  0x69   : > { %s4444_s28 = scalar_lea.vmem %s4443_s24, 49152  ;;  %p4445_p10 = scmp.lt.s32.totalorder %s4874_s27, %s4443_s24 }
  0x6a   : > { %p4440_p8 = pnand %p4439_p2, %p4241_p5  ;;  %p4446_p1 = scmp.lt.s32.totalorder %s4444_s28, %s4438_s3 }
  0x6c   : > { %p4441_p9 = pneg %p4440_p8  ;;  %p4447_p3 = por %p4446_p1, %p4445_p10 }
  0x6e   : > { %p4448_p12 = pnand %p4447_p3, %p4441_p9 }
  0x70   : > { %4451 = shalt.err (!%p4448_p12)
}
  0x71   : > { %s4640_s8 = smov 192   ;;  %s4641_s6 = smov 12  }
  0x72   : > { %231 = dma.hbm_to_vmem [thread:$0]  (%p4241_p5), %s4872_s5, %s4861_s20, %s4874_s27, %s4864_s26, %s4640_s8, %s4640_s8, %s4641_s6  }
  0x73 PF: > { %p4245_p4 = scmp.ge.s32.totalorder %s4634_s25, 1  ;;  %p233_p6 = scmp.lt.s32.totalorder %s4634_s25, 5 }
  0x75   : > { %p234_p11 = pnand %p4245_p4, %p233_p6 }
  0x76   : > { %s239_s29 = sand.u32 (!%p234_p11), 1, %s4610_s19   ;;  %p5574_p7 = scmp.ne.s32.totalorder (!%p234_p11), %s5564_s11, 0 }
  0x77   : > { %237 = sbr.rel (%p234_p11) target bundleno = 853 (0x355), region = 28  ;;  %s240_s4 = scalar_lea.sflag (!%p234_p11), [#allocation3], %s239_s29 }
  0x78   : > { %s4259_s30 = smul.u32 (!%p234_p11), 1536, %s239_s29 }
  0x7a   : > { %s4904_s15 = scalar_lea.vmem (!%p234_p11), [#allocation2], %s4259_s30 }
  0x7e   : > { %4565 = dma.done.wait (%p5574_p7), %s240_s4, 24576  }
  0x7f   : > { %4567 = vsyncadd (%p5574_p7), %s240_s4, 4294942720  ;;  %s248_s20 = sand.u32 1, %s4598_s16   ;;  %p5575_p5 = scmp.ne.s32.totalorder %s5567_s18, 0 }
  0x80   : > { %s4260_s26 = smul.u32 1536, %s248_s20  ;;  %s249_s27 = scalar_lea.sflag [#allocation6], %s248_s20 }
  0x82   : > { %s4911_s5 = scalar_lea.vmem [#allocation5], %s4260_s26 }
  0x83   : > { %4569 = dma.done.wait (%p5575_p5), %s249_s27, 24576  }
  0x84   : > { %4571 = vsyncadd (%p5575_p5), %s249_s27, 4294942720  ;;  %s4918_s23 = sand.u32 1, %s4586_s13   ;;  %s4246_s11 = sshll.u32 %s4622_s22, 1 }
  0x85   : > { %s4261_s3 = smul.u32 24, %s4918_s23  ;;  %s4923_s7 = sadd.s32 %s4618_s21, %s4246_s11 }
  0x86   : > { %p4247_p13 = scmp.ne.s32.totalorder %s4618_s21, 0 }
  0x87   : > { %s4925_s24 = scalar_lea.vmem [#allocation7], %s4261_s3  ;;  %s4927_s28 = scalar_lea.vmem [#allocation8], %s4261_s3  ;;  %v4642_v0 = vmov (!%p4247_p13), 0.0  }
  0x88   : > { %305 = sbr.rel (%p4247_p13) target bundleno = 143 (0x8f), region = 40  ;;  %306 = vst [vmem:[%s4925_s24] sm:$0xff] (!%p4247_p13), %v4642_v0  ;;  %307 = vst [vmem:[%s4925_s24 + $0x8] sm:$0xff] (!%p4247_p13), %v4642_v0 }
  0x89   : > { %308 = vst [vmem:[%s4925_s24 + $0x10] sm:$0xff] (!%p4247_p13), %v4642_v0  ;;  %309 = vst [vmem:[%s4927_s28] sm:$0xff] (!%p4247_p13), %v4642_v0 }
  0x8a   : > { %310 = vst [vmem:[%s4927_s28 + $0x8] sm:$0xff] (!%p4247_p13), %v4642_v0  ;;  %311 = vst [vmem:[%s4927_s28 + $0x10] sm:$0xff] (!%p4247_p13), %v4642_v0 }
  0x8f PF: > { %p4248_p0 = scmp.ge.s32.totalorder %s4923_s7, 3 }
  0x90   : > { %v316_v1 = vld [vmem:[%s4904_s15] sm:$0xff] (!%p4248_p0)  ;;  %v317_v2 = vld [vmem:[%s4904_s15 + $0x8] ss:$12 sps:$4 sm:$0xff] (!%p4248_p0)   ;;  %v318_v3 = vld [vmem:[%s4904_s15 + $0xc] sm:$0xff] (!%p4248_p0) }
  0x91   : > { %315 = sbr.rel (%p4248_p0) target bundleno = 406 (0x196), region = 44  ;;  %v320_v4 = vld [vmem:[%s4904_s15 + $0x18] sm:$0xff] (!%p4248_p0)  ;;  %v321_v5 = vld [vmem:[%s4904_s15 + $0x20] ss:$12 sps:$4 sm:$0xff] (!%p4248_p0)   ;;  %v572_v6 = vunpack.c.l.bf16 (!%p4248_p0), %v316_v1  ;;  %v573_v7 = vunpack.c.h.bf16 (!%p4248_p0), %v316_v1  ;;  %v322_v8 = vld [vmem:[%s4904_s15 + $0x24] sm:$0xff] (!%p4248_p0)  ;;  %v574_v9 = vunpack.c.l.bf16 (!%p4248_p0), %v317_v2  ;;  %v575_v10 = vunpack.c.l.bf16 (!%p4248_p0), %v318_v3 }
  0x92   : > { %v576_v11 = vunpack.c.h.bf16 (!%p4248_p0), %v318_v3  ;;  %v577_v12 = vunpack.c.h.bf16 (!%p4248_p0), %v317_v2  ;;  %v324_v13 = vld [vmem:[%s4904_s15 + $0x30] sm:$0xff] (!%p4248_p0)  ;;  %v578_v14 = vunpack.c.l.bf16 (!%p4248_p0), %v320_v4  ;;  %v579_v15 = vunpack.c.h.bf16 (!%p4248_p0), %v320_v4  ;;  %v325_v17 = vld [vmem:[%s4904_s15 + $0x38] ss:$12 sps:$4 sm:$0xff] (!%p4248_p0)   ;;  %v326_v20 = vld [vmem:[%s4904_s15 + $0x3c] sm:$0xff] (!%p4248_p0) }
  0x93   : > { %v580_v16 = vunpack.c.l.bf16 (!%p4248_p0), %v321_v5  ;;  %v581_v18 = vunpack.c.l.bf16 (!%p4248_p0), %v322_v8  ;;  %v582_v19 = vunpack.c.h.bf16 (!%p4248_p0), %v322_v8  ;;  %v583_v21 = vunpack.c.h.bf16 (!%p4248_p0), %v321_v5  ;;  %v328_v27 = vld [vmem:[%s4904_s15 + $0x48] sm:$0xff] (!%p4248_p0)  ;;  %v329_v32 = vld [vmem:[%s4904_s15 + $0x50] ss:$12 sps:$4 sm:$0xff] (!%p4248_p0)   ;;  %v330_v35 = vld [vmem:[%s4904_s15 + $0x54] sm:$0xff] (!%p4248_p0) }
  0x94   : > { %v959_v22 = vadd.f32 (!%p4248_p0), %v575_v10, %v572_v6  ;;  %v1086_v23 = vadd.f32 (!%p4248_p0), %v576_v11, %v573_v7  ;;  %v1213_v24 = vadd.f32 (!%p4248_p0), %v577_v12, %v574_v9  ;;  %v584_v25 = vunpack.c.l.bf16 (!%p4248_p0), %v324_v13  ;;  %v332_v42 = vld [vmem:[%s4904_s15 + $0x60] sm:$0xff] (!%p4248_p0)  ;;  %v333_v47 = vld [vmem:[%s4904_s15 + $0x68] ss:$12 sps:$4 sm:$0xff] (!%p4248_p0)   ;;  %v334_v50 = vld [vmem:[%s4904_s15 + $0x6c] sm:$0xff] (!%p4248_p0) }
  0x95   : > { %v585_v26 = vunpack.c.h.bf16 (!%p4248_p0), %v324_v13  ;;  %v586_v28 = vunpack.c.l.bf16 (!%p4248_p0), %v325_v17  ;;  %v587_v33 = vunpack.c.l.bf16 (!%p4248_p0), %v326_v20  ;;  %v588_v34 = vunpack.c.h.bf16 (!%p4248_p0), %v326_v20  ;;  %v336_v57 = vld [vmem:[%s4904_s15 + $0x78] sm:$0xff] (!%p4248_p0)  ;;  %v337_v62 = vld [vmem:[%s4904_s15 + $0x80] ss:$12 sps:$4 sm:$0xff] (!%p4248_p0)   ;;  %v338_v1 = vld [vmem:[%s4904_s15 + $0x84] sm:$0xff] (!%p4248_p0) }
  0x96   : > { %v960_v29 = vadd.f32 (!%p4248_p0), %v959_v22, %v578_v14  ;;  %v1087_v30 = vadd.f32 (!%p4248_p0), %v1086_v23, %v579_v15  ;;  %v1214_v31 = vadd.f32 (!%p4248_p0), %v1213_v24, %v580_v16  ;;  %v589_v36 = vunpack.c.h.bf16 (!%p4248_p0), %v325_v17  ;;  %v340_v8 = vld [vmem:[%s4904_s15 + $0x90] sm:$0xff] (!%p4248_p0)  ;;  %v341_v13 = vld [vmem:[%s4904_s15 + $0x98] ss:$12 sps:$4 sm:$0xff] (!%p4248_p0)   ;;  %v342_v16 = vld [vmem:[%s4904_s15 + $0x9c] sm:$0xff] (!%p4248_p0) }
  0x97   : > { %v590_v40 = vunpack.c.l.bf16 (!%p4248_p0), %v328_v27  ;;  %v591_v41 = vunpack.c.h.bf16 (!%p4248_p0), %v328_v27  ;;  %v592_v43 = vunpack.c.l.bf16 (!%p4248_p0), %v329_v32  ;;  %v593_v48 = vunpack.c.l.bf16 (!%p4248_p0), %v330_v35  ;;  %v344_v23 = vld [vmem:[%s4904_s15 + $0xa8] sm:$0xff] (!%p4248_p0) }
  0x98   : > { %v961_v37 = vadd.f32 %v960_v29, %v581_v18  ;;  %v1088_v38 = vadd.f32 %v1087_v30, %v582_v19  ;;  %v1215_v39 = vadd.f32 %v1214_v31, %v583_v21  ;;  %v594_v49 = vunpack.c.h.bf16 %v330_v35  ;;  %v346_v31 = vld [vmem:[%s4904_s15 + $0xb4] sm:$0xff] }
  0x99   : > { %v595_v51 = vunpack.c.h.bf16 %v329_v32  ;;  %v596_v55 = vunpack.c.l.bf16 %v332_v42  ;;  %v597_v56 = vunpack.c.h.bf16 %v332_v42  ;;  %v598_v58 = vunpack.c.l.bf16 %v333_v47 }
  0x9a   : > { %v962_v44 = vadd.f32 %v961_v37, %v584_v25  ;;  %v1089_v45 = vadd.f32 %v1088_v38, %v585_v26  ;;  %v1216_v46 = vadd.f32 %v1215_v39, %v586_v28  ;;  %v599_v63 = vunpack.c.l.bf16 %v334_v50  ;;  %v345_v28 = vld [vmem:[%s4904_s15 + $0xb0] ss:$12 sps:$4 sm:$0xff]   ;;  %v348_v38 = vld [vmem:[%s4904_s15 + $0xc0] sm:$0xff] }
  0x9b   : > { %v600_v0 = vunpack.c.h.bf16 %v334_v50  ;;  %v601_v2 = vunpack.c.h.bf16 %v333_v47  ;;  %v602_v6 = vunpack.c.l.bf16 %v336_v57  ;;  %v603_v7 = vunpack.c.h.bf16 %v336_v57 }
  0x9c   : > { %v963_v52 = vadd.f32 %v962_v44, %v587_v33  ;;  %v1090_v53 = vadd.f32 %v1089_v45, %v588_v34  ;;  %v1217_v54 = vadd.f32 %v1216_v46, %v589_v36  ;;  %v604_v9 = vunpack.c.l.bf16 %v337_v62  ;;  %v350_v46 = vld [vmem:[%s4904_s15 + $0xcc] sm:$0xff] }
  0x9d   : > { %v605_v14 = vunpack.c.l.bf16 %v338_v1  ;;  %v606_v15 = vunpack.c.h.bf16 %v338_v1  ;;  %v607_v17 = vunpack.c.h.bf16 %v337_v62  ;;  %v608_v21 = vunpack.c.l.bf16 %v340_v8 }
  0x9e   : > { %v964_v59 = vadd.f32 %v963_v52, %v590_v40  ;;  %v1091_v60 = vadd.f32 %v1090_v53, %v591_v41  ;;  %v1218_v61 = vadd.f32 %v1217_v54, %v592_v43  ;;  %v609_v22 = vunpack.c.h.bf16 %v340_v8  ;;  %v349_v43 = vld [vmem:[%s4904_s15 + $0xc8] ss:$12 sps:$4 sm:$0xff]   ;;  %v352_v53 = vld [vmem:[%s4904_s15 + $0xd8] sm:$0xff] }
  0x9f   : > { %v610_v24 = vunpack.c.l.bf16 %v341_v13  ;;  %v611_v29 = vunpack.c.l.bf16 %v342_v16  ;;  %v612_v30 = vunpack.c.h.bf16 %v342_v16  ;;  %v613_v32 = vunpack.c.h.bf16 %v341_v13 }
  0xa0   : > { %v965_v3 = vadd.f32 %v964_v59, %v593_v48  ;;  %v1092_v4 = vadd.f32 %v1091_v60, %v594_v49  ;;  %v1219_v5 = vadd.f32 %v1218_v61, %v595_v51  ;;  %v614_v36 = vunpack.c.l.bf16 %v344_v23  ;;  %v354_v61 = vld [vmem:[%s4904_s15 + $0xe4] sm:$0xff] }
  0xa1   : > { %v615_v37 = vunpack.c.h.bf16 %v344_v23  ;;  %v616_v39 = vunpack.c.l.bf16 %v345_v28  ;;  %v617_v44 = vunpack.c.l.bf16 %v346_v31  ;;  %v618_v45 = vunpack.c.h.bf16 %v346_v31 }
  0xa2   : > { %v966_v10 = vadd.f32 %v965_v3, %v596_v55  ;;  %v1093_v11 = vadd.f32 %v1092_v4, %v597_v56  ;;  %v1220_v12 = vadd.f32 %v1219_v5, %v598_v58  ;;  %v619_v47 = vunpack.c.h.bf16 %v345_v28  ;;  %v353_v58 = vld [vmem:[%s4904_s15 + $0xe0] ss:$12 sps:$4 sm:$0xff]   ;;  %v356_v4 = vld [vmem:[%s4904_s15 + $0xf0] sm:$0xff] }
  0xa3   : > { %v620_v51 = vunpack.c.l.bf16 %v348_v38  ;;  %v621_v52 = vunpack.c.h.bf16 %v348_v38  ;;  %v622_v54 = vunpack.c.l.bf16 %v349_v43  ;;  %v623_v59 = vunpack.c.l.bf16 %v350_v46 }
  0xa4   : > { %v967_v18 = vadd.f32 %v966_v10, %v599_v63  ;;  %v1094_v19 = vadd.f32 %v1093_v11, %v600_v0  ;;  %v1221_v20 = vadd.f32 %v1220_v12, %v601_v2  ;;  %v624_v60 = vunpack.c.h.bf16 %v350_v46  ;;  %v358_v12 = vld [vmem:[%s4904_s15 + $0xfc] sm:$0xff] }
  0xa5   : > { %v625_v62 = vunpack.c.h.bf16 %v349_v43  ;;  %v626_v2 = vunpack.c.l.bf16 %v352_v53  ;;  %v627_v3 = vunpack.c.h.bf16 %v352_v53  ;;  %v628_v5 = vunpack.c.l.bf16 %v353_v58 }
  0xa6   : > { %v968_v25 = vadd.f32 %v967_v18, %v602_v6  ;;  %v1095_v26 = vadd.f32 %v1094_v19, %v603_v7  ;;  %v1222_v27 = vadd.f32 %v1221_v20, %v604_v9  ;;  %v357_v9 = vld [vmem:[%s4904_s15 + $0xf8] ss:$12 sps:$4 sm:$0xff]   ;;  %v629_v10 = vunpack.c.l.bf16 %v354_v61  ;;  %v360_v19 = vld [vmem:[%s4904_s15 + $0x108] sm:$0xff] }
  0xa7   : > { %v630_v11 = vunpack.c.h.bf16 %v354_v61  ;;  %v631_v13 = vunpack.c.h.bf16 %v353_v58  ;;  %v633_v18 = vunpack.c.h.bf16 %v356_v4  ;;  %v634_v20 = vunpack.c.l.bf16 %v357_v9 }
  0xa8   : > { %v969_v33 = vadd.f32 %v968_v25, %v605_v14  ;;  %v1096_v34 = vadd.f32 %v1095_v26, %v606_v15  ;;  %v1223_v35 = vadd.f32 %v1222_v27, %v607_v17  ;;  %v632_v17 = vunpack.c.l.bf16 %v356_v4  ;;  %v362_v27 = vld [vmem:[%s4904_s15 + $0x114] sm:$0xff] }
  0xa9   : > { %v635_v25 = vunpack.c.l.bf16 %v358_v12  ;;  %v636_v26 = vunpack.c.h.bf16 %v358_v12  ;;  %v637_v28 = vunpack.c.h.bf16 %v357_v9 }
  0xaa   : > { %v970_v40 = vadd.f32 %v969_v33, %v608_v21  ;;  %v1097_v41 = vadd.f32 %v1096_v34, %v609_v22  ;;  %v1224_v42 = vadd.f32 %v1223_v35, %v610_v24  ;;  %v361_v24 = vld [vmem:[%s4904_s15 + $0x110] ss:$12 sps:$4 sm:$0xff]   ;;  %v639_v33 = vunpack.c.h.bf16 %v360_v19  ;;  %v364_v34 = vld [vmem:[%s4904_s15 + $0x120] sm:$0xff] }
  0xab   : > { %v640_v35 = vunpack.c.l.bf16 %v361_v24  ;;  %v643_v43 = vunpack.c.h.bf16 %v361_v24 }
  0xac   : > { %v971_v48 = vadd.f32 %v970_v40, %v611_v29  ;;  %v1098_v49 = vadd.f32 %v1097_v41, %v612_v30  ;;  %v1225_v50 = vadd.f32 %v1224_v42, %v613_v32  ;;  %v638_v32 = vunpack.c.l.bf16 %v360_v19  ;;  %v366_v42 = vld [vmem:[%s4904_s15 + $0x12c] sm:$0xff] }
  0xad   : > { %v641_v40 = vunpack.c.l.bf16 %v362_v27  ;;  %v642_v41 = vunpack.c.h.bf16 %v362_v27 }
  0xae   : > { %v972_v55 = vadd.f32 %v971_v48, %v614_v36  ;;  %v1099_v56 = vadd.f32 %v1098_v49, %v615_v37  ;;  %v1226_v57 = vadd.f32 %v1225_v50, %v616_v39  ;;  %v365_v39 = vld [vmem:[%s4904_s15 + $0x128] ss:$12 sps:$4 sm:$0xff]   ;;  %v645_v48 = vunpack.c.h.bf16 %v364_v34  ;;  %v368_v49 = vld [vmem:[%s4904_s15 + $0x138] sm:$0xff] }
  0xaf   : > { %v646_v50 = vunpack.c.l.bf16 %v365_v39  ;;  %v649_v58 = vunpack.c.h.bf16 %v365_v39 }
  0xb0   : > { %v973_v63 = vadd.f32 %v972_v55, %v617_v44  ;;  %v1100_v0 = vadd.f32 %v1099_v56, %v618_v45  ;;  %v1227_v1 = vadd.f32 %v1226_v57, %v619_v47  ;;  %v644_v47 = vunpack.c.l.bf16 %v364_v34  ;;  %v370_v57 = vld [vmem:[%s4904_s15 + $0x144] sm:$0xff] }
  0xb1   : > { %v647_v55 = vunpack.c.l.bf16 %v366_v42  ;;  %v648_v56 = vunpack.c.h.bf16 %v366_v42 }
  0xb2   : > { %v974_v6 = vadd.f32 %v973_v63, %v620_v51  ;;  %v1101_v7 = vadd.f32 %v1100_v0, %v621_v52  ;;  %v1228_v8 = vadd.f32 %v1227_v1, %v622_v54  ;;  %v369_v54 = vld [vmem:[%s4904_s15 + $0x140] ss:$12 sps:$4 sm:$0xff]   ;;  %v651_v63 = vunpack.c.h.bf16 %v368_v49  ;;  %v372_v0 = vld [vmem:[%s4904_s15 + $0x150] sm:$0xff] }
  0xb3   : > { %v652_v1 = vunpack.c.l.bf16 %v369_v54  ;;  %v655_v9 = vunpack.c.h.bf16 %v369_v54 }
  0xb4   : > { %v975_v14 = vadd.f32 %v974_v6, %v623_v59  ;;  %v1102_v15 = vadd.f32 %v1101_v7, %v624_v60  ;;  %v1229_v16 = vadd.f32 %v1228_v8, %v625_v62  ;;  %v650_v62 = vunpack.c.l.bf16 %v368_v49  ;;  %v374_v8 = vld [vmem:[%s4904_s15 + $0x15c] sm:$0xff] }
  0xb5   : > { %v653_v6 = vunpack.c.l.bf16 %v370_v57  ;;  %v654_v7 = vunpack.c.h.bf16 %v370_v57 }
  0xb6   : > { %v976_v21 = vadd.f32 %v975_v14, %v626_v2  ;;  %v1103_v22 = vadd.f32 %v1102_v15, %v627_v3  ;;  %v1230_v23 = vadd.f32 %v1229_v16, %v628_v5  ;;  %v373_v5 = vld [vmem:[%s4904_s15 + $0x158] ss:$12 sps:$4 sm:$0xff]   ;;  %v657_v14 = vunpack.c.h.bf16 %v372_v0  ;;  %v376_v15 = vld [vmem:[%s4904_s15 + $0x168] sm:$0xff] }
  0xb7   : > { %v658_v16 = vunpack.c.l.bf16 %v373_v5  ;;  %v661_v24 = vunpack.c.h.bf16 %v373_v5 }
  0xb8   : > { %v977_v29 = vadd.f32 %v976_v21, %v629_v10  ;;  %v1104_v30 = vadd.f32 %v1103_v22, %v630_v11  ;;  %v1231_v31 = vadd.f32 %v1230_v23, %v631_v13  ;;  %v656_v13 = vunpack.c.l.bf16 %v372_v0  ;;  %v378_v23 = vld [vmem:[%s4904_s15 + $0x174] sm:$0xff] }
  0xb9   : > { %v659_v21 = vunpack.c.l.bf16 %v374_v8  ;;  %v660_v22 = vunpack.c.h.bf16 %v374_v8 }
  0xba   : > { %v978_v36 = vadd.f32 %v977_v29, %v632_v17  ;;  %v1105_v37 = vadd.f32 %v1104_v30, %v633_v18  ;;  %v1232_v38 = vadd.f32 %v1231_v31, %v634_v20  ;;  %v377_v20 = vld [vmem:[%s4904_s15 + $0x170] ss:$12 sps:$4 sm:$0xff]   ;;  %v663_v29 = vunpack.c.h.bf16 %v376_v15  ;;  %v380_v30 = vld [vmem:[%s4904_s15 + $0x180] sm:$0xff] }
  0xbb   : > { %v664_v31 = vunpack.c.l.bf16 %v377_v20  ;;  %v667_v39 = vunpack.c.h.bf16 %v377_v20 }
  0xbc   : > { %v979_v44 = vadd.f32 %v978_v36, %v635_v25  ;;  %v1106_v45 = vadd.f32 %v1105_v37, %v636_v26  ;;  %v1233_v46 = vadd.f32 %v1232_v38, %v637_v28  ;;  %v662_v28 = vunpack.c.l.bf16 %v376_v15  ;;  %v382_v38 = vld [vmem:[%s4904_s15 + $0x18c] sm:$0xff] }
  0xbd   : > { %v665_v36 = vunpack.c.l.bf16 %v378_v23  ;;  %v666_v37 = vunpack.c.h.bf16 %v378_v23 }
  0xbe   : > { %v980_v51 = vadd.f32 %v979_v44, %v638_v32  ;;  %v1107_v52 = vadd.f32 %v1106_v45, %v639_v33  ;;  %v1234_v53 = vadd.f32 %v1233_v46, %v640_v35  ;;  %v381_v35 = vld [vmem:[%s4904_s15 + $0x188] ss:$12 sps:$4 sm:$0xff]   ;;  %v669_v44 = vunpack.c.h.bf16 %v380_v30  ;;  %v384_v45 = vld [vmem:[%s4904_s15 + $0x198] sm:$0xff] }
  0xbf   : > { %v670_v46 = vunpack.c.l.bf16 %v381_v35  ;;  %v673_v54 = vunpack.c.h.bf16 %v381_v35 }
  0xc0   : > { %v981_v59 = vadd.f32 %v980_v51, %v641_v40  ;;  %v1108_v60 = vadd.f32 %v1107_v52, %v642_v41  ;;  %v1235_v61 = vadd.f32 %v1234_v53, %v643_v43  ;;  %v668_v43 = vunpack.c.l.bf16 %v380_v30  ;;  %v386_v53 = vld [vmem:[%s4904_s15 + $0x1a4] sm:$0xff] }
  0xc1   : > { %v671_v51 = vunpack.c.l.bf16 %v382_v38  ;;  %v672_v52 = vunpack.c.h.bf16 %v382_v38 }
  0xc2   : > { %v982_v2 = vadd.f32 %v981_v59, %v644_v47  ;;  %v1109_v3 = vadd.f32 %v1108_v60, %v645_v48  ;;  %v1236_v4 = vadd.f32 %v1235_v61, %v646_v50  ;;  %v385_v50 = vld [vmem:[%s4904_s15 + $0x1a0] ss:$12 sps:$4 sm:$0xff]   ;;  %v675_v59 = vunpack.c.h.bf16 %v384_v45  ;;  %v388_v60 = vld [vmem:[%s4904_s15 + $0x1b0] sm:$0xff] }
  0xc3   : > { %v676_v61 = vunpack.c.l.bf16 %v385_v50  ;;  %v679_v5 = vunpack.c.h.bf16 %v385_v50 }
  0xc4   : > { %v983_v10 = vadd.f32 %v982_v2, %v647_v55  ;;  %v1110_v11 = vadd.f32 %v1109_v3, %v648_v56  ;;  %v1237_v12 = vadd.f32 %v1236_v4, %v649_v58  ;;  %v674_v58 = vunpack.c.l.bf16 %v384_v45  ;;  %v390_v4 = vld [vmem:[%s4904_s15 + $0x1bc] sm:$0xff] }
  0xc5   : > { %v677_v2 = vunpack.c.l.bf16 %v386_v53  ;;  %v678_v3 = vunpack.c.h.bf16 %v386_v53 }
  0xc6   : > { %v984_v17 = vadd.f32 %v983_v10, %v650_v62  ;;  %v1111_v18 = vadd.f32 %v1110_v11, %v651_v63  ;;  %v1238_v19 = vadd.f32 %v1237_v12, %v652_v1  ;;  %v389_v1 = vld [vmem:[%s4904_s15 + $0x1b8] ss:$12 sps:$4 sm:$0xff]   ;;  %v681_v10 = vunpack.c.h.bf16 %v388_v60  ;;  %v392_v11 = vld [vmem:[%s4904_s15 + $0x1c8] sm:$0xff] }
  0xc7   : > { %v682_v12 = vunpack.c.l.bf16 %v389_v1  ;;  %v685_v20 = vunpack.c.h.bf16 %v389_v1 }
  0xc8   : > { %v985_v25 = vadd.f32 %v984_v17, %v653_v6  ;;  %v1112_v26 = vadd.f32 %v1111_v18, %v654_v7  ;;  %v1239_v27 = vadd.f32 %v1238_v19, %v655_v9  ;;  %v680_v9 = vunpack.c.l.bf16 %v388_v60  ;;  %v394_v19 = vld [vmem:[%s4904_s15 + $0x1d4] sm:$0xff] }
  0xc9   : > { %v683_v17 = vunpack.c.l.bf16 %v390_v4  ;;  %v684_v18 = vunpack.c.h.bf16 %v390_v4 }
  0xca   : > { %v986_v32 = vadd.f32 %v985_v25, %v656_v13  ;;  %v1113_v33 = vadd.f32 %v1112_v26, %v657_v14  ;;  %v1240_v34 = vadd.f32 %v1239_v27, %v658_v16  ;;  %v393_v16 = vld [vmem:[%s4904_s15 + $0x1d0] ss:$12 sps:$4 sm:$0xff]   ;;  %v687_v25 = vunpack.c.h.bf16 %v392_v11  ;;  %v396_v26 = vld [vmem:[%s4904_s15 + $0x1e0] sm:$0xff] }
  0xcb   : > { %v688_v27 = vunpack.c.l.bf16 %v393_v16  ;;  %v691_v35 = vunpack.c.h.bf16 %v393_v16 }
  0xcc   : > { %v987_v40 = vadd.f32 %v986_v32, %v659_v21  ;;  %v1114_v41 = vadd.f32 %v1113_v33, %v660_v22  ;;  %v1241_v42 = vadd.f32 %v1240_v34, %v661_v24  ;;  %v686_v24 = vunpack.c.l.bf16 %v392_v11  ;;  %v398_v34 = vld [vmem:[%s4904_s15 + $0x1ec] sm:$0xff] }
  0xcd   : > { %v689_v32 = vunpack.c.l.bf16 %v394_v19  ;;  %v690_v33 = vunpack.c.h.bf16 %v394_v19 }
  0xce   : > { %v988_v47 = vadd.f32 %v987_v40, %v662_v28  ;;  %v1115_v48 = vadd.f32 %v1114_v41, %v663_v29  ;;  %v1242_v49 = vadd.f32 %v1241_v42, %v664_v31  ;;  %v397_v31 = vld [vmem:[%s4904_s15 + $0x1e8] ss:$12 sps:$4 sm:$0xff]   ;;  %v693_v40 = vunpack.c.h.bf16 %v396_v26  ;;  %v400_v41 = vld [vmem:[%s4904_s15 + $0x1f8] sm:$0xff] }
  0xcf   : > { %v694_v42 = vunpack.c.l.bf16 %v397_v31  ;;  %v697_v50 = vunpack.c.h.bf16 %v397_v31 }
  0xd0   : > { %v989_v55 = vadd.f32 %v988_v47, %v665_v36  ;;  %v1116_v56 = vadd.f32 %v1115_v48, %v666_v37  ;;  %v1243_v57 = vadd.f32 %v1242_v49, %v667_v39  ;;  %v692_v39 = vunpack.c.l.bf16 %v396_v26  ;;  %v402_v49 = vld [vmem:[%s4904_s15 + $0x204] sm:$0xff] }
  0xd1   : > { %v695_v47 = vunpack.c.l.bf16 %v398_v34  ;;  %v696_v48 = vunpack.c.h.bf16 %v398_v34 }
  0xd2   : > { %v990_v62 = vadd.f32 %v989_v55, %v668_v43  ;;  %v1117_v63 = vadd.f32 %v1116_v56, %v669_v44  ;;  %v1244_v0 = vadd.f32 %v1243_v57, %v670_v46  ;;  %v401_v46 = vld [vmem:[%s4904_s15 + $0x200] ss:$12 sps:$4 sm:$0xff]   ;;  %v699_v55 = vunpack.c.h.bf16 %v400_v41  ;;  %v404_v56 = vld [vmem:[%s4904_s15 + $0x210] sm:$0xff] }
  0xd3   : > { %v700_v57 = vunpack.c.l.bf16 %v401_v46  ;;  %v703_v1 = vunpack.c.h.bf16 %v401_v46 }
  0xd4   : > { %v991_v6 = vadd.f32 %v990_v62, %v671_v51  ;;  %v1118_v7 = vadd.f32 %v1117_v63, %v672_v52  ;;  %v1245_v8 = vadd.f32 %v1244_v0, %v673_v54  ;;  %v698_v54 = vunpack.c.l.bf16 %v400_v41  ;;  %v406_v0 = vld [vmem:[%s4904_s15 + $0x21c] sm:$0xff] }
  0xd5   : > { %v701_v62 = vunpack.c.l.bf16 %v402_v49  ;;  %v702_v63 = vunpack.c.h.bf16 %v402_v49 }
  0xd6   : > { %v992_v13 = vadd.f32 %v991_v6, %v674_v58  ;;  %v1119_v14 = vadd.f32 %v1118_v7, %v675_v59  ;;  %v1246_v15 = vadd.f32 %v1245_v8, %v676_v61  ;;  %v405_v61 = vld [vmem:[%s4904_s15 + $0x218] ss:$12 sps:$4 sm:$0xff]   ;;  %v705_v6 = vunpack.c.h.bf16 %v404_v56  ;;  %v408_v7 = vld [vmem:[%s4904_s15 + $0x228] sm:$0xff] }
  0xd7   : > { %v706_v8 = vunpack.c.l.bf16 %v405_v61  ;;  %v709_v16 = vunpack.c.h.bf16 %v405_v61 }
  0xd8   : > { %v993_v21 = vadd.f32 %v992_v13, %v677_v2  ;;  %v1120_v22 = vadd.f32 %v1119_v14, %v678_v3  ;;  %v1247_v23 = vadd.f32 %v1246_v15, %v679_v5  ;;  %v704_v5 = vunpack.c.l.bf16 %v404_v56  ;;  %v410_v15 = vld [vmem:[%s4904_s15 + $0x234] sm:$0xff] }
  0xd9   : > { %v707_v13 = vunpack.c.l.bf16 %v406_v0  ;;  %v708_v14 = vunpack.c.h.bf16 %v406_v0 }
  0xda   : > { %v994_v28 = vadd.f32 %v993_v21, %v680_v9  ;;  %v1121_v29 = vadd.f32 %v1120_v22, %v681_v10  ;;  %v1248_v30 = vadd.f32 %v1247_v23, %v682_v12  ;;  %v409_v12 = vld [vmem:[%s4904_s15 + $0x230] ss:$12 sps:$4 sm:$0xff]   ;;  %v711_v21 = vunpack.c.h.bf16 %v408_v7  ;;  %v412_v22 = vld [vmem:[%s4904_s15 + $0x240] sm:$0xff] }
  0xdb   : > { %v712_v23 = vunpack.c.l.bf16 %v409_v12  ;;  %v715_v31 = vunpack.c.h.bf16 %v409_v12 }
  0xdc   : > { %v995_v36 = vadd.f32 %v994_v28, %v683_v17  ;;  %v1122_v37 = vadd.f32 %v1121_v29, %v684_v18  ;;  %v1249_v38 = vadd.f32 %v1248_v30, %v685_v20  ;;  %v710_v20 = vunpack.c.l.bf16 %v408_v7  ;;  %v414_v30 = vld [vmem:[%s4904_s15 + $0x24c] sm:$0xff] }
  0xdd   : > { %v713_v28 = vunpack.c.l.bf16 %v410_v15  ;;  %v714_v29 = vunpack.c.h.bf16 %v410_v15 }
  0xde   : > { %v996_v43 = vadd.f32 %v995_v36, %v686_v24  ;;  %v1123_v44 = vadd.f32 %v1122_v37, %v687_v25  ;;  %v1250_v45 = vadd.f32 %v1249_v38, %v688_v27  ;;  %v413_v27 = vld [vmem:[%s4904_s15 + $0x248] ss:$12 sps:$4 sm:$0xff]   ;;  %v717_v36 = vunpack.c.h.bf16 %v412_v22  ;;  %v416_v37 = vld [vmem:[%s4904_s15 + $0x258] sm:$0xff] }
  0xdf   : > { %v718_v38 = vunpack.c.l.bf16 %v413_v27  ;;  %v721_v46 = vunpack.c.h.bf16 %v413_v27 }
  0xe0   : > { %v997_v51 = vadd.f32 %v996_v43, %v689_v32  ;;  %v1124_v52 = vadd.f32 %v1123_v44, %v690_v33  ;;  %v1251_v53 = vadd.f32 %v1250_v45, %v691_v35  ;;  %v716_v35 = vunpack.c.l.bf16 %v412_v22  ;;  %v418_v45 = vld [vmem:[%s4904_s15 + $0x264] sm:$0xff] }
  0xe1   : > { %v719_v43 = vunpack.c.l.bf16 %v414_v30  ;;  %v720_v44 = vunpack.c.h.bf16 %v414_v30 }
  0xe2   : > { %v998_v58 = vadd.f32 %v997_v51, %v692_v39  ;;  %v1125_v59 = vadd.f32 %v1124_v52, %v693_v40  ;;  %v1252_v60 = vadd.f32 %v1251_v53, %v694_v42  ;;  %v417_v42 = vld [vmem:[%s4904_s15 + $0x260] ss:$12 sps:$4 sm:$0xff]   ;;  %v723_v51 = vunpack.c.h.bf16 %v416_v37  ;;  %v420_v52 = vld [vmem:[%s4904_s15 + $0x270] sm:$0xff] }
  0xe3   : > { %v724_v53 = vunpack.c.l.bf16 %v417_v42  ;;  %v727_v61 = vunpack.c.h.bf16 %v417_v42 }
  0xe4   : > { %v999_v2 = vadd.f32 %v998_v58, %v695_v47  ;;  %v1126_v3 = vadd.f32 %v1125_v59, %v696_v48  ;;  %v1253_v4 = vadd.f32 %v1252_v60, %v697_v50  ;;  %v722_v50 = vunpack.c.l.bf16 %v416_v37  ;;  %v422_v60 = vld [vmem:[%s4904_s15 + $0x27c] sm:$0xff] }
  0xe5   : > { %v725_v58 = vunpack.c.l.bf16 %v418_v45  ;;  %v726_v59 = vunpack.c.h.bf16 %v418_v45 }
  0xe6   : > { %v1000_v9 = vadd.f32 %v999_v2, %v698_v54  ;;  %v1127_v10 = vadd.f32 %v1126_v3, %v699_v55  ;;  %v1254_v11 = vadd.f32 %v1253_v4, %v700_v57  ;;  %v421_v57 = vld [vmem:[%s4904_s15 + $0x278] ss:$12 sps:$4 sm:$0xff]   ;;  %v729_v2 = vunpack.c.h.bf16 %v420_v52  ;;  %v424_v3 = vld [vmem:[%s4904_s15 + $0x288] sm:$0xff] }
  0xe7   : > { %v730_v4 = vunpack.c.l.bf16 %v421_v57  ;;  %v733_v12 = vunpack.c.h.bf16 %v421_v57 }
  0xe8   : > { %v1001_v17 = vadd.f32 %v1000_v9, %v701_v62  ;;  %v1128_v18 = vadd.f32 %v1127_v10, %v702_v63  ;;  %v1255_v19 = vadd.f32 %v1254_v11, %v703_v1  ;;  %v728_v1 = vunpack.c.l.bf16 %v420_v52  ;;  %v426_v11 = vld [vmem:[%s4904_s15 + $0x294] sm:$0xff] }
  0xe9   : > { %v731_v9 = vunpack.c.l.bf16 %v422_v60  ;;  %v732_v10 = vunpack.c.h.bf16 %v422_v60 }
  0xea   : > { %v1002_v24 = vadd.f32 %v1001_v17, %v704_v5  ;;  %v1129_v25 = vadd.f32 %v1128_v18, %v705_v6  ;;  %v1256_v26 = vadd.f32 %v1255_v19, %v706_v8  ;;  %v425_v8 = vld [vmem:[%s4904_s15 + $0x290] ss:$12 sps:$4 sm:$0xff]   ;;  %v735_v17 = vunpack.c.h.bf16 %v424_v3  ;;  %v428_v18 = vld [vmem:[%s4904_s15 + $0x2a0] sm:$0xff] }
  0xeb   : > { %v736_v19 = vunpack.c.l.bf16 %v425_v8  ;;  %v739_v27 = vunpack.c.h.bf16 %v425_v8 }
  0xec   : > { %v1003_v32 = vadd.f32 %v1002_v24, %v707_v13  ;;  %v1130_v33 = vadd.f32 %v1129_v25, %v708_v14  ;;  %v1257_v34 = vadd.f32 %v1256_v26, %v709_v16  ;;  %v734_v16 = vunpack.c.l.bf16 %v424_v3  ;;  %v430_v26 = vld [vmem:[%s4904_s15 + $0x2ac] sm:$0xff] }
  0xed   : > { %v737_v24 = vunpack.c.l.bf16 %v426_v11  ;;  %v738_v25 = vunpack.c.h.bf16 %v426_v11 }
  0xee   : > { %v1004_v39 = vadd.f32 %v1003_v32, %v710_v20  ;;  %v1131_v40 = vadd.f32 %v1130_v33, %v711_v21  ;;  %v1258_v41 = vadd.f32 %v1257_v34, %v712_v23  ;;  %v429_v23 = vld [vmem:[%s4904_s15 + $0x2a8] ss:$12 sps:$4 sm:$0xff]   ;;  %v741_v32 = vunpack.c.h.bf16 %v428_v18  ;;  %v432_v33 = vld [vmem:[%s4904_s15 + $0x2b8] sm:$0xff] }
  0xef   : > { %v742_v34 = vunpack.c.l.bf16 %v429_v23  ;;  %v745_v42 = vunpack.c.h.bf16 %v429_v23 }
  0xf0   : > { %v1005_v47 = vadd.f32 %v1004_v39, %v713_v28  ;;  %v1132_v48 = vadd.f32 %v1131_v40, %v714_v29  ;;  %v1259_v49 = vadd.f32 %v1258_v41, %v715_v31  ;;  %v740_v31 = vunpack.c.l.bf16 %v428_v18  ;;  %v434_v41 = vld [vmem:[%s4904_s15 + $0x2c4] sm:$0xff] }
  0xf1   : > { %v743_v39 = vunpack.c.l.bf16 %v430_v26  ;;  %v744_v40 = vunpack.c.h.bf16 %v430_v26 }
  0xf2   : > { %v1006_v54 = vadd.f32 %v1005_v47, %v716_v35  ;;  %v1133_v55 = vadd.f32 %v1132_v48, %v717_v36  ;;  %v1260_v56 = vadd.f32 %v1259_v49, %v718_v38  ;;  %v433_v38 = vld [vmem:[%s4904_s15 + $0x2c0] ss:$12 sps:$4 sm:$0xff]   ;;  %v747_v47 = vunpack.c.h.bf16 %v432_v33  ;;  %v436_v48 = vld [vmem:[%s4904_s15 + $0x2d0] sm:$0xff] }
  0xf3   : > { %v748_v49 = vunpack.c.l.bf16 %v433_v38  ;;  %v751_v57 = vunpack.c.h.bf16 %v433_v38 }
  0xf4   : > { %v1007_v62 = vadd.f32 %v1006_v54, %v719_v43  ;;  %v1134_v63 = vadd.f32 %v1133_v55, %v720_v44  ;;  %v1261_v0 = vadd.f32 %v1260_v56, %v721_v46  ;;  %v746_v46 = vunpack.c.l.bf16 %v432_v33  ;;  %v438_v56 = vld [vmem:[%s4904_s15 + $0x2dc] sm:$0xff] }
  0xf5   : > { %v749_v54 = vunpack.c.l.bf16 %v434_v41  ;;  %v750_v55 = vunpack.c.h.bf16 %v434_v41 }
  0xf6   : > { %v1008_v5 = vadd.f32 %v1007_v62, %v722_v50  ;;  %v1135_v6 = vadd.f32 %v1134_v63, %v723_v51  ;;  %v1262_v7 = vadd.f32 %v1261_v0, %v724_v53  ;;  %v437_v53 = vld [vmem:[%s4904_s15 + $0x2d8] ss:$12 sps:$4 sm:$0xff]   ;;  %v753_v62 = vunpack.c.h.bf16 %v436_v48  ;;  %v440_v63 = vld [vmem:[%s4904_s15 + $0x2e8] sm:$0xff] }
  0xf7   : > { %v754_v0 = vunpack.c.l.bf16 %v437_v53  ;;  %v757_v8 = vunpack.c.h.bf16 %v437_v53 }
  0xf8   : > { %v1009_v13 = vadd.f32 %v1008_v5, %v725_v58  ;;  %v1136_v14 = vadd.f32 %v1135_v6, %v726_v59  ;;  %v1263_v15 = vadd.f32 %v1262_v7, %v727_v61  ;;  %v752_v61 = vunpack.c.l.bf16 %v436_v48  ;;  %v442_v7 = vld [vmem:[%s4904_s15 + $0x2f4] sm:$0xff] }
  0xf9   : > { %v755_v5 = vunpack.c.l.bf16 %v438_v56  ;;  %v756_v6 = vunpack.c.h.bf16 %v438_v56 }
  0xfa   : > { %v1010_v20 = vadd.f32 %v1009_v13, %v728_v1  ;;  %v1137_v21 = vadd.f32 %v1136_v14, %v729_v2  ;;  %v1264_v22 = vadd.f32 %v1263_v15, %v730_v4  ;;  %v441_v4 = vld [vmem:[%s4904_s15 + $0x2f0] ss:$12 sps:$4 sm:$0xff]   ;;  %v759_v13 = vunpack.c.h.bf16 %v440_v63  ;;  %v444_v14 = vld [vmem:[%s4904_s15 + $0x300] sm:$0xff] }
  0xfb   : > { %v760_v15 = vunpack.c.l.bf16 %v441_v4  ;;  %v763_v23 = vunpack.c.h.bf16 %v441_v4 }
  0xfc   : > { %v1011_v28 = vadd.f32 %v1010_v20, %v731_v9  ;;  %v1138_v29 = vadd.f32 %v1137_v21, %v732_v10  ;;  %v1265_v30 = vadd.f32 %v1264_v22, %v733_v12  ;;  %v758_v12 = vunpack.c.l.bf16 %v440_v63  ;;  %v446_v22 = vld [vmem:[%s4904_s15 + $0x30c] sm:$0xff] }
  0xfd   : > { %v761_v20 = vunpack.c.l.bf16 %v442_v7  ;;  %v762_v21 = vunpack.c.h.bf16 %v442_v7 }
  0xfe   : > { %v1012_v35 = vadd.f32 %v1011_v28, %v734_v16  ;;  %v1139_v36 = vadd.f32 %v1138_v29, %v735_v17  ;;  %v1266_v37 = vadd.f32 %v1265_v30, %v736_v19  ;;  %v445_v19 = vld [vmem:[%s4904_s15 + $0x308] ss:$12 sps:$4 sm:$0xff]   ;;  %v765_v28 = vunpack.c.h.bf16 %v444_v14  ;;  %v448_v29 = vld [vmem:[%s4904_s15 + $0x318] sm:$0xff] }
  0xff   : > { %v766_v30 = vunpack.c.l.bf16 %v445_v19  ;;  %v769_v38 = vunpack.c.h.bf16 %v445_v19 }
 0x100   : > { %v1013_v43 = vadd.f32 %v1012_v35, %v737_v24  ;;  %v1140_v44 = vadd.f32 %v1139_v36, %v738_v25  ;;  %v1267_v45 = vadd.f32 %v1266_v37, %v739_v27  ;;  %v764_v27 = vunpack.c.l.bf16 %v444_v14  ;;  %v450_v37 = vld [vmem:[%s4904_s15 + $0x324] sm:$0xff] }
 0x101   : > { %v767_v35 = vunpack.c.l.bf16 %v446_v22  ;;  %v768_v36 = vunpack.c.h.bf16 %v446_v22 }
 0x102   : > { %v1014_v50 = vadd.f32 %v1013_v43, %v740_v31  ;;  %v1141_v51 = vadd.f32 %v1140_v44, %v741_v32  ;;  %v1268_v52 = vadd.f32 %v1267_v45, %v742_v34  ;;  %v449_v34 = vld [vmem:[%s4904_s15 + $0x320] ss:$12 sps:$4 sm:$0xff]   ;;  %v771_v43 = vunpack.c.h.bf16 %v448_v29  ;;  %v452_v44 = vld [vmem:[%s4904_s15 + $0x330] sm:$0xff] }
 0x103   : > { %v772_v45 = vunpack.c.l.bf16 %v449_v34  ;;  %v775_v53 = vunpack.c.h.bf16 %v449_v34 }
 0x104   : > { %v1015_v58 = vadd.f32 %v1014_v50, %v743_v39  ;;  %v1142_v59 = vadd.f32 %v1141_v51, %v744_v40  ;;  %v1269_v60 = vadd.f32 %v1268_v52, %v745_v42  ;;  %v770_v42 = vunpack.c.l.bf16 %v448_v29  ;;  %v454_v52 = vld [vmem:[%s4904_s15 + $0x33c] sm:$0xff] }
 0x105   : > { %v773_v50 = vunpack.c.l.bf16 %v450_v37  ;;  %v774_v51 = vunpack.c.h.bf16 %v450_v37 }
 0x106   : > { %v1016_v1 = vadd.f32 %v1015_v58, %v746_v46  ;;  %v1143_v2 = vadd.f32 %v1142_v59, %v747_v47  ;;  %v1270_v3 = vadd.f32 %v1269_v60, %v748_v49  ;;  %v453_v49 = vld [vmem:[%s4904_s15 + $0x338] ss:$12 sps:$4 sm:$0xff]   ;;  %v777_v58 = vunpack.c.h.bf16 %v452_v44  ;;  %v456_v59 = vld [vmem:[%s4904_s15 + $0x348] sm:$0xff] }
 0x107   : > { %v778_v60 = vunpack.c.l.bf16 %v453_v49  ;;  %v781_v4 = vunpack.c.h.bf16 %v453_v49 }
 0x108   : > { %v1017_v9 = vadd.f32 %v1016_v1, %v749_v54  ;;  %v1144_v10 = vadd.f32 %v1143_v2, %v750_v55  ;;  %v1271_v11 = vadd.f32 %v1270_v3, %v751_v57  ;;  %v776_v57 = vunpack.c.l.bf16 %v452_v44  ;;  %v458_v3 = vld [vmem:[%s4904_s15 + $0x354] sm:$0xff] }
 0x109   : > { %v779_v1 = vunpack.c.l.bf16 %v454_v52  ;;  %v780_v2 = vunpack.c.h.bf16 %v454_v52 }
 0x10a   : > { %v1018_v16 = vadd.f32 %v1017_v9, %v752_v61  ;;  %v1145_v17 = vadd.f32 %v1144_v10, %v753_v62  ;;  %v1272_v18 = vadd.f32 %v1271_v11, %v754_v0  ;;  %v457_v0 = vld [vmem:[%s4904_s15 + $0x350] ss:$12 sps:$4 sm:$0xff]   ;;  %v783_v9 = vunpack.c.h.bf16 %v456_v59  ;;  %v460_v10 = vld [vmem:[%s4904_s15 + $0x360] sm:$0xff] }
 0x10b   : > { %v784_v11 = vunpack.c.l.bf16 %v457_v0  ;;  %v787_v19 = vunpack.c.h.bf16 %v457_v0 }
 0x10c   : > { %v1019_v24 = vadd.f32 %v1018_v16, %v755_v5  ;;  %v1146_v25 = vadd.f32 %v1145_v17, %v756_v6  ;;  %v1273_v26 = vadd.f32 %v1272_v18, %v757_v8  ;;  %v782_v8 = vunpack.c.l.bf16 %v456_v59  ;;  %v462_v18 = vld [vmem:[%s4904_s15 + $0x36c] sm:$0xff] }
 0x10d   : > { %v785_v16 = vunpack.c.l.bf16 %v458_v3  ;;  %v786_v17 = vunpack.c.h.bf16 %v458_v3 }
 0x10e   : > { %v1020_v31 = vadd.f32 %v1019_v24, %v758_v12  ;;  %v1147_v32 = vadd.f32 %v1146_v25, %v759_v13  ;;  %v1274_v33 = vadd.f32 %v1273_v26, %v760_v15  ;;  %v461_v15 = vld [vmem:[%s4904_s15 + $0x368] ss:$12 sps:$4 sm:$0xff]   ;;  %v789_v24 = vunpack.c.h.bf16 %v460_v10  ;;  %v464_v25 = vld [vmem:[%s4904_s15 + $0x378] sm:$0xff] }
 0x10f   : > { %v790_v26 = vunpack.c.l.bf16 %v461_v15  ;;  %v793_v34 = vunpack.c.h.bf16 %v461_v15 }
 0x110   : > { %v1021_v39 = vadd.f32 %v1020_v31, %v761_v20  ;;  %v1148_v40 = vadd.f32 %v1147_v32, %v762_v21  ;;  %v1275_v41 = vadd.f32 %v1274_v33, %v763_v23  ;;  %v788_v23 = vunpack.c.l.bf16 %v460_v10  ;;  %v466_v33 = vld [vmem:[%s4904_s15 + $0x384] sm:$0xff] }
 0x111   : > { %v791_v31 = vunpack.c.l.bf16 %v462_v18  ;;  %v792_v32 = vunpack.c.h.bf16 %v462_v18 }
 0x112   : > { %v1022_v46 = vadd.f32 %v1021_v39, %v764_v27  ;;  %v1149_v47 = vadd.f32 %v1148_v40, %v765_v28  ;;  %v1276_v48 = vadd.f32 %v1275_v41, %v766_v30  ;;  %v465_v30 = vld [vmem:[%s4904_s15 + $0x380] ss:$12 sps:$4 sm:$0xff]   ;;  %v795_v39 = vunpack.c.h.bf16 %v464_v25  ;;  %v468_v40 = vld [vmem:[%s4904_s15 + $0x390] sm:$0xff] }
 0x113   : > { %v796_v41 = vunpack.c.l.bf16 %v465_v30  ;;  %v799_v49 = vunpack.c.h.bf16 %v465_v30 }
 0x114   : > { %v1023_v54 = vadd.f32 %v1022_v46, %v767_v35  ;;  %v1150_v55 = vadd.f32 %v1149_v47, %v768_v36  ;;  %v1277_v56 = vadd.f32 %v1276_v48, %v769_v38  ;;  %v794_v38 = vunpack.c.l.bf16 %v464_v25  ;;  %v470_v48 = vld [vmem:[%s4904_s15 + $0x39c] sm:$0xff] }
 0x115   : > { %v797_v46 = vunpack.c.l.bf16 %v466_v33  ;;  %v798_v47 = vunpack.c.h.bf16 %v466_v33 }
 0x116   : > { %v1024_v61 = vadd.f32 %v1023_v54, %v770_v42  ;;  %v1151_v62 = vadd.f32 %v1150_v55, %v771_v43  ;;  %v1278_v63 = vadd.f32 %v1277_v56, %v772_v45  ;;  %v469_v45 = vld [vmem:[%s4904_s15 + $0x398] ss:$12 sps:$4 sm:$0xff]   ;;  %v801_v54 = vunpack.c.h.bf16 %v468_v40  ;;  %v472_v55 = vld [vmem:[%s4904_s15 + $0x3a8] sm:$0xff] }
 0x117   : > { %v802_v56 = vunpack.c.l.bf16 %v469_v45  ;;  %v805_v0 = vunpack.c.h.bf16 %v469_v45 }
 0x118   : > { %v1025_v5 = vadd.f32 %v1024_v61, %v773_v50  ;;  %v1152_v6 = vadd.f32 %v1151_v62, %v774_v51  ;;  %v1279_v7 = vadd.f32 %v1278_v63, %v775_v53  ;;  %v800_v53 = vunpack.c.l.bf16 %v468_v40  ;;  %v474_v63 = vld [vmem:[%s4904_s15 + $0x3b4] sm:$0xff] }
 0x119   : > { %v803_v61 = vunpack.c.l.bf16 %v470_v48  ;;  %v804_v62 = vunpack.c.h.bf16 %v470_v48 }
 0x11a   : > { %v1026_v12 = vadd.f32 %v1025_v5, %v776_v57  ;;  %v1153_v13 = vadd.f32 %v1152_v6, %v777_v58  ;;  %v1280_v14 = vadd.f32 %v1279_v7, %v778_v60  ;;  %v473_v60 = vld [vmem:[%s4904_s15 + $0x3b0] ss:$12 sps:$4 sm:$0xff]   ;;  %v807_v5 = vunpack.c.h.bf16 %v472_v55  ;;  %v476_v6 = vld [vmem:[%s4904_s15 + $0x3c0] sm:$0xff] }
 0x11b   : > { %v808_v7 = vunpack.c.l.bf16 %v473_v60  ;;  %v811_v15 = vunpack.c.h.bf16 %v473_v60 }
 0x11c   : > { %v1027_v20 = vadd.f32 %v1026_v12, %v779_v1  ;;  %v1154_v21 = vadd.f32 %v1153_v13, %v780_v2  ;;  %v1281_v22 = vadd.f32 %v1280_v14, %v781_v4  ;;  %v806_v4 = vunpack.c.l.bf16 %v472_v55  ;;  %v478_v14 = vld [vmem:[%s4904_s15 + $0x3cc] sm:$0xff] }
 0x11d   : > { %v809_v12 = vunpack.c.l.bf16 %v474_v63  ;;  %v810_v13 = vunpack.c.h.bf16 %v474_v63 }
 0x11e   : > { %v1028_v27 = vadd.f32 %v1027_v20, %v782_v8  ;;  %v1155_v28 = vadd.f32 %v1154_v21, %v783_v9  ;;  %v1282_v29 = vadd.f32 %v1281_v22, %v784_v11  ;;  %v477_v11 = vld [vmem:[%s4904_s15 + $0x3c8] ss:$12 sps:$4 sm:$0xff]   ;;  %v813_v20 = vunpack.c.h.bf16 %v476_v6  ;;  %v480_v21 = vld [vmem:[%s4904_s15 + $0x3d8] sm:$0xff] }
 0x11f   : > { %v814_v22 = vunpack.c.l.bf16 %v477_v11  ;;  %v817_v30 = vunpack.c.h.bf16 %v477_v11 }
 0x120   : > { %v1029_v35 = vadd.f32 %v1028_v27, %v785_v16  ;;  %v1156_v36 = vadd.f32 %v1155_v28, %v786_v17  ;;  %v1283_v37 = vadd.f32 %v1282_v29, %v787_v19  ;;  %v812_v19 = vunpack.c.l.bf16 %v476_v6  ;;  %v482_v29 = vld [vmem:[%s4904_s15 + $0x3e4] sm:$0xff] }
 0x121   : > { %v815_v27 = vunpack.c.l.bf16 %v478_v14  ;;  %v816_v28 = vunpack.c.h.bf16 %v478_v14 }
 0x122   : > { %v1030_v42 = vadd.f32 %v1029_v35, %v788_v23  ;;  %v1157_v43 = vadd.f32 %v1156_v36, %v789_v24  ;;  %v1284_v44 = vadd.f32 %v1283_v37, %v790_v26  ;;  %v481_v26 = vld [vmem:[%s4904_s15 + $0x3e0] ss:$12 sps:$4 sm:$0xff]   ;;  %v819_v35 = vunpack.c.h.bf16 %v480_v21  ;;  %v484_v36 = vld [vmem:[%s4904_s15 + $0x3f0] sm:$0xff] }
 0x123   : > { %v820_v37 = vunpack.c.l.bf16 %v481_v26  ;;  %v823_v45 = vunpack.c.h.bf16 %v481_v26 }
 0x124   : > { %v1031_v50 = vadd.f32 %v1030_v42, %v791_v31  ;;  %v1158_v51 = vadd.f32 %v1157_v43, %v792_v32  ;;  %v1285_v52 = vadd.f32 %v1284_v44, %v793_v34  ;;  %v818_v34 = vunpack.c.l.bf16 %v480_v21  ;;  %v486_v44 = vld [vmem:[%s4904_s15 + $0x3fc] sm:$0xff] }
 0x125   : > { %v821_v42 = vunpack.c.l.bf16 %v482_v29  ;;  %v822_v43 = vunpack.c.h.bf16 %v482_v29 }
 0x126   : > { %v1032_v57 = vadd.f32 %v1031_v50, %v794_v38  ;;  %v1159_v58 = vadd.f32 %v1158_v51, %v795_v39  ;;  %v1286_v59 = vadd.f32 %v1285_v52, %v796_v41  ;;  %v485_v41 = vld [vmem:[%s4904_s15 + $0x3f8] ss:$12 sps:$4 sm:$0xff]   ;;  %v825_v50 = vunpack.c.h.bf16 %v484_v36  ;;  %v488_v51 = vld [vmem:[%s4904_s15 + $0x408] sm:$0xff] }
 0x127   : > { %v826_v52 = vunpack.c.l.bf16 %v485_v41  ;;  %v829_v60 = vunpack.c.h.bf16 %v485_v41 }
 0x128   : > { %v1033_v1 = vadd.f32 %v1032_v57, %v797_v46  ;;  %v1160_v2 = vadd.f32 %v1159_v58, %v798_v47  ;;  %v1287_v3 = vadd.f32 %v1286_v59, %v799_v49  ;;  %v824_v49 = vunpack.c.l.bf16 %v484_v36  ;;  %v490_v59 = vld [vmem:[%s4904_s15 + $0x414] sm:$0xff] }
 0x129   : > { %v827_v57 = vunpack.c.l.bf16 %v486_v44  ;;  %v828_v58 = vunpack.c.h.bf16 %v486_v44 }
 0x12a   : > { %v1034_v8 = vadd.f32 %v1033_v1, %v800_v53  ;;  %v1161_v9 = vadd.f32 %v1160_v2, %v801_v54  ;;  %v1288_v10 = vadd.f32 %v1287_v3, %v802_v56  ;;  %v489_v56 = vld [vmem:[%s4904_s15 + $0x410] ss:$12 sps:$4 sm:$0xff]   ;;  %v831_v1 = vunpack.c.h.bf16 %v488_v51  ;;  %v492_v2 = vld [vmem:[%s4904_s15 + $0x420] sm:$0xff] }
 0x12b   : > { %v832_v3 = vunpack.c.l.bf16 %v489_v56  ;;  %v835_v11 = vunpack.c.h.bf16 %v489_v56 }
 0x12c   : > { %v1035_v16 = vadd.f32 %v1034_v8, %v803_v61  ;;  %v1162_v17 = vadd.f32 %v1161_v9, %v804_v62  ;;  %v1289_v18 = vadd.f32 %v1288_v10, %v805_v0  ;;  %v830_v0 = vunpack.c.l.bf16 %v488_v51  ;;  %v494_v10 = vld [vmem:[%s4904_s15 + $0x42c] sm:$0xff] }
 0x12d   : > { %v833_v8 = vunpack.c.l.bf16 %v490_v59  ;;  %v834_v9 = vunpack.c.h.bf16 %v490_v59 }
 0x12e   : > { %v1036_v23 = vadd.f32 %v1035_v16, %v806_v4  ;;  %v1163_v24 = vadd.f32 %v1162_v17, %v807_v5  ;;  %v1290_v25 = vadd.f32 %v1289_v18, %v808_v7  ;;  %v493_v7 = vld [vmem:[%s4904_s15 + $0x428] ss:$12 sps:$4 sm:$0xff]   ;;  %v837_v16 = vunpack.c.h.bf16 %v492_v2  ;;  %v496_v17 = vld [vmem:[%s4904_s15 + $0x438] sm:$0xff] }
 0x12f   : > { %v838_v18 = vunpack.c.l.bf16 %v493_v7  ;;  %v841_v26 = vunpack.c.h.bf16 %v493_v7 }
 0x130   : > { %v1037_v31 = vadd.f32 %v1036_v23, %v809_v12  ;;  %v1164_v32 = vadd.f32 %v1163_v24, %v810_v13  ;;  %v1291_v33 = vadd.f32 %v1290_v25, %v811_v15  ;;  %v836_v15 = vunpack.c.l.bf16 %v492_v2  ;;  %v498_v25 = vld [vmem:[%s4904_s15 + $0x444] sm:$0xff] }
 0x131   : > { %v839_v23 = vunpack.c.l.bf16 %v494_v10  ;;  %v840_v24 = vunpack.c.h.bf16 %v494_v10 }
 0x132   : > { %v1038_v38 = vadd.f32 %v1037_v31, %v812_v19  ;;  %v1165_v39 = vadd.f32 %v1164_v32, %v813_v20  ;;  %v1292_v40 = vadd.f32 %v1291_v33, %v814_v22  ;;  %v497_v22 = vld [vmem:[%s4904_s15 + $0x440] ss:$12 sps:$4 sm:$0xff]   ;;  %v843_v31 = vunpack.c.h.bf16 %v496_v17  ;;  %v500_v32 = vld [vmem:[%s4904_s15 + $0x450] sm:$0xff] }
 0x133   : > { %v844_v33 = vunpack.c.l.bf16 %v497_v22  ;;  %v847_v41 = vunpack.c.h.bf16 %v497_v22 }
 0x134   : > { %v1039_v46 = vadd.f32 %v1038_v38, %v815_v27  ;;  %v1166_v47 = vadd.f32 %v1165_v39, %v816_v28  ;;  %v1293_v48 = vadd.f32 %v1292_v40, %v817_v30  ;;  %v842_v30 = vunpack.c.l.bf16 %v496_v17  ;;  %v502_v40 = vld [vmem:[%s4904_s15 + $0x45c] sm:$0xff] }
 0x135   : > { %v845_v38 = vunpack.c.l.bf16 %v498_v25  ;;  %v846_v39 = vunpack.c.h.bf16 %v498_v25 }
 0x136   : > { %v1040_v53 = vadd.f32 %v1039_v46, %v818_v34  ;;  %v1167_v54 = vadd.f32 %v1166_v47, %v819_v35  ;;  %v1294_v55 = vadd.f32 %v1293_v48, %v820_v37  ;;  %v501_v37 = vld [vmem:[%s4904_s15 + $0x458] ss:$12 sps:$4 sm:$0xff]   ;;  %v849_v46 = vunpack.c.h.bf16 %v500_v32  ;;  %v504_v47 = vld [vmem:[%s4904_s15 + $0x468] sm:$0xff] }
 0x137   : > { %v850_v48 = vunpack.c.l.bf16 %v501_v37  ;;  %v853_v56 = vunpack.c.h.bf16 %v501_v37 }
 0x138   : > { %v1041_v61 = vadd.f32 %v1040_v53, %v821_v42  ;;  %v1168_v62 = vadd.f32 %v1167_v54, %v822_v43  ;;  %v1295_v63 = vadd.f32 %v1294_v55, %v823_v45  ;;  %v848_v45 = vunpack.c.l.bf16 %v500_v32  ;;  %v506_v55 = vld [vmem:[%s4904_s15 + $0x474] sm:$0xff] }
 0x139   : > { %v851_v53 = vunpack.c.l.bf16 %v502_v40  ;;  %v852_v54 = vunpack.c.h.bf16 %v502_v40 }
 0x13a   : > { %v1042_v4 = vadd.f32 %v1041_v61, %v824_v49  ;;  %v1169_v5 = vadd.f32 %v1168_v62, %v825_v50  ;;  %v1296_v6 = vadd.f32 %v1295_v63, %v826_v52  ;;  %v505_v52 = vld [vmem:[%s4904_s15 + $0x470] ss:$12 sps:$4 sm:$0xff]   ;;  %v855_v61 = vunpack.c.h.bf16 %v504_v47  ;;  %v508_v62 = vld [vmem:[%s4904_s15 + $0x480] sm:$0xff] }
 0x13b   : > { %v856_v63 = vunpack.c.l.bf16 %v505_v52  ;;  %v859_v7 = vunpack.c.h.bf16 %v505_v52 }
 0x13c   : > { %v1043_v12 = vadd.f32 %v1042_v4, %v827_v57  ;;  %v1170_v13 = vadd.f32 %v1169_v5, %v828_v58  ;;  %v1297_v14 = vadd.f32 %v1296_v6, %v829_v60  ;;  %v854_v60 = vunpack.c.l.bf16 %v504_v47  ;;  %v510_v6 = vld [vmem:[%s4904_s15 + $0x48c] sm:$0xff] }
 0x13d   : > { %v857_v4 = vunpack.c.l.bf16 %v506_v55  ;;  %v858_v5 = vunpack.c.h.bf16 %v506_v55 }
 0x13e   : > { %v1044_v19 = vadd.f32 %v1043_v12, %v830_v0  ;;  %v1171_v20 = vadd.f32 %v1170_v13, %v831_v1  ;;  %v1298_v21 = vadd.f32 %v1297_v14, %v832_v3  ;;  %v509_v3 = vld [vmem:[%s4904_s15 + $0x488] ss:$12 sps:$4 sm:$0xff]   ;;  %v861_v12 = vunpack.c.h.bf16 %v508_v62  ;;  %v512_v13 = vld [vmem:[%s4904_s15 + $0x498] sm:$0xff] }
 0x13f   : > { %v862_v14 = vunpack.c.l.bf16 %v509_v3  ;;  %v865_v22 = vunpack.c.h.bf16 %v509_v3 }
 0x140   : > { %v1045_v27 = vadd.f32 %v1044_v19, %v833_v8  ;;  %v1172_v28 = vadd.f32 %v1171_v20, %v834_v9  ;;  %v1299_v29 = vadd.f32 %v1298_v21, %v835_v11  ;;  %v860_v11 = vunpack.c.l.bf16 %v508_v62  ;;  %v514_v21 = vld [vmem:[%s4904_s15 + $0x4a4] sm:$0xff] }
 0x141   : > { %v863_v19 = vunpack.c.l.bf16 %v510_v6  ;;  %v864_v20 = vunpack.c.h.bf16 %v510_v6 }
 0x142   : > { %v1046_v34 = vadd.f32 %v1045_v27, %v836_v15  ;;  %v1173_v35 = vadd.f32 %v1172_v28, %v837_v16  ;;  %v1300_v36 = vadd.f32 %v1299_v29, %v838_v18  ;;  %v513_v18 = vld [vmem:[%s4904_s15 + $0x4a0] ss:$12 sps:$4 sm:$0xff]   ;;  %v867_v27 = vunpack.c.h.bf16 %v512_v13  ;;  %v516_v28 = vld [vmem:[%s4904_s15 + $0x4b0] sm:$0xff] }
 0x143   : > { %v868_v29 = vunpack.c.l.bf16 %v513_v18  ;;  %v871_v37 = vunpack.c.h.bf16 %v513_v18 }
 0x144   : > { %v1047_v42 = vadd.f32 %v1046_v34, %v839_v23  ;;  %v1174_v43 = vadd.f32 %v1173_v35, %v840_v24  ;;  %v1301_v44 = vadd.f32 %v1300_v36, %v841_v26  ;;  %v866_v26 = vunpack.c.l.bf16 %v512_v13  ;;  %v518_v36 = vld [vmem:[%s4904_s15 + $0x4bc] sm:$0xff] }
 0x145   : > { %v869_v34 = vunpack.c.l.bf16 %v514_v21  ;;  %v870_v35 = vunpack.c.h.bf16 %v514_v21 }
 0x146   : > { %v1048_v49 = vadd.f32 %v1047_v42, %v842_v30  ;;  %v1175_v50 = vadd.f32 %v1174_v43, %v843_v31  ;;  %v1302_v51 = vadd.f32 %v1301_v44, %v844_v33  ;;  %v517_v33 = vld [vmem:[%s4904_s15 + $0x4b8] ss:$12 sps:$4 sm:$0xff]   ;;  %v873_v42 = vunpack.c.h.bf16 %v516_v28  ;;  %v520_v43 = vld [vmem:[%s4904_s15 + $0x4c8] sm:$0xff] }
 0x147   : > { %v874_v44 = vunpack.c.l.bf16 %v517_v33  ;;  %v877_v52 = vunpack.c.h.bf16 %v517_v33 }
 0x148   : > { %v1049_v57 = vadd.f32 %v1048_v49, %v845_v38  ;;  %v1176_v58 = vadd.f32 %v1175_v50, %v846_v39  ;;  %v1303_v59 = vadd.f32 %v1302_v51, %v847_v41  ;;  %v872_v41 = vunpack.c.l.bf16 %v516_v28  ;;  %v522_v51 = vld [vmem:[%s4904_s15 + $0x4d4] sm:$0xff] }
 0x149   : > { %v875_v49 = vunpack.c.l.bf16 %v518_v36  ;;  %v876_v50 = vunpack.c.h.bf16 %v518_v36 }
 0x14a   : > { %v1050_v0 = vadd.f32 %v1049_v57, %v848_v45  ;;  %v1177_v1 = vadd.f32 %v1176_v58, %v849_v46  ;;  %v1304_v2 = vadd.f32 %v1303_v59, %v850_v48  ;;  %v521_v48 = vld [vmem:[%s4904_s15 + $0x4d0] ss:$12 sps:$4 sm:$0xff]   ;;  %v879_v57 = vunpack.c.h.bf16 %v520_v43  ;;  %v524_v58 = vld [vmem:[%s4904_s15 + $0x4e0] sm:$0xff] }
 0x14b   : > { %v880_v59 = vunpack.c.l.bf16 %v521_v48  ;;  %v883_v3 = vunpack.c.h.bf16 %v521_v48 }
 0x14c   : > { %v1051_v8 = vadd.f32 %v1050_v0, %v851_v53  ;;  %v1178_v9 = vadd.f32 %v1177_v1, %v852_v54  ;;  %v1305_v10 = vadd.f32 %v1304_v2, %v853_v56  ;;  %v878_v56 = vunpack.c.l.bf16 %v520_v43  ;;  %v526_v2 = vld [vmem:[%s4904_s15 + $0x4ec] sm:$0xff] }
 0x14d   : > { %v881_v0 = vunpack.c.l.bf16 %v522_v51  ;;  %v882_v1 = vunpack.c.h.bf16 %v522_v51 }
 0x14e   : > { %v1052_v15 = vadd.f32 %v1051_v8, %v854_v60  ;;  %v1179_v16 = vadd.f32 %v1178_v9, %v855_v61  ;;  %v1306_v17 = vadd.f32 %v1305_v10, %v856_v63  ;;  %v525_v63 = vld [vmem:[%s4904_s15 + $0x4e8] ss:$12 sps:$4 sm:$0xff]   ;;  %v885_v8 = vunpack.c.h.bf16 %v524_v58  ;;  %v528_v9 = vld [vmem:[%s4904_s15 + $0x4f8] sm:$0xff] }
 0x14f   : > { %v886_v10 = vunpack.c.l.bf16 %v525_v63  ;;  %v889_v18 = vunpack.c.h.bf16 %v525_v63 }
 0x150   : > { %v1053_v23 = vadd.f32 %v1052_v15, %v857_v4  ;;  %v1180_v24 = vadd.f32 %v1179_v16, %v858_v5  ;;  %v1307_v25 = vadd.f32 %v1306_v17, %v859_v7  ;;  %v884_v7 = vunpack.c.l.bf16 %v524_v58  ;;  %v530_v17 = vld [vmem:[%s4904_s15 + $0x504] sm:$0xff] }
 0x151   : > { %v887_v15 = vunpack.c.l.bf16 %v526_v2  ;;  %v888_v16 = vunpack.c.h.bf16 %v526_v2 }
 0x152   : > { %v1054_v30 = vadd.f32 %v1053_v23, %v860_v11  ;;  %v1181_v31 = vadd.f32 %v1180_v24, %v861_v12  ;;  %v1308_v32 = vadd.f32 %v1307_v25, %v862_v14  ;;  %v529_v14 = vld [vmem:[%s4904_s15 + $0x500] ss:$12 sps:$4 sm:$0xff]   ;;  %v891_v23 = vunpack.c.h.bf16 %v528_v9  ;;  %v532_v24 = vld [vmem:[%s4904_s15 + $0x510] sm:$0xff] }
 0x153   : > { %v892_v25 = vunpack.c.l.bf16 %v529_v14  ;;  %v895_v33 = vunpack.c.h.bf16 %v529_v14 }
 0x154   : > { %v1055_v38 = vadd.f32 %v1054_v30, %v863_v19  ;;  %v1182_v39 = vadd.f32 %v1181_v31, %v864_v20  ;;  %v1309_v40 = vadd.f32 %v1308_v32, %v865_v22  ;;  %v890_v22 = vunpack.c.l.bf16 %v528_v9  ;;  %v534_v32 = vld [vmem:[%s4904_s15 + $0x51c] sm:$0xff] }
 0x155   : > { %v893_v30 = vunpack.c.l.bf16 %v530_v17  ;;  %v894_v31 = vunpack.c.h.bf16 %v530_v17 }
 0x156   : > { %v1056_v45 = vadd.f32 %v1055_v38, %v866_v26  ;;  %v1183_v46 = vadd.f32 %v1182_v39, %v867_v27  ;;  %v1310_v47 = vadd.f32 %v1309_v40, %v868_v29  ;;  %v533_v29 = vld [vmem:[%s4904_s15 + $0x518] ss:$12 sps:$4 sm:$0xff]   ;;  %v897_v38 = vunpack.c.h.bf16 %v532_v24  ;;  %v536_v39 = vld [vmem:[%s4904_s15 + $0x528] sm:$0xff] }
 0x157   : > { %v898_v40 = vunpack.c.l.bf16 %v533_v29  ;;  %v901_v48 = vunpack.c.h.bf16 %v533_v29 }
 0x158   : > { %v1057_v53 = vadd.f32 %v1056_v45, %v869_v34  ;;  %v1184_v54 = vadd.f32 %v1183_v46, %v870_v35  ;;  %v1311_v55 = vadd.f32 %v1310_v47, %v871_v37  ;;  %v896_v37 = vunpack.c.l.bf16 %v532_v24  ;;  %v538_v47 = vld [vmem:[%s4904_s15 + $0x534] sm:$0xff] }
 0x159   : > { %v899_v45 = vunpack.c.l.bf16 %v534_v32  ;;  %v900_v46 = vunpack.c.h.bf16 %v534_v32 }
 0x15a   : > { %v1058_v60 = vadd.f32 %v1057_v53, %v872_v41  ;;  %v1185_v61 = vadd.f32 %v1184_v54, %v873_v42  ;;  %v1312_v62 = vadd.f32 %v1311_v55, %v874_v44  ;;  %v537_v44 = vld [vmem:[%s4904_s15 + $0x530] ss:$12 sps:$4 sm:$0xff]   ;;  %v903_v53 = vunpack.c.h.bf16 %v536_v39  ;;  %v540_v54 = vld [vmem:[%s4904_s15 + $0x540] sm:$0xff] }
 0x15b   : > { %v904_v55 = vunpack.c.l.bf16 %v537_v44  ;;  %v907_v63 = vunpack.c.h.bf16 %v537_v44 }
 0x15c   : > { %v1059_v4 = vadd.f32 %v1058_v60, %v875_v49  ;;  %v1186_v5 = vadd.f32 %v1185_v61, %v876_v50  ;;  %v1313_v6 = vadd.f32 %v1312_v62, %v877_v52  ;;  %v902_v52 = vunpack.c.l.bf16 %v536_v39  ;;  %v542_v62 = vld [vmem:[%s4904_s15 + $0x54c] sm:$0xff] }
 0x15d   : > { %v905_v60 = vunpack.c.l.bf16 %v538_v47  ;;  %v906_v61 = vunpack.c.h.bf16 %v538_v47 }
 0x15e   : > { %v1060_v11 = vadd.f32 %v1059_v4, %v878_v56  ;;  %v1187_v12 = vadd.f32 %v1186_v5, %v879_v57  ;;  %v1314_v13 = vadd.f32 %v1313_v6, %v880_v59  ;;  %v541_v59 = vld [vmem:[%s4904_s15 + $0x548] ss:$12 sps:$4 sm:$0xff]   ;;  %v909_v4 = vunpack.c.h.bf16 %v540_v54  ;;  %v544_v5 = vld [vmem:[%s4904_s15 + $0x558] sm:$0xff] }
 0x15f   : > { %v910_v6 = vunpack.c.l.bf16 %v541_v59  ;;  %v913_v14 = vunpack.c.h.bf16 %v541_v59 }
 0x160   : > { %v1061_v19 = vadd.f32 %v1060_v11, %v881_v0  ;;  %v1188_v20 = vadd.f32 %v1187_v12, %v882_v1  ;;  %v1315_v21 = vadd.f32 %v1314_v13, %v883_v3  ;;  %v908_v3 = vunpack.c.l.bf16 %v540_v54  ;;  %v546_v13 = vld [vmem:[%s4904_s15 + $0x564] sm:$0xff] }
 0x161   : > { %v911_v11 = vunpack.c.l.bf16 %v542_v62  ;;  %v912_v12 = vunpack.c.h.bf16 %v542_v62 }
 0x162   : > { %v1062_v26 = vadd.f32 %v1061_v19, %v884_v7  ;;  %v1189_v27 = vadd.f32 %v1188_v20, %v885_v8  ;;  %v1316_v28 = vadd.f32 %v1315_v21, %v886_v10  ;;  %v545_v10 = vld [vmem:[%s4904_s15 + $0x560] ss:$12 sps:$4 sm:$0xff]   ;;  %v915_v19 = vunpack.c.h.bf16 %v544_v5  ;;  %v548_v20 = vld [vmem:[%s4904_s15 + $0x570] sm:$0xff] }
 0x163   : > { %v916_v21 = vunpack.c.l.bf16 %v545_v10  ;;  %v919_v29 = vunpack.c.h.bf16 %v545_v10 }
 0x164   : > { %v1063_v34 = vadd.f32 %v1062_v26, %v887_v15  ;;  %v1190_v35 = vadd.f32 %v1189_v27, %v888_v16  ;;  %v1317_v36 = vadd.f32 %v1316_v28, %v889_v18  ;;  %v914_v18 = vunpack.c.l.bf16 %v544_v5  ;;  %v550_v28 = vld [vmem:[%s4904_s15 + $0x57c] sm:$0xff] }
 0x165   : > { %v917_v26 = vunpack.c.l.bf16 %v546_v13  ;;  %v918_v27 = vunpack.c.h.bf16 %v546_v13 }
 0x166   : > { %v1064_v41 = vadd.f32 %v1063_v34, %v890_v22  ;;  %v1191_v42 = vadd.f32 %v1190_v35, %v891_v23  ;;  %v1318_v43 = vadd.f32 %v1317_v36, %v892_v25  ;;  %v549_v25 = vld [vmem:[%s4904_s15 + $0x578] ss:$12 sps:$4 sm:$0xff]   ;;  %v921_v34 = vunpack.c.h.bf16 %v548_v20  ;;  %v552_v35 = vld [vmem:[%s4904_s15 + $0x588] sm:$0xff] }
 0x167   : > { %v922_v36 = vunpack.c.l.bf16 %v549_v25  ;;  %v925_v44 = vunpack.c.h.bf16 %v549_v25 }
 0x168   : > { %v1065_v49 = vadd.f32 %v1064_v41, %v893_v30  ;;  %v1192_v50 = vadd.f32 %v1191_v42, %v894_v31  ;;  %v1319_v51 = vadd.f32 %v1318_v43, %v895_v33  ;;  %v920_v33 = vunpack.c.l.bf16 %v548_v20  ;;  %v554_v43 = vld [vmem:[%s4904_s15 + $0x594] sm:$0xff] }
 0x169   : > { %v923_v41 = vunpack.c.l.bf16 %v550_v28  ;;  %v924_v42 = vunpack.c.h.bf16 %v550_v28 }
 0x16a   : > { %v1066_v56 = vadd.f32 %v1065_v49, %v896_v37  ;;  %v1193_v57 = vadd.f32 %v1192_v50, %v897_v38  ;;  %v1320_v58 = vadd.f32 %v1319_v51, %v898_v40  ;;  %v553_v40 = vld [vmem:[%s4904_s15 + $0x590] ss:$12 sps:$4 sm:$0xff]   ;;  %v927_v49 = vunpack.c.h.bf16 %v552_v35  ;;  %v556_v50 = vld [vmem:[%s4904_s15 + $0x5a0] sm:$0xff] }
 0x16b   : > { %v928_v51 = vunpack.c.l.bf16 %v553_v40  ;;  %v931_v59 = vunpack.c.h.bf16 %v553_v40 }
 0x16c   : > { %v1067_v0 = vadd.f32 %v1066_v56, %v899_v45  ;;  %v1194_v1 = vadd.f32 %v1193_v57, %v900_v46  ;;  %v1321_v2 = vadd.f32 %v1320_v58, %v901_v48  ;;  %v926_v48 = vunpack.c.l.bf16 %v552_v35  ;;  %v558_v58 = vld [vmem:[%s4904_s15 + $0x5ac] sm:$0xff] }
 0x16d   : > { %v929_v56 = vunpack.c.l.bf16 %v554_v43  ;;  %v930_v57 = vunpack.c.h.bf16 %v554_v43 }
 0x16e   : > { %v1068_v7 = vadd.f32 %v1067_v0, %v902_v52  ;;  %v1195_v8 = vadd.f32 %v1194_v1, %v903_v53  ;;  %v1322_v9 = vadd.f32 %v1321_v2, %v904_v55  ;;  %v557_v55 = vld [vmem:[%s4904_s15 + $0x5a8] ss:$12 sps:$4 sm:$0xff]   ;;  %v933_v0 = vunpack.c.h.bf16 %v556_v50  ;;  %v560_v1 = vld [vmem:[%s4904_s15 + $0x5b8] sm:$0xff] }
 0x16f   : > { %v934_v2 = vunpack.c.l.bf16 %v557_v55  ;;  %v937_v10 = vunpack.c.h.bf16 %v557_v55 }
 0x170   : > { %v1069_v15 = vadd.f32 %v1068_v7, %v905_v60  ;;  %v1196_v16 = vadd.f32 %v1195_v8, %v906_v61  ;;  %v1323_v17 = vadd.f32 %v1322_v9, %v907_v63  ;;  %v932_v63 = vunpack.c.l.bf16 %v556_v50  ;;  %v562_v9 = vld [vmem:[%s4904_s15 + $0x5c4] sm:$0xff] }
 0x171   : > { %v935_v7 = vunpack.c.l.bf16 %v558_v58  ;;  %v936_v8 = vunpack.c.h.bf16 %v558_v58 }
 0x172   : > { %v1070_v22 = vadd.f32 %v1069_v15, %v908_v3  ;;  %v1197_v23 = vadd.f32 %v1196_v16, %v909_v4  ;;  %v1324_v24 = vadd.f32 %v1323_v17, %v910_v6  ;;  %v561_v6 = vld [vmem:[%s4904_s15 + $0x5c0] ss:$12 sps:$4 sm:$0xff]   ;;  %v939_v15 = vunpack.c.h.bf16 %v560_v1  ;;  %v564_v16 = vld [vmem:[%s4904_s15 + $0x5d0] sm:$0xff] }
 0x173   : > { %v940_v17 = vunpack.c.l.bf16 %v561_v6  ;;  %v943_v25 = vunpack.c.h.bf16 %v561_v6 }
 0x174   : > { %v1071_v30 = vadd.f32 %v1070_v22, %v911_v11  ;;  %v1198_v31 = vadd.f32 %v1197_v23, %v912_v12  ;;  %v1325_v32 = vadd.f32 %v1324_v24, %v913_v14  ;;  %v938_v14 = vunpack.c.l.bf16 %v560_v1  ;;  %v566_v24 = vld [vmem:[%s4904_s15 + $0x5dc] sm:$0xff] }
 0x175   : > { %v941_v22 = vunpack.c.l.bf16 %v562_v9  ;;  %v942_v23 = vunpack.c.h.bf16 %v562_v9 }
 0x176   : > { %v1072_v37 = vadd.f32 %v1071_v30, %v914_v18  ;;  %v1199_v38 = vadd.f32 %v1198_v31, %v915_v19  ;;  %v1326_v39 = vadd.f32 %v1325_v32, %v916_v21  ;;  %v565_v21 = vld [vmem:[%s4904_s15 + $0x5d8] ss:$12 sps:$4 sm:$0xff]   ;;  %v945_v30 = vunpack.c.h.bf16 %v564_v16  ;;  %v568_v31 = vld [vmem:[%s4904_s15 + $0x5e8] sm:$0xff] }
 0x177   : > { %v946_v32 = vunpack.c.l.bf16 %v565_v21  ;;  %v949_v40 = vunpack.c.h.bf16 %v565_v21 }
 0x178   : > { %v1073_v45 = vadd.f32 %v1072_v37, %v917_v26  ;;  %v1200_v46 = vadd.f32 %v1199_v38, %v918_v27  ;;  %v1327_v47 = vadd.f32 %v1326_v39, %v919_v29  ;;  %v944_v29 = vunpack.c.l.bf16 %v564_v16  ;;  %v570_v39 = vld [vmem:[%s4904_s15 + $0x5f4] sm:$0xff] }
 0x179   : > { %v947_v37 = vunpack.c.l.bf16 %v566_v24  ;;  %v948_v38 = vunpack.c.h.bf16 %v566_v24  ;;  %v953_v50 = vunpack.c.l.bf16 %v570_v39 }
 0x17a   : > { %v1074_v52 = vadd.f32 %v1073_v45, %v920_v33  ;;  %v1201_v53 = vadd.f32 %v1200_v46, %v921_v34  ;;  %v1328_v54 = vadd.f32 %v1327_v47, %v922_v36  ;;  %v569_v36 = vld [vmem:[%s4904_s15 + $0x5f0] ss:$12 sps:$4 sm:$0xff]   ;;  %v951_v45 = vunpack.c.h.bf16 %v568_v31 }
 0x17b   : > { %v952_v46 = vunpack.c.l.bf16 %v569_v36 }
 0x17c   : > { %v1075_v60 = vadd.f32 %v1074_v52, %v923_v41  ;;  %v1202_v61 = vadd.f32 %v1201_v53, %v924_v42  ;;  %v1329_v62 = vadd.f32 %v1328_v54, %v925_v44  ;;  %v950_v44 = vunpack.c.l.bf16 %v568_v31 }
 0x17d   : > { %v955_v52 = vunpack.c.h.bf16 %v569_v36 }
 0x17e   : > { %v1076_v3 = vadd.f32 %v1075_v60, %v926_v48  ;;  %v1203_v4 = vadd.f32 %v1202_v61, %v927_v49  ;;  %v1330_v5 = vadd.f32 %v1329_v62, %v928_v51  ;;  %v954_v51 = vunpack.c.h.bf16 %v570_v39  ;;  %v957_v60 = vld [vmem:[%s4925_s24 + $0x8] sm:$0xff]  ;;  %v958_v61 = vld [vmem:[%s4925_s24 + $0x10] sm:$0xff] }
 0x180   : > { %v1077_v11 = vadd.f32 %v1076_v3, %v929_v56  ;;  %v1204_v12 = vadd.f32 %v1203_v4, %v930_v57  ;;  %v1331_v13 = vadd.f32 %v1330_v5, %v931_v59  ;;  %v956_v59 = vld [vmem:[%s4925_s24] sm:$0xff] }
 0x182   : > { %v1078_v18 = vadd.f32 %v1077_v11, %v932_v63  ;;  %v1205_v19 = vadd.f32 %v1204_v12, %v933_v0  ;;  %v1332_v20 = vadd.f32 %v1331_v13, %v934_v2 }
 0x184   : > { %v1079_v26 = vadd.f32 %v1078_v18, %v935_v7  ;;  %v1206_v27 = vadd.f32 %v1205_v19, %v936_v8  ;;  %v1333_v28 = vadd.f32 %v1332_v20, %v937_v10 }
 0x186   : > { %v1080_v33 = vadd.f32 %v1079_v26, %v938_v14  ;;  %v1207_v34 = vadd.f32 %v1206_v27, %v939_v15  ;;  %v1334_v35 = vadd.f32 %v1333_v28, %v940_v17 }
 0x188   : > { %v1081_v41 = vadd.f32 %v1080_v33, %v941_v22  ;;  %v1208_v42 = vadd.f32 %v1207_v34, %v942_v23  ;;  %v1335_v43 = vadd.f32 %v1334_v35, %v943_v25 }
 0x18a   : > { %v1082_v47 = vadd.f32 %v1081_v41, %v944_v29  ;;  %v1209_v48 = vadd.f32 %v1208_v42, %v945_v30  ;;  %v1336_v49 = vadd.f32 %v1335_v43, %v946_v32 }
 0x18c   : > { %v1083_v53 = vadd.f32 %v1082_v47, %v947_v37  ;;  %v1210_v54 = vadd.f32 %v1209_v48, %v948_v38  ;;  %v1337_v55 = vadd.f32 %v1336_v49, %v949_v40 }
 0x18e   : > { %v1084_v56 = vadd.f32 %v1083_v53, %v950_v44  ;;  %v1211_v57 = vadd.f32 %v1210_v54, %v951_v45  ;;  %v1338_v58 = vadd.f32 %v1337_v55, %v952_v46 }
 0x190   : > { %v1085_v62 = vadd.f32 %v1084_v56, %v953_v50  ;;  %v1212_v63 = vadd.f32 %v1211_v57, %v954_v51  ;;  %v1339_v0 = vadd.f32 %v1338_v58, %v955_v52 }
 0x192   : > { %v1340_v1 = vadd.f32 %v1085_v62, %v956_v59  ;;  %v1341_v2 = vadd.f32 %v1212_v63, %v957_v60  ;;  %v1342_v3 = vadd.f32 %v1339_v0, %v958_v61 }
 0x194   : > { %1343 = vst [vmem:[%s4925_s24] sm:$0xff] %v1340_v1  ;;  %1344 = vst [vmem:[%s4925_s24 + $0x8] sm:$0xff] %v1341_v2 }
 0x195   : > { %1345 = vst [vmem:[%s4925_s24 + $0x10] sm:$0xff] %v1342_v3 }
 0x196 PF: > { %p4249_p2 = scmp.ge.s32.totalorder %s4923_s7, 1 }
 0x197   : > { %v1350_v4 = vld [vmem:[%s4911_s5] sm:$0xff] (!%p4249_p2)  ;;  %v1351_v5 = vld [vmem:[%s4911_s5 + $0x8] ss:$12 sps:$4 sm:$0xff] (!%p4249_p2)   ;;  %v1352_v6 = vld [vmem:[%s4911_s5 + $0xc] sm:$0xff] (!%p4249_p2) }
 0x198   : > { %1349 = sbr.rel (%p4249_p2) target bundleno = 669 (0x29d), region = 48  ;;  %v1354_v7 = vld [vmem:[%s4911_s5 + $0x18] sm:$0xff] (!%p4249_p2)  ;;  %v1355_v8 = vld [vmem:[%s4911_s5 + $0x20] ss:$12 sps:$4 sm:$0xff] (!%p4249_p2)   ;;  %v1606_v9 = vunpack.c.l.bf16 (!%p4249_p2), %v1350_v4  ;;  %v1607_v10 = vunpack.c.h.bf16 (!%p4249_p2), %v1350_v4  ;;  %v1356_v11 = vld [vmem:[%s4911_s5 + $0x24] sm:$0xff] (!%p4249_p2)  ;;  %v1608_v12 = vunpack.c.l.bf16 (!%p4249_p2), %v1351_v5  ;;  %v1609_v13 = vunpack.c.l.bf16 (!%p4249_p2), %v1352_v6 }
 0x199   : > { %v1610_v14 = vunpack.c.h.bf16 (!%p4249_p2), %v1352_v6  ;;  %v1611_v15 = vunpack.c.h.bf16 (!%p4249_p2), %v1351_v5  ;;  %v1358_v16 = vld [vmem:[%s4911_s5 + $0x30] sm:$0xff] (!%p4249_p2)  ;;  %v1612_v17 = vunpack.c.l.bf16 (!%p4249_p2), %v1354_v7  ;;  %v1613_v18 = vunpack.c.h.bf16 (!%p4249_p2), %v1354_v7  ;;  %v1359_v20 = vld [vmem:[%s4911_s5 + $0x38] ss:$12 sps:$4 sm:$0xff] (!%p4249_p2)   ;;  %v1360_v23 = vld [vmem:[%s4911_s5 + $0x3c] sm:$0xff] (!%p4249_p2) }
 0x19a   : > { %v1614_v19 = vunpack.c.l.bf16 (!%p4249_p2), %v1355_v8  ;;  %v1615_v21 = vunpack.c.l.bf16 (!%p4249_p2), %v1356_v11  ;;  %v1616_v22 = vunpack.c.h.bf16 (!%p4249_p2), %v1356_v11  ;;  %v1617_v24 = vunpack.c.h.bf16 (!%p4249_p2), %v1355_v8  ;;  %v1362_v30 = vld [vmem:[%s4911_s5 + $0x48] sm:$0xff] (!%p4249_p2)  ;;  %v1363_v35 = vld [vmem:[%s4911_s5 + $0x50] ss:$12 sps:$4 sm:$0xff] (!%p4249_p2)   ;;  %v1364_v38 = vld [vmem:[%s4911_s5 + $0x54] sm:$0xff] (!%p4249_p2) }
 0x19b   : > { %v1993_v25 = vadd.f32 (!%p4249_p2), %v1609_v13, %v1606_v9  ;;  %v2120_v26 = vadd.f32 (!%p4249_p2), %v1610_v14, %v1607_v10  ;;  %v2247_v27 = vadd.f32 (!%p4249_p2), %v1611_v15, %v1608_v12  ;;  %v1618_v28 = vunpack.c.l.bf16 (!%p4249_p2), %v1358_v16  ;;  %v1366_v45 = vld [vmem:[%s4911_s5 + $0x60] sm:$0xff] (!%p4249_p2)  ;;  %v1367_v50 = vld [vmem:[%s4911_s5 + $0x68] ss:$12 sps:$4 sm:$0xff] (!%p4249_p2)   ;;  %v1368_v53 = vld [vmem:[%s4911_s5 + $0x6c] sm:$0xff] (!%p4249_p2) }
 0x19c   : > { %v1619_v29 = vunpack.c.h.bf16 (!%p4249_p2), %v1358_v16  ;;  %v1620_v31 = vunpack.c.l.bf16 (!%p4249_p2), %v1359_v20  ;;  %v1621_v36 = vunpack.c.l.bf16 (!%p4249_p2), %v1360_v23  ;;  %v1622_v37 = vunpack.c.h.bf16 (!%p4249_p2), %v1360_v23  ;;  %v1370_v60 = vld [vmem:[%s4911_s5 + $0x78] sm:$0xff] (!%p4249_p2)  ;;  %v1371_v1 = vld [vmem:[%s4911_s5 + $0x80] ss:$12 sps:$4 sm:$0xff] (!%p4249_p2)   ;;  %v1372_v4 = vld [vmem:[%s4911_s5 + $0x84] sm:$0xff] (!%p4249_p2) }
 0x19d   : > { %v1994_v32 = vadd.f32 (!%p4249_p2), %v1993_v25, %v1612_v17  ;;  %v2121_v33 = vadd.f32 (!%p4249_p2), %v2120_v26, %v1613_v18  ;;  %v2248_v34 = vadd.f32 (!%p4249_p2), %v2247_v27, %v1614_v19  ;;  %v1623_v39 = vunpack.c.h.bf16 (!%p4249_p2), %v1359_v20  ;;  %v1374_v11 = vld [vmem:[%s4911_s5 + $0x90] sm:$0xff] (!%p4249_p2)  ;;  %v1375_v16 = vld [vmem:[%s4911_s5 + $0x98] ss:$12 sps:$4 sm:$0xff] (!%p4249_p2)   ;;  %v1376_v19 = vld [vmem:[%s4911_s5 + $0x9c] sm:$0xff] (!%p4249_p2) }
 0x19e   : > { %v1624_v43 = vunpack.c.l.bf16 (!%p4249_p2), %v1362_v30  ;;  %v1625_v44 = vunpack.c.h.bf16 (!%p4249_p2), %v1362_v30  ;;  %v1626_v46 = vunpack.c.l.bf16 (!%p4249_p2), %v1363_v35  ;;  %v1627_v51 = vunpack.c.l.bf16 (!%p4249_p2), %v1364_v38  ;;  %v1378_v26 = vld [vmem:[%s4911_s5 + $0xa8] sm:$0xff] (!%p4249_p2) }
 0x19f   : > { %v1995_v40 = vadd.f32 %v1994_v32, %v1615_v21  ;;  %v2122_v41 = vadd.f32 %v2121_v33, %v1616_v22  ;;  %v2249_v42 = vadd.f32 %v2248_v34, %v1617_v24  ;;  %v1628_v52 = vunpack.c.h.bf16 %v1364_v38  ;;  %v1380_v34 = vld [vmem:[%s4911_s5 + $0xb4] sm:$0xff] }
 0x1a0   : > { %v1629_v54 = vunpack.c.h.bf16 %v1363_v35  ;;  %v1630_v58 = vunpack.c.l.bf16 %v1366_v45  ;;  %v1631_v59 = vunpack.c.h.bf16 %v1366_v45  ;;  %v1632_v61 = vunpack.c.l.bf16 %v1367_v50 }
 0x1a1   : > { %v1996_v47 = vadd.f32 %v1995_v40, %v1618_v28  ;;  %v2123_v48 = vadd.f32 %v2122_v41, %v1619_v29  ;;  %v2250_v49 = vadd.f32 %v2249_v42, %v1620_v31  ;;  %v1633_v2 = vunpack.c.l.bf16 %v1368_v53  ;;  %v1379_v31 = vld [vmem:[%s4911_s5 + $0xb0] ss:$12 sps:$4 sm:$0xff]   ;;  %v1382_v41 = vld [vmem:[%s4911_s5 + $0xc0] sm:$0xff] }
 0x1a2   : > { %v1634_v3 = vunpack.c.h.bf16 %v1368_v53  ;;  %v1635_v5 = vunpack.c.h.bf16 %v1367_v50  ;;  %v1636_v9 = vunpack.c.l.bf16 %v1370_v60  ;;  %v1637_v10 = vunpack.c.h.bf16 %v1370_v60 }
 0x1a3   : > { %v1997_v55 = vadd.f32 %v1996_v47, %v1621_v36  ;;  %v2124_v56 = vadd.f32 %v2123_v48, %v1622_v37  ;;  %v2251_v57 = vadd.f32 %v2250_v49, %v1623_v39  ;;  %v1638_v12 = vunpack.c.l.bf16 %v1371_v1  ;;  %v1384_v49 = vld [vmem:[%s4911_s5 + $0xcc] sm:$0xff] }
 0x1a4   : > { %v1639_v17 = vunpack.c.l.bf16 %v1372_v4  ;;  %v1640_v18 = vunpack.c.h.bf16 %v1372_v4  ;;  %v1641_v20 = vunpack.c.h.bf16 %v1371_v1  ;;  %v1642_v24 = vunpack.c.l.bf16 %v1374_v11 }
 0x1a5   : > { %v1998_v62 = vadd.f32 %v1997_v55, %v1624_v43  ;;  %v2125_v63 = vadd.f32 %v2124_v56, %v1625_v44  ;;  %v2252_v0 = vadd.f32 %v2251_v57, %v1626_v46  ;;  %v1643_v25 = vunpack.c.h.bf16 %v1374_v11  ;;  %v1383_v46 = vld [vmem:[%s4911_s5 + $0xc8] ss:$12 sps:$4 sm:$0xff]   ;;  %v1386_v56 = vld [vmem:[%s4911_s5 + $0xd8] sm:$0xff] }
 0x1a6   : > { %v1644_v27 = vunpack.c.l.bf16 %v1375_v16  ;;  %v1645_v32 = vunpack.c.l.bf16 %v1376_v19  ;;  %v1646_v33 = vunpack.c.h.bf16 %v1376_v19  ;;  %v1647_v35 = vunpack.c.h.bf16 %v1375_v16 }
 0x1a7   : > { %v1999_v6 = vadd.f32 %v1998_v62, %v1627_v51  ;;  %v2126_v7 = vadd.f32 %v2125_v63, %v1628_v52  ;;  %v2253_v8 = vadd.f32 %v2252_v0, %v1629_v54  ;;  %v1648_v39 = vunpack.c.l.bf16 %v1378_v26  ;;  %v1388_v0 = vld [vmem:[%s4911_s5 + $0xe4] sm:$0xff] }
 0x1a8   : > { %v1649_v40 = vunpack.c.h.bf16 %v1378_v26  ;;  %v1650_v42 = vunpack.c.l.bf16 %v1379_v31  ;;  %v1651_v47 = vunpack.c.l.bf16 %v1380_v34  ;;  %v1652_v48 = vunpack.c.h.bf16 %v1380_v34 }
 0x1a9   : > { %v2000_v13 = vadd.f32 %v1999_v6, %v1630_v58  ;;  %v2127_v14 = vadd.f32 %v2126_v7, %v1631_v59  ;;  %v2254_v15 = vadd.f32 %v2253_v8, %v1632_v61  ;;  %v1653_v50 = vunpack.c.h.bf16 %v1379_v31  ;;  %v1387_v61 = vld [vmem:[%s4911_s5 + $0xe0] ss:$12 sps:$4 sm:$0xff]   ;;  %v1390_v7 = vld [vmem:[%s4911_s5 + $0xf0] sm:$0xff] }
 0x1aa   : > { %v1654_v54 = vunpack.c.l.bf16 %v1382_v41  ;;  %v1655_v55 = vunpack.c.h.bf16 %v1382_v41  ;;  %v1656_v57 = vunpack.c.l.bf16 %v1383_v46  ;;  %v1657_v62 = vunpack.c.l.bf16 %v1384_v49 }
 0x1ab   : > { %v2001_v21 = vadd.f32 %v2000_v13, %v1633_v2  ;;  %v2128_v22 = vadd.f32 %v2127_v14, %v1634_v3  ;;  %v2255_v23 = vadd.f32 %v2254_v15, %v1635_v5  ;;  %v1658_v63 = vunpack.c.h.bf16 %v1384_v49  ;;  %v1392_v15 = vld [vmem:[%s4911_s5 + $0xfc] sm:$0xff] }
 0x1ac   : > { %v1659_v1 = vunpack.c.h.bf16 %v1383_v46  ;;  %v1660_v5 = vunpack.c.l.bf16 %v1386_v56  ;;  %v1661_v6 = vunpack.c.h.bf16 %v1386_v56  ;;  %v1662_v8 = vunpack.c.l.bf16 %v1387_v61 }
 0x1ad   : > { %v2002_v28 = vadd.f32 %v2001_v21, %v1636_v9  ;;  %v2129_v29 = vadd.f32 %v2128_v22, %v1637_v10  ;;  %v2256_v30 = vadd.f32 %v2255_v23, %v1638_v12  ;;  %v1391_v12 = vld [vmem:[%s4911_s5 + $0xf8] ss:$12 sps:$4 sm:$0xff]   ;;  %v1663_v13 = vunpack.c.l.bf16 %v1388_v0  ;;  %v1394_v22 = vld [vmem:[%s4911_s5 + $0x108] sm:$0xff] }
 0x1ae   : > { %v1664_v14 = vunpack.c.h.bf16 %v1388_v0  ;;  %v1665_v16 = vunpack.c.h.bf16 %v1387_v61  ;;  %v1667_v21 = vunpack.c.h.bf16 %v1390_v7  ;;  %v1668_v23 = vunpack.c.l.bf16 %v1391_v12 }
 0x1af   : > { %v2003_v36 = vadd.f32 %v2002_v28, %v1639_v17  ;;  %v2130_v37 = vadd.f32 %v2129_v29, %v1640_v18  ;;  %v2257_v38 = vadd.f32 %v2256_v30, %v1641_v20  ;;  %v1666_v20 = vunpack.c.l.bf16 %v1390_v7  ;;  %v1396_v30 = vld [vmem:[%s4911_s5 + $0x114] sm:$0xff] }
 0x1b0   : > { %v1669_v28 = vunpack.c.l.bf16 %v1392_v15  ;;  %v1670_v29 = vunpack.c.h.bf16 %v1392_v15  ;;  %v1671_v31 = vunpack.c.h.bf16 %v1391_v12 }
 0x1b1   : > { %v2004_v43 = vadd.f32 %v2003_v36, %v1642_v24  ;;  %v2131_v44 = vadd.f32 %v2130_v37, %v1643_v25  ;;  %v2258_v45 = vadd.f32 %v2257_v38, %v1644_v27  ;;  %v1395_v27 = vld [vmem:[%s4911_s5 + $0x110] ss:$12 sps:$4 sm:$0xff]   ;;  %v1673_v36 = vunpack.c.h.bf16 %v1394_v22  ;;  %v1398_v37 = vld [vmem:[%s4911_s5 + $0x120] sm:$0xff] }
 0x1b2   : > { %v1674_v38 = vunpack.c.l.bf16 %v1395_v27  ;;  %v1677_v46 = vunpack.c.h.bf16 %v1395_v27 }
 0x1b3   : > { %v2005_v51 = vadd.f32 %v2004_v43, %v1645_v32  ;;  %v2132_v52 = vadd.f32 %v2131_v44, %v1646_v33  ;;  %v2259_v53 = vadd.f32 %v2258_v45, %v1647_v35  ;;  %v1672_v35 = vunpack.c.l.bf16 %v1394_v22  ;;  %v1400_v45 = vld [vmem:[%s4911_s5 + $0x12c] sm:$0xff] }
 0x1b4   : > { %v1675_v43 = vunpack.c.l.bf16 %v1396_v30  ;;  %v1676_v44 = vunpack.c.h.bf16 %v1396_v30 }
 0x1b5   : > { %v2006_v58 = vadd.f32 %v2005_v51, %v1648_v39  ;;  %v2133_v59 = vadd.f32 %v2132_v52, %v1649_v40  ;;  %v2260_v60 = vadd.f32 %v2259_v53, %v1650_v42  ;;  %v1399_v42 = vld [vmem:[%s4911_s5 + $0x128] ss:$12 sps:$4 sm:$0xff]   ;;  %v1679_v51 = vunpack.c.h.bf16 %v1398_v37  ;;  %v1402_v52 = vld [vmem:[%s4911_s5 + $0x138] sm:$0xff] }
 0x1b6   : > { %v1680_v53 = vunpack.c.l.bf16 %v1399_v42  ;;  %v1683_v61 = vunpack.c.h.bf16 %v1399_v42 }
 0x1b7   : > { %v2007_v2 = vadd.f32 %v2006_v58, %v1651_v47  ;;  %v2134_v3 = vadd.f32 %v2133_v59, %v1652_v48  ;;  %v2261_v4 = vadd.f32 %v2260_v60, %v1653_v50  ;;  %v1678_v50 = vunpack.c.l.bf16 %v1398_v37  ;;  %v1404_v60 = vld [vmem:[%s4911_s5 + $0x144] sm:$0xff] }
 0x1b8   : > { %v1681_v58 = vunpack.c.l.bf16 %v1400_v45  ;;  %v1682_v59 = vunpack.c.h.bf16 %v1400_v45 }
 0x1b9   : > { %v2008_v9 = vadd.f32 %v2007_v2, %v1654_v54  ;;  %v2135_v10 = vadd.f32 %v2134_v3, %v1655_v55  ;;  %v2262_v11 = vadd.f32 %v2261_v4, %v1656_v57  ;;  %v1403_v57 = vld [vmem:[%s4911_s5 + $0x140] ss:$12 sps:$4 sm:$0xff]   ;;  %v1685_v2 = vunpack.c.h.bf16 %v1402_v52  ;;  %v1406_v3 = vld [vmem:[%s4911_s5 + $0x150] sm:$0xff] }
 0x1ba   : > { %v1686_v4 = vunpack.c.l.bf16 %v1403_v57  ;;  %v1689_v12 = vunpack.c.h.bf16 %v1403_v57 }
 0x1bb   : > { %v2009_v17 = vadd.f32 %v2008_v9, %v1657_v62  ;;  %v2136_v18 = vadd.f32 %v2135_v10, %v1658_v63  ;;  %v2263_v19 = vadd.f32 %v2262_v11, %v1659_v1  ;;  %v1684_v1 = vunpack.c.l.bf16 %v1402_v52  ;;  %v1408_v11 = vld [vmem:[%s4911_s5 + $0x15c] sm:$0xff] }
 0x1bc   : > { %v1687_v9 = vunpack.c.l.bf16 %v1404_v60  ;;  %v1688_v10 = vunpack.c.h.bf16 %v1404_v60 }
 0x1bd   : > { %v2010_v24 = vadd.f32 %v2009_v17, %v1660_v5  ;;  %v2137_v25 = vadd.f32 %v2136_v18, %v1661_v6  ;;  %v2264_v26 = vadd.f32 %v2263_v19, %v1662_v8  ;;  %v1407_v8 = vld [vmem:[%s4911_s5 + $0x158] ss:$12 sps:$4 sm:$0xff]   ;;  %v1691_v17 = vunpack.c.h.bf16 %v1406_v3  ;;  %v1410_v18 = vld [vmem:[%s4911_s5 + $0x168] sm:$0xff] }
 0x1be   : > { %v1692_v19 = vunpack.c.l.bf16 %v1407_v8  ;;  %v1695_v27 = vunpack.c.h.bf16 %v1407_v8 }
 0x1bf   : > { %v2011_v32 = vadd.f32 %v2010_v24, %v1663_v13  ;;  %v2138_v33 = vadd.f32 %v2137_v25, %v1664_v14  ;;  %v2265_v34 = vadd.f32 %v2264_v26, %v1665_v16  ;;  %v1690_v16 = vunpack.c.l.bf16 %v1406_v3  ;;  %v1412_v26 = vld [vmem:[%s4911_s5 + $0x174] sm:$0xff] }
 0x1c0   : > { %v1693_v24 = vunpack.c.l.bf16 %v1408_v11  ;;  %v1694_v25 = vunpack.c.h.bf16 %v1408_v11 }
 0x1c1   : > { %v2012_v39 = vadd.f32 %v2011_v32, %v1666_v20  ;;  %v2139_v40 = vadd.f32 %v2138_v33, %v1667_v21  ;;  %v2266_v41 = vadd.f32 %v2265_v34, %v1668_v23  ;;  %v1411_v23 = vld [vmem:[%s4911_s5 + $0x170] ss:$12 sps:$4 sm:$0xff]   ;;  %v1697_v32 = vunpack.c.h.bf16 %v1410_v18  ;;  %v1414_v33 = vld [vmem:[%s4911_s5 + $0x180] sm:$0xff] }
 0x1c2   : > { %v1698_v34 = vunpack.c.l.bf16 %v1411_v23  ;;  %v1701_v42 = vunpack.c.h.bf16 %v1411_v23 }
 0x1c3   : > { %v2013_v47 = vadd.f32 %v2012_v39, %v1669_v28  ;;  %v2140_v48 = vadd.f32 %v2139_v40, %v1670_v29  ;;  %v2267_v49 = vadd.f32 %v2266_v41, %v1671_v31  ;;  %v1696_v31 = vunpack.c.l.bf16 %v1410_v18  ;;  %v1416_v41 = vld [vmem:[%s4911_s5 + $0x18c] sm:$0xff] }
 0x1c4   : > { %v1699_v39 = vunpack.c.l.bf16 %v1412_v26  ;;  %v1700_v40 = vunpack.c.h.bf16 %v1412_v26 }
 0x1c5   : > { %v2014_v54 = vadd.f32 %v2013_v47, %v1672_v35  ;;  %v2141_v55 = vadd.f32 %v2140_v48, %v1673_v36  ;;  %v2268_v56 = vadd.f32 %v2267_v49, %v1674_v38  ;;  %v1415_v38 = vld [vmem:[%s4911_s5 + $0x188] ss:$12 sps:$4 sm:$0xff]   ;;  %v1703_v47 = vunpack.c.h.bf16 %v1414_v33  ;;  %v1418_v48 = vld [vmem:[%s4911_s5 + $0x198] sm:$0xff] }
 0x1c6   : > { %v1704_v49 = vunpack.c.l.bf16 %v1415_v38  ;;  %v1707_v57 = vunpack.c.h.bf16 %v1415_v38 }
 0x1c7   : > { %v2015_v62 = vadd.f32 %v2014_v54, %v1675_v43  ;;  %v2142_v63 = vadd.f32 %v2141_v55, %v1676_v44  ;;  %v2269_v0 = vadd.f32 %v2268_v56, %v1677_v46  ;;  %v1702_v46 = vunpack.c.l.bf16 %v1414_v33  ;;  %v1420_v56 = vld [vmem:[%s4911_s5 + $0x1a4] sm:$0xff] }
 0x1c8   : > { %v1705_v54 = vunpack.c.l.bf16 %v1416_v41  ;;  %v1706_v55 = vunpack.c.h.bf16 %v1416_v41 }
 0x1c9   : > { %v2016_v5 = vadd.f32 %v2015_v62, %v1678_v50  ;;  %v2143_v6 = vadd.f32 %v2142_v63, %v1679_v51  ;;  %v2270_v7 = vadd.f32 %v2269_v0, %v1680_v53  ;;  %v1419_v53 = vld [vmem:[%s4911_s5 + $0x1a0] ss:$12 sps:$4 sm:$0xff]   ;;  %v1709_v62 = vunpack.c.h.bf16 %v1418_v48  ;;  %v1422_v63 = vld [vmem:[%s4911_s5 + $0x1b0] sm:$0xff] }
 0x1ca   : > { %v1710_v0 = vunpack.c.l.bf16 %v1419_v53  ;;  %v1713_v8 = vunpack.c.h.bf16 %v1419_v53 }
 0x1cb   : > { %v2017_v13 = vadd.f32 %v2016_v5, %v1681_v58  ;;  %v2144_v14 = vadd.f32 %v2143_v6, %v1682_v59  ;;  %v2271_v15 = vadd.f32 %v2270_v7, %v1683_v61  ;;  %v1708_v61 = vunpack.c.l.bf16 %v1418_v48  ;;  %v1424_v7 = vld [vmem:[%s4911_s5 + $0x1bc] sm:$0xff] }
 0x1cc   : > { %v1711_v5 = vunpack.c.l.bf16 %v1420_v56  ;;  %v1712_v6 = vunpack.c.h.bf16 %v1420_v56 }
 0x1cd   : > { %v2018_v20 = vadd.f32 %v2017_v13, %v1684_v1  ;;  %v2145_v21 = vadd.f32 %v2144_v14, %v1685_v2  ;;  %v2272_v22 = vadd.f32 %v2271_v15, %v1686_v4  ;;  %v1423_v4 = vld [vmem:[%s4911_s5 + $0x1b8] ss:$12 sps:$4 sm:$0xff]   ;;  %v1715_v13 = vunpack.c.h.bf16 %v1422_v63  ;;  %v1426_v14 = vld [vmem:[%s4911_s5 + $0x1c8] sm:$0xff] }
 0x1ce   : > { %v1716_v15 = vunpack.c.l.bf16 %v1423_v4  ;;  %v1719_v23 = vunpack.c.h.bf16 %v1423_v4 }
 0x1cf   : > { %v2019_v28 = vadd.f32 %v2018_v20, %v1687_v9  ;;  %v2146_v29 = vadd.f32 %v2145_v21, %v1688_v10  ;;  %v2273_v30 = vadd.f32 %v2272_v22, %v1689_v12  ;;  %v1714_v12 = vunpack.c.l.bf16 %v1422_v63  ;;  %v1428_v22 = vld [vmem:[%s4911_s5 + $0x1d4] sm:$0xff] }
 0x1d0   : > { %v1717_v20 = vunpack.c.l.bf16 %v1424_v7  ;;  %v1718_v21 = vunpack.c.h.bf16 %v1424_v7 }
 0x1d1   : > { %v2020_v35 = vadd.f32 %v2019_v28, %v1690_v16  ;;  %v2147_v36 = vadd.f32 %v2146_v29, %v1691_v17  ;;  %v2274_v37 = vadd.f32 %v2273_v30, %v1692_v19  ;;  %v1427_v19 = vld [vmem:[%s4911_s5 + $0x1d0] ss:$12 sps:$4 sm:$0xff]   ;;  %v1721_v28 = vunpack.c.h.bf16 %v1426_v14  ;;  %v1430_v29 = vld [vmem:[%s4911_s5 + $0x1e0] sm:$0xff] }
 0x1d2   : > { %v1722_v30 = vunpack.c.l.bf16 %v1427_v19  ;;  %v1725_v38 = vunpack.c.h.bf16 %v1427_v19 }
 0x1d3   : > { %v2021_v43 = vadd.f32 %v2020_v35, %v1693_v24  ;;  %v2148_v44 = vadd.f32 %v2147_v36, %v1694_v25  ;;  %v2275_v45 = vadd.f32 %v2274_v37, %v1695_v27  ;;  %v1720_v27 = vunpack.c.l.bf16 %v1426_v14  ;;  %v1432_v37 = vld [vmem:[%s4911_s5 + $0x1ec] sm:$0xff] }
 0x1d4   : > { %v1723_v35 = vunpack.c.l.bf16 %v1428_v22  ;;  %v1724_v36 = vunpack.c.h.bf16 %v1428_v22 }
 0x1d5   : > { %v2022_v50 = vadd.f32 %v2021_v43, %v1696_v31  ;;  %v2149_v51 = vadd.f32 %v2148_v44, %v1697_v32  ;;  %v2276_v52 = vadd.f32 %v2275_v45, %v1698_v34  ;;  %v1431_v34 = vld [vmem:[%s4911_s5 + $0x1e8] ss:$12 sps:$4 sm:$0xff]   ;;  %v1727_v43 = vunpack.c.h.bf16 %v1430_v29  ;;  %v1434_v44 = vld [vmem:[%s4911_s5 + $0x1f8] sm:$0xff] }
 0x1d6   : > { %v1728_v45 = vunpack.c.l.bf16 %v1431_v34  ;;  %v1731_v53 = vunpack.c.h.bf16 %v1431_v34 }
 0x1d7   : > { %v2023_v58 = vadd.f32 %v2022_v50, %v1699_v39  ;;  %v2150_v59 = vadd.f32 %v2149_v51, %v1700_v40  ;;  %v2277_v60 = vadd.f32 %v2276_v52, %v1701_v42  ;;  %v1726_v42 = vunpack.c.l.bf16 %v1430_v29  ;;  %v1436_v52 = vld [vmem:[%s4911_s5 + $0x204] sm:$0xff] }
 0x1d8   : > { %v1729_v50 = vunpack.c.l.bf16 %v1432_v37  ;;  %v1730_v51 = vunpack.c.h.bf16 %v1432_v37 }
 0x1d9   : > { %v2024_v1 = vadd.f32 %v2023_v58, %v1702_v46  ;;  %v2151_v2 = vadd.f32 %v2150_v59, %v1703_v47  ;;  %v2278_v3 = vadd.f32 %v2277_v60, %v1704_v49  ;;  %v1435_v49 = vld [vmem:[%s4911_s5 + $0x200] ss:$12 sps:$4 sm:$0xff]   ;;  %v1733_v58 = vunpack.c.h.bf16 %v1434_v44  ;;  %v1438_v59 = vld [vmem:[%s4911_s5 + $0x210] sm:$0xff] }
 0x1da   : > { %v1734_v60 = vunpack.c.l.bf16 %v1435_v49  ;;  %v1737_v4 = vunpack.c.h.bf16 %v1435_v49 }
 0x1db   : > { %v2025_v9 = vadd.f32 %v2024_v1, %v1705_v54  ;;  %v2152_v10 = vadd.f32 %v2151_v2, %v1706_v55  ;;  %v2279_v11 = vadd.f32 %v2278_v3, %v1707_v57  ;;  %v1732_v57 = vunpack.c.l.bf16 %v1434_v44  ;;  %v1440_v3 = vld [vmem:[%s4911_s5 + $0x21c] sm:$0xff] }
 0x1dc   : > { %v1735_v1 = vunpack.c.l.bf16 %v1436_v52  ;;  %v1736_v2 = vunpack.c.h.bf16 %v1436_v52 }
 0x1dd   : > { %v2026_v16 = vadd.f32 %v2025_v9, %v1708_v61  ;;  %v2153_v17 = vadd.f32 %v2152_v10, %v1709_v62  ;;  %v2280_v18 = vadd.f32 %v2279_v11, %v1710_v0  ;;  %v1439_v0 = vld [vmem:[%s4911_s5 + $0x218] ss:$12 sps:$4 sm:$0xff]   ;;  %v1739_v9 = vunpack.c.h.bf16 %v1438_v59  ;;  %v1442_v10 = vld [vmem:[%s4911_s5 + $0x228] sm:$0xff] }
 0x1de   : > { %v1740_v11 = vunpack.c.l.bf16 %v1439_v0  ;;  %v1743_v19 = vunpack.c.h.bf16 %v1439_v0 }
 0x1df   : > { %v2027_v24 = vadd.f32 %v2026_v16, %v1711_v5  ;;  %v2154_v25 = vadd.f32 %v2153_v17, %v1712_v6  ;;  %v2281_v26 = vadd.f32 %v2280_v18, %v1713_v8  ;;  %v1738_v8 = vunpack.c.l.bf16 %v1438_v59  ;;  %v1444_v18 = vld [vmem:[%s4911_s5 + $0x234] sm:$0xff] }
 0x1e0   : > { %v1741_v16 = vunpack.c.l.bf16 %v1440_v3  ;;  %v1742_v17 = vunpack.c.h.bf16 %v1440_v3 }
 0x1e1   : > { %v2028_v31 = vadd.f32 %v2027_v24, %v1714_v12  ;;  %v2155_v32 = vadd.f32 %v2154_v25, %v1715_v13  ;;  %v2282_v33 = vadd.f32 %v2281_v26, %v1716_v15  ;;  %v1443_v15 = vld [vmem:[%s4911_s5 + $0x230] ss:$12 sps:$4 sm:$0xff]   ;;  %v1745_v24 = vunpack.c.h.bf16 %v1442_v10  ;;  %v1446_v25 = vld [vmem:[%s4911_s5 + $0x240] sm:$0xff] }
 0x1e2   : > { %v1746_v26 = vunpack.c.l.bf16 %v1443_v15  ;;  %v1749_v34 = vunpack.c.h.bf16 %v1443_v15 }
 0x1e3   : > { %v2029_v39 = vadd.f32 %v2028_v31, %v1717_v20  ;;  %v2156_v40 = vadd.f32 %v2155_v32, %v1718_v21  ;;  %v2283_v41 = vadd.f32 %v2282_v33, %v1719_v23  ;;  %v1744_v23 = vunpack.c.l.bf16 %v1442_v10  ;;  %v1448_v33 = vld [vmem:[%s4911_s5 + $0x24c] sm:$0xff] }
 0x1e4   : > { %v1747_v31 = vunpack.c.l.bf16 %v1444_v18  ;;  %v1748_v32 = vunpack.c.h.bf16 %v1444_v18 }
 0x1e5   : > { %v2030_v46 = vadd.f32 %v2029_v39, %v1720_v27  ;;  %v2157_v47 = vadd.f32 %v2156_v40, %v1721_v28  ;;  %v2284_v48 = vadd.f32 %v2283_v41, %v1722_v30  ;;  %v1447_v30 = vld [vmem:[%s4911_s5 + $0x248] ss:$12 sps:$4 sm:$0xff]   ;;  %v1751_v39 = vunpack.c.h.bf16 %v1446_v25  ;;  %v1450_v40 = vld [vmem:[%s4911_s5 + $0x258] sm:$0xff] }
 0x1e6   : > { %v1752_v41 = vunpack.c.l.bf16 %v1447_v30  ;;  %v1755_v49 = vunpack.c.h.bf16 %v1447_v30 }
 0x1e7   : > { %v2031_v54 = vadd.f32 %v2030_v46, %v1723_v35  ;;  %v2158_v55 = vadd.f32 %v2157_v47, %v1724_v36  ;;  %v2285_v56 = vadd.f32 %v2284_v48, %v1725_v38  ;;  %v1750_v38 = vunpack.c.l.bf16 %v1446_v25  ;;  %v1452_v48 = vld [vmem:[%s4911_s5 + $0x264] sm:$0xff] }
 0x1e8   : > { %v1753_v46 = vunpack.c.l.bf16 %v1448_v33  ;;  %v1754_v47 = vunpack.c.h.bf16 %v1448_v33 }
 0x1e9   : > { %v2032_v61 = vadd.f32 %v2031_v54, %v1726_v42  ;;  %v2159_v62 = vadd.f32 %v2158_v55, %v1727_v43  ;;  %v2286_v63 = vadd.f32 %v2285_v56, %v1728_v45  ;;  %v1451_v45 = vld [vmem:[%s4911_s5 + $0x260] ss:$12 sps:$4 sm:$0xff]   ;;  %v1757_v54 = vunpack.c.h.bf16 %v1450_v40  ;;  %v1454_v55 = vld [vmem:[%s4911_s5 + $0x270] sm:$0xff] }
 0x1ea   : > { %v1758_v56 = vunpack.c.l.bf16 %v1451_v45  ;;  %v1761_v0 = vunpack.c.h.bf16 %v1451_v45 }
 0x1eb   : > { %v2033_v5 = vadd.f32 %v2032_v61, %v1729_v50  ;;  %v2160_v6 = vadd.f32 %v2159_v62, %v1730_v51  ;;  %v2287_v7 = vadd.f32 %v2286_v63, %v1731_v53  ;;  %v1756_v53 = vunpack.c.l.bf16 %v1450_v40  ;;  %v1456_v63 = vld [vmem:[%s4911_s5 + $0x27c] sm:$0xff] }
 0x1ec   : > { %v1759_v61 = vunpack.c.l.bf16 %v1452_v48  ;;  %v1760_v62 = vunpack.c.h.bf16 %v1452_v48 }
 0x1ed   : > { %v2034_v12 = vadd.f32 %v2033_v5, %v1732_v57  ;;  %v2161_v13 = vadd.f32 %v2160_v6, %v1733_v58  ;;  %v2288_v14 = vadd.f32 %v2287_v7, %v1734_v60  ;;  %v1455_v60 = vld [vmem:[%s4911_s5 + $0x278] ss:$12 sps:$4 sm:$0xff]   ;;  %v1763_v5 = vunpack.c.h.bf16 %v1454_v55  ;;  %v1458_v6 = vld [vmem:[%s4911_s5 + $0x288] sm:$0xff] }
 0x1ee   : > { %v1764_v7 = vunpack.c.l.bf16 %v1455_v60  ;;  %v1767_v15 = vunpack.c.h.bf16 %v1455_v60 }
 0x1ef   : > { %v2035_v20 = vadd.f32 %v2034_v12, %v1735_v1  ;;  %v2162_v21 = vadd.f32 %v2161_v13, %v1736_v2  ;;  %v2289_v22 = vadd.f32 %v2288_v14, %v1737_v4  ;;  %v1762_v4 = vunpack.c.l.bf16 %v1454_v55  ;;  %v1460_v14 = vld [vmem:[%s4911_s5 + $0x294] sm:$0xff] }
 0x1f0   : > { %v1765_v12 = vunpack.c.l.bf16 %v1456_v63  ;;  %v1766_v13 = vunpack.c.h.bf16 %v1456_v63 }
 0x1f1   : > { %v2036_v27 = vadd.f32 %v2035_v20, %v1738_v8  ;;  %v2163_v28 = vadd.f32 %v2162_v21, %v1739_v9  ;;  %v2290_v29 = vadd.f32 %v2289_v22, %v1740_v11  ;;  %v1459_v11 = vld [vmem:[%s4911_s5 + $0x290] ss:$12 sps:$4 sm:$0xff]   ;;  %v1769_v20 = vunpack.c.h.bf16 %v1458_v6  ;;  %v1462_v21 = vld [vmem:[%s4911_s5 + $0x2a0] sm:$0xff] }
 0x1f2   : > { %v1770_v22 = vunpack.c.l.bf16 %v1459_v11  ;;  %v1773_v30 = vunpack.c.h.bf16 %v1459_v11 }
 0x1f3   : > { %v2037_v35 = vadd.f32 %v2036_v27, %v1741_v16  ;;  %v2164_v36 = vadd.f32 %v2163_v28, %v1742_v17  ;;  %v2291_v37 = vadd.f32 %v2290_v29, %v1743_v19  ;;  %v1768_v19 = vunpack.c.l.bf16 %v1458_v6  ;;  %v1464_v29 = vld [vmem:[%s4911_s5 + $0x2ac] sm:$0xff] }
 0x1f4   : > { %v1771_v27 = vunpack.c.l.bf16 %v1460_v14  ;;  %v1772_v28 = vunpack.c.h.bf16 %v1460_v14 }
 0x1f5   : > { %v2038_v42 = vadd.f32 %v2037_v35, %v1744_v23  ;;  %v2165_v43 = vadd.f32 %v2164_v36, %v1745_v24  ;;  %v2292_v44 = vadd.f32 %v2291_v37, %v1746_v26  ;;  %v1463_v26 = vld [vmem:[%s4911_s5 + $0x2a8] ss:$12 sps:$4 sm:$0xff]   ;;  %v1775_v35 = vunpack.c.h.bf16 %v1462_v21  ;;  %v1466_v36 = vld [vmem:[%s4911_s5 + $0x2b8] sm:$0xff] }
 0x1f6   : > { %v1776_v37 = vunpack.c.l.bf16 %v1463_v26  ;;  %v1779_v45 = vunpack.c.h.bf16 %v1463_v26 }
 0x1f7   : > { %v2039_v50 = vadd.f32 %v2038_v42, %v1747_v31  ;;  %v2166_v51 = vadd.f32 %v2165_v43, %v1748_v32  ;;  %v2293_v52 = vadd.f32 %v2292_v44, %v1749_v34  ;;  %v1774_v34 = vunpack.c.l.bf16 %v1462_v21  ;;  %v1468_v44 = vld [vmem:[%s4911_s5 + $0x2c4] sm:$0xff] }
 0x1f8   : > { %v1777_v42 = vunpack.c.l.bf16 %v1464_v29  ;;  %v1778_v43 = vunpack.c.h.bf16 %v1464_v29 }
 0x1f9   : > { %v2040_v57 = vadd.f32 %v2039_v50, %v1750_v38  ;;  %v2167_v58 = vadd.f32 %v2166_v51, %v1751_v39  ;;  %v2294_v59 = vadd.f32 %v2293_v52, %v1752_v41  ;;  %v1467_v41 = vld [vmem:[%s4911_s5 + $0x2c0] ss:$12 sps:$4 sm:$0xff]   ;;  %v1781_v50 = vunpack.c.h.bf16 %v1466_v36  ;;  %v1470_v51 = vld [vmem:[%s4911_s5 + $0x2d0] sm:$0xff] }
 0x1fa   : > { %v1782_v52 = vunpack.c.l.bf16 %v1467_v41  ;;  %v1785_v60 = vunpack.c.h.bf16 %v1467_v41 }
 0x1fb   : > { %v2041_v1 = vadd.f32 %v2040_v57, %v1753_v46  ;;  %v2168_v2 = vadd.f32 %v2167_v58, %v1754_v47  ;;  %v2295_v3 = vadd.f32 %v2294_v59, %v1755_v49  ;;  %v1780_v49 = vunpack.c.l.bf16 %v1466_v36  ;;  %v1472_v59 = vld [vmem:[%s4911_s5 + $0x2dc] sm:$0xff] }
 0x1fc   : > { %v1783_v57 = vunpack.c.l.bf16 %v1468_v44  ;;  %v1784_v58 = vunpack.c.h.bf16 %v1468_v44 }
 0x1fd   : > { %v2042_v8 = vadd.f32 %v2041_v1, %v1756_v53  ;;  %v2169_v9 = vadd.f32 %v2168_v2, %v1757_v54  ;;  %v2296_v10 = vadd.f32 %v2295_v3, %v1758_v56  ;;  %v1471_v56 = vld [vmem:[%s4911_s5 + $0x2d8] ss:$12 sps:$4 sm:$0xff]   ;;  %v1787_v1 = vunpack.c.h.bf16 %v1470_v51  ;;  %v1474_v2 = vld [vmem:[%s4911_s5 + $0x2e8] sm:$0xff] }
 0x1fe   : > { %v1788_v3 = vunpack.c.l.bf16 %v1471_v56  ;;  %v1791_v11 = vunpack.c.h.bf16 %v1471_v56 }
 0x1ff   : > { %v2043_v16 = vadd.f32 %v2042_v8, %v1759_v61  ;;  %v2170_v17 = vadd.f32 %v2169_v9, %v1760_v62  ;;  %v2297_v18 = vadd.f32 %v2296_v10, %v1761_v0  ;;  %v1786_v0 = vunpack.c.l.bf16 %v1470_v51  ;;  %v1476_v10 = vld [vmem:[%s4911_s5 + $0x2f4] sm:$0xff] }
 0x200   : > { %v1789_v8 = vunpack.c.l.bf16 %v1472_v59  ;;  %v1790_v9 = vunpack.c.h.bf16 %v1472_v59 }
 0x201   : > { %v2044_v23 = vadd.f32 %v2043_v16, %v1762_v4  ;;  %v2171_v24 = vadd.f32 %v2170_v17, %v1763_v5  ;;  %v2298_v25 = vadd.f32 %v2297_v18, %v1764_v7  ;;  %v1475_v7 = vld [vmem:[%s4911_s5 + $0x2f0] ss:$12 sps:$4 sm:$0xff]   ;;  %v1793_v16 = vunpack.c.h.bf16 %v1474_v2  ;;  %v1478_v17 = vld [vmem:[%s4911_s5 + $0x300] sm:$0xff] }
 0x202   : > { %v1794_v18 = vunpack.c.l.bf16 %v1475_v7  ;;  %v1797_v26 = vunpack.c.h.bf16 %v1475_v7 }
 0x203   : > { %v2045_v31 = vadd.f32 %v2044_v23, %v1765_v12  ;;  %v2172_v32 = vadd.f32 %v2171_v24, %v1766_v13  ;;  %v2299_v33 = vadd.f32 %v2298_v25, %v1767_v15  ;;  %v1792_v15 = vunpack.c.l.bf16 %v1474_v2  ;;  %v1480_v25 = vld [vmem:[%s4911_s5 + $0x30c] sm:$0xff] }
 0x204   : > { %v1795_v23 = vunpack.c.l.bf16 %v1476_v10  ;;  %v1796_v24 = vunpack.c.h.bf16 %v1476_v10 }
 0x205   : > { %v2046_v38 = vadd.f32 %v2045_v31, %v1768_v19  ;;  %v2173_v39 = vadd.f32 %v2172_v32, %v1769_v20  ;;  %v2300_v40 = vadd.f32 %v2299_v33, %v1770_v22  ;;  %v1479_v22 = vld [vmem:[%s4911_s5 + $0x308] ss:$12 sps:$4 sm:$0xff]   ;;  %v1799_v31 = vunpack.c.h.bf16 %v1478_v17  ;;  %v1482_v32 = vld [vmem:[%s4911_s5 + $0x318] sm:$0xff] }
 0x206   : > { %v1800_v33 = vunpack.c.l.bf16 %v1479_v22  ;;  %v1803_v41 = vunpack.c.h.bf16 %v1479_v22 }
 0x207   : > { %v2047_v46 = vadd.f32 %v2046_v38, %v1771_v27  ;;  %v2174_v47 = vadd.f32 %v2173_v39, %v1772_v28  ;;  %v2301_v48 = vadd.f32 %v2300_v40, %v1773_v30  ;;  %v1798_v30 = vunpack.c.l.bf16 %v1478_v17  ;;  %v1484_v40 = vld [vmem:[%s4911_s5 + $0x324] sm:$0xff] }
 0x208   : > { %v1801_v38 = vunpack.c.l.bf16 %v1480_v25  ;;  %v1802_v39 = vunpack.c.h.bf16 %v1480_v25 }
 0x209   : > { %v2048_v53 = vadd.f32 %v2047_v46, %v1774_v34  ;;  %v2175_v54 = vadd.f32 %v2174_v47, %v1775_v35  ;;  %v2302_v55 = vadd.f32 %v2301_v48, %v1776_v37  ;;  %v1483_v37 = vld [vmem:[%s4911_s5 + $0x320] ss:$12 sps:$4 sm:$0xff]   ;;  %v1805_v46 = vunpack.c.h.bf16 %v1482_v32  ;;  %v1486_v47 = vld [vmem:[%s4911_s5 + $0x330] sm:$0xff] }
 0x20a   : > { %v1806_v48 = vunpack.c.l.bf16 %v1483_v37  ;;  %v1809_v56 = vunpack.c.h.bf16 %v1483_v37 }
 0x20b   : > { %v2049_v61 = vadd.f32 %v2048_v53, %v1777_v42  ;;  %v2176_v62 = vadd.f32 %v2175_v54, %v1778_v43  ;;  %v2303_v63 = vadd.f32 %v2302_v55, %v1779_v45  ;;  %v1804_v45 = vunpack.c.l.bf16 %v1482_v32  ;;  %v1488_v55 = vld [vmem:[%s4911_s5 + $0x33c] sm:$0xff] }
 0x20c   : > { %v1807_v53 = vunpack.c.l.bf16 %v1484_v40  ;;  %v1808_v54 = vunpack.c.h.bf16 %v1484_v40 }
 0x20d   : > { %v2050_v4 = vadd.f32 %v2049_v61, %v1780_v49  ;;  %v2177_v5 = vadd.f32 %v2176_v62, %v1781_v50  ;;  %v2304_v6 = vadd.f32 %v2303_v63, %v1782_v52  ;;  %v1487_v52 = vld [vmem:[%s4911_s5 + $0x338] ss:$12 sps:$4 sm:$0xff]   ;;  %v1811_v61 = vunpack.c.h.bf16 %v1486_v47  ;;  %v1490_v62 = vld [vmem:[%s4911_s5 + $0x348] sm:$0xff] }
 0x20e   : > { %v1812_v63 = vunpack.c.l.bf16 %v1487_v52  ;;  %v1815_v7 = vunpack.c.h.bf16 %v1487_v52 }
 0x20f   : > { %v2051_v12 = vadd.f32 %v2050_v4, %v1783_v57  ;;  %v2178_v13 = vadd.f32 %v2177_v5, %v1784_v58  ;;  %v2305_v14 = vadd.f32 %v2304_v6, %v1785_v60  ;;  %v1810_v60 = vunpack.c.l.bf16 %v1486_v47  ;;  %v1492_v6 = vld [vmem:[%s4911_s5 + $0x354] sm:$0xff] }
 0x210   : > { %v1813_v4 = vunpack.c.l.bf16 %v1488_v55  ;;  %v1814_v5 = vunpack.c.h.bf16 %v1488_v55 }
 0x211   : > { %v2052_v19 = vadd.f32 %v2051_v12, %v1786_v0  ;;  %v2179_v20 = vadd.f32 %v2178_v13, %v1787_v1  ;;  %v2306_v21 = vadd.f32 %v2305_v14, %v1788_v3  ;;  %v1491_v3 = vld [vmem:[%s4911_s5 + $0x350] ss:$12 sps:$4 sm:$0xff]   ;;  %v1817_v12 = vunpack.c.h.bf16 %v1490_v62  ;;  %v1494_v13 = vld [vmem:[%s4911_s5 + $0x360] sm:$0xff] }
 0x212   : > { %v1818_v14 = vunpack.c.l.bf16 %v1491_v3  ;;  %v1821_v22 = vunpack.c.h.bf16 %v1491_v3 }
 0x213   : > { %v2053_v27 = vadd.f32 %v2052_v19, %v1789_v8  ;;  %v2180_v28 = vadd.f32 %v2179_v20, %v1790_v9  ;;  %v2307_v29 = vadd.f32 %v2306_v21, %v1791_v11  ;;  %v1816_v11 = vunpack.c.l.bf16 %v1490_v62  ;;  %v1496_v21 = vld [vmem:[%s4911_s5 + $0x36c] sm:$0xff] }
 0x214   : > { %v1819_v19 = vunpack.c.l.bf16 %v1492_v6  ;;  %v1820_v20 = vunpack.c.h.bf16 %v1492_v6 }
 0x215   : > { %v2054_v34 = vadd.f32 %v2053_v27, %v1792_v15  ;;  %v2181_v35 = vadd.f32 %v2180_v28, %v1793_v16  ;;  %v2308_v36 = vadd.f32 %v2307_v29, %v1794_v18  ;;  %v1495_v18 = vld [vmem:[%s4911_s5 + $0x368] ss:$12 sps:$4 sm:$0xff]   ;;  %v1823_v27 = vunpack.c.h.bf16 %v1494_v13  ;;  %v1498_v28 = vld [vmem:[%s4911_s5 + $0x378] sm:$0xff] }
 0x216   : > { %v1824_v29 = vunpack.c.l.bf16 %v1495_v18  ;;  %v1827_v37 = vunpack.c.h.bf16 %v1495_v18 }
 0x217   : > { %v2055_v42 = vadd.f32 %v2054_v34, %v1795_v23  ;;  %v2182_v43 = vadd.f32 %v2181_v35, %v1796_v24  ;;  %v2309_v44 = vadd.f32 %v2308_v36, %v1797_v26  ;;  %v1822_v26 = vunpack.c.l.bf16 %v1494_v13  ;;  %v1500_v36 = vld [vmem:[%s4911_s5 + $0x384] sm:$0xff] }
 0x218   : > { %v1825_v34 = vunpack.c.l.bf16 %v1496_v21  ;;  %v1826_v35 = vunpack.c.h.bf16 %v1496_v21 }
 0x219   : > { %v2056_v49 = vadd.f32 %v2055_v42, %v1798_v30  ;;  %v2183_v50 = vadd.f32 %v2182_v43, %v1799_v31  ;;  %v2310_v51 = vadd.f32 %v2309_v44, %v1800_v33  ;;  %v1499_v33 = vld [vmem:[%s4911_s5 + $0x380] ss:$12 sps:$4 sm:$0xff]   ;;  %v1829_v42 = vunpack.c.h.bf16 %v1498_v28  ;;  %v1502_v43 = vld [vmem:[%s4911_s5 + $0x390] sm:$0xff] }
 0x21a   : > { %v1830_v44 = vunpack.c.l.bf16 %v1499_v33  ;;  %v1833_v52 = vunpack.c.h.bf16 %v1499_v33 }
 0x21b   : > { %v2057_v57 = vadd.f32 %v2056_v49, %v1801_v38  ;;  %v2184_v58 = vadd.f32 %v2183_v50, %v1802_v39  ;;  %v2311_v59 = vadd.f32 %v2310_v51, %v1803_v41  ;;  %v1828_v41 = vunpack.c.l.bf16 %v1498_v28  ;;  %v1504_v51 = vld [vmem:[%s4911_s5 + $0x39c] sm:$0xff] }
 0x21c   : > { %v1831_v49 = vunpack.c.l.bf16 %v1500_v36  ;;  %v1832_v50 = vunpack.c.h.bf16 %v1500_v36 }
 0x21d   : > { %v2058_v0 = vadd.f32 %v2057_v57, %v1804_v45  ;;  %v2185_v1 = vadd.f32 %v2184_v58, %v1805_v46  ;;  %v2312_v2 = vadd.f32 %v2311_v59, %v1806_v48  ;;  %v1503_v48 = vld [vmem:[%s4911_s5 + $0x398] ss:$12 sps:$4 sm:$0xff]   ;;  %v1835_v57 = vunpack.c.h.bf16 %v1502_v43  ;;  %v1506_v58 = vld [vmem:[%s4911_s5 + $0x3a8] sm:$0xff] }
 0x21e   : > { %v1836_v59 = vunpack.c.l.bf16 %v1503_v48  ;;  %v1839_v3 = vunpack.c.h.bf16 %v1503_v48 }
 0x21f   : > { %v2059_v8 = vadd.f32 %v2058_v0, %v1807_v53  ;;  %v2186_v9 = vadd.f32 %v2185_v1, %v1808_v54  ;;  %v2313_v10 = vadd.f32 %v2312_v2, %v1809_v56  ;;  %v1834_v56 = vunpack.c.l.bf16 %v1502_v43  ;;  %v1508_v2 = vld [vmem:[%s4911_s5 + $0x3b4] sm:$0xff] }
 0x220   : > { %v1837_v0 = vunpack.c.l.bf16 %v1504_v51  ;;  %v1838_v1 = vunpack.c.h.bf16 %v1504_v51 }
 0x221   : > { %v2060_v15 = vadd.f32 %v2059_v8, %v1810_v60  ;;  %v2187_v16 = vadd.f32 %v2186_v9, %v1811_v61  ;;  %v2314_v17 = vadd.f32 %v2313_v10, %v1812_v63  ;;  %v1507_v63 = vld [vmem:[%s4911_s5 + $0x3b0] ss:$12 sps:$4 sm:$0xff]   ;;  %v1841_v8 = vunpack.c.h.bf16 %v1506_v58  ;;  %v1510_v9 = vld [vmem:[%s4911_s5 + $0x3c0] sm:$0xff] }
 0x222   : > { %v1842_v10 = vunpack.c.l.bf16 %v1507_v63  ;;  %v1845_v18 = vunpack.c.h.bf16 %v1507_v63 }
 0x223   : > { %v2061_v23 = vadd.f32 %v2060_v15, %v1813_v4  ;;  %v2188_v24 = vadd.f32 %v2187_v16, %v1814_v5  ;;  %v2315_v25 = vadd.f32 %v2314_v17, %v1815_v7  ;;  %v1840_v7 = vunpack.c.l.bf16 %v1506_v58  ;;  %v1512_v17 = vld [vmem:[%s4911_s5 + $0x3cc] sm:$0xff] }
 0x224   : > { %v1843_v15 = vunpack.c.l.bf16 %v1508_v2  ;;  %v1844_v16 = vunpack.c.h.bf16 %v1508_v2 }
 0x225   : > { %v2062_v30 = vadd.f32 %v2061_v23, %v1816_v11  ;;  %v2189_v31 = vadd.f32 %v2188_v24, %v1817_v12  ;;  %v2316_v32 = vadd.f32 %v2315_v25, %v1818_v14  ;;  %v1511_v14 = vld [vmem:[%s4911_s5 + $0x3c8] ss:$12 sps:$4 sm:$0xff]   ;;  %v1847_v23 = vunpack.c.h.bf16 %v1510_v9  ;;  %v1514_v24 = vld [vmem:[%s4911_s5 + $0x3d8] sm:$0xff] }
 0x226   : > { %v1848_v25 = vunpack.c.l.bf16 %v1511_v14  ;;  %v1851_v33 = vunpack.c.h.bf16 %v1511_v14 }
 0x227   : > { %v2063_v38 = vadd.f32 %v2062_v30, %v1819_v19  ;;  %v2190_v39 = vadd.f32 %v2189_v31, %v1820_v20  ;;  %v2317_v40 = vadd.f32 %v2316_v32, %v1821_v22  ;;  %v1846_v22 = vunpack.c.l.bf16 %v1510_v9  ;;  %v1516_v32 = vld [vmem:[%s4911_s5 + $0x3e4] sm:$0xff] }
 0x228   : > { %v1849_v30 = vunpack.c.l.bf16 %v1512_v17  ;;  %v1850_v31 = vunpack.c.h.bf16 %v1512_v17 }
 0x229   : > { %v2064_v45 = vadd.f32 %v2063_v38, %v1822_v26  ;;  %v2191_v46 = vadd.f32 %v2190_v39, %v1823_v27  ;;  %v2318_v47 = vadd.f32 %v2317_v40, %v1824_v29  ;;  %v1515_v29 = vld [vmem:[%s4911_s5 + $0x3e0] ss:$12 sps:$4 sm:$0xff]   ;;  %v1853_v38 = vunpack.c.h.bf16 %v1514_v24  ;;  %v1518_v39 = vld [vmem:[%s4911_s5 + $0x3f0] sm:$0xff] }
 0x22a   : > { %v1854_v40 = vunpack.c.l.bf16 %v1515_v29  ;;  %v1857_v48 = vunpack.c.h.bf16 %v1515_v29 }
 0x22b   : > { %v2065_v53 = vadd.f32 %v2064_v45, %v1825_v34  ;;  %v2192_v54 = vadd.f32 %v2191_v46, %v1826_v35  ;;  %v2319_v55 = vadd.f32 %v2318_v47, %v1827_v37  ;;  %v1852_v37 = vunpack.c.l.bf16 %v1514_v24  ;;  %v1520_v47 = vld [vmem:[%s4911_s5 + $0x3fc] sm:$0xff] }
 0x22c   : > { %v1855_v45 = vunpack.c.l.bf16 %v1516_v32  ;;  %v1856_v46 = vunpack.c.h.bf16 %v1516_v32 }
 0x22d   : > { %v2066_v60 = vadd.f32 %v2065_v53, %v1828_v41  ;;  %v2193_v61 = vadd.f32 %v2192_v54, %v1829_v42  ;;  %v2320_v62 = vadd.f32 %v2319_v55, %v1830_v44  ;;  %v1519_v44 = vld [vmem:[%s4911_s5 + $0x3f8] ss:$12 sps:$4 sm:$0xff]   ;;  %v1859_v53 = vunpack.c.h.bf16 %v1518_v39  ;;  %v1522_v54 = vld [vmem:[%s4911_s5 + $0x408] sm:$0xff] }
 0x22e   : > { %v1860_v55 = vunpack.c.l.bf16 %v1519_v44  ;;  %v1863_v63 = vunpack.c.h.bf16 %v1519_v44 }
 0x22f   : > { %v2067_v4 = vadd.f32 %v2066_v60, %v1831_v49  ;;  %v2194_v5 = vadd.f32 %v2193_v61, %v1832_v50  ;;  %v2321_v6 = vadd.f32 %v2320_v62, %v1833_v52  ;;  %v1858_v52 = vunpack.c.l.bf16 %v1518_v39  ;;  %v1524_v62 = vld [vmem:[%s4911_s5 + $0x414] sm:$0xff] }
 0x230   : > { %v1861_v60 = vunpack.c.l.bf16 %v1520_v47  ;;  %v1862_v61 = vunpack.c.h.bf16 %v1520_v47 }
 0x231   : > { %v2068_v11 = vadd.f32 %v2067_v4, %v1834_v56  ;;  %v2195_v12 = vadd.f32 %v2194_v5, %v1835_v57  ;;  %v2322_v13 = vadd.f32 %v2321_v6, %v1836_v59  ;;  %v1523_v59 = vld [vmem:[%s4911_s5 + $0x410] ss:$12 sps:$4 sm:$0xff]   ;;  %v1865_v4 = vunpack.c.h.bf16 %v1522_v54  ;;  %v1526_v5 = vld [vmem:[%s4911_s5 + $0x420] sm:$0xff] }
 0x232   : > { %v1866_v6 = vunpack.c.l.bf16 %v1523_v59  ;;  %v1869_v14 = vunpack.c.h.bf16 %v1523_v59 }
 0x233   : > { %v2069_v19 = vadd.f32 %v2068_v11, %v1837_v0  ;;  %v2196_v20 = vadd.f32 %v2195_v12, %v1838_v1  ;;  %v2323_v21 = vadd.f32 %v2322_v13, %v1839_v3  ;;  %v1864_v3 = vunpack.c.l.bf16 %v1522_v54  ;;  %v1528_v13 = vld [vmem:[%s4911_s5 + $0x42c] sm:$0xff] }
 0x234   : > { %v1867_v11 = vunpack.c.l.bf16 %v1524_v62  ;;  %v1868_v12 = vunpack.c.h.bf16 %v1524_v62 }
 0x235   : > { %v2070_v26 = vadd.f32 %v2069_v19, %v1840_v7  ;;  %v2197_v27 = vadd.f32 %v2196_v20, %v1841_v8  ;;  %v2324_v28 = vadd.f32 %v2323_v21, %v1842_v10  ;;  %v1527_v10 = vld [vmem:[%s4911_s5 + $0x428] ss:$12 sps:$4 sm:$0xff]   ;;  %v1871_v19 = vunpack.c.h.bf16 %v1526_v5  ;;  %v1530_v20 = vld [vmem:[%s4911_s5 + $0x438] sm:$0xff] }
 0x236   : > { %v1872_v21 = vunpack.c.l.bf16 %v1527_v10  ;;  %v1875_v29 = vunpack.c.h.bf16 %v1527_v10 }
 0x237   : > { %v2071_v34 = vadd.f32 %v2070_v26, %v1843_v15  ;;  %v2198_v35 = vadd.f32 %v2197_v27, %v1844_v16  ;;  %v2325_v36 = vadd.f32 %v2324_v28, %v1845_v18  ;;  %v1870_v18 = vunpack.c.l.bf16 %v1526_v5  ;;  %v1532_v28 = vld [vmem:[%s4911_s5 + $0x444] sm:$0xff] }
 0x238   : > { %v1873_v26 = vunpack.c.l.bf16 %v1528_v13  ;;  %v1874_v27 = vunpack.c.h.bf16 %v1528_v13 }
 0x239   : > { %v2072_v41 = vadd.f32 %v2071_v34, %v1846_v22  ;;  %v2199_v42 = vadd.f32 %v2198_v35, %v1847_v23  ;;  %v2326_v43 = vadd.f32 %v2325_v36, %v1848_v25  ;;  %v1531_v25 = vld [vmem:[%s4911_s5 + $0x440] ss:$12 sps:$4 sm:$0xff]   ;;  %v1877_v34 = vunpack.c.h.bf16 %v1530_v20  ;;  %v1534_v35 = vld [vmem:[%s4911_s5 + $0x450] sm:$0xff] }
 0x23a   : > { %v1878_v36 = vunpack.c.l.bf16 %v1531_v25  ;;  %v1881_v44 = vunpack.c.h.bf16 %v1531_v25 }
 0x23b   : > { %v2073_v49 = vadd.f32 %v2072_v41, %v1849_v30  ;;  %v2200_v50 = vadd.f32 %v2199_v42, %v1850_v31  ;;  %v2327_v51 = vadd.f32 %v2326_v43, %v1851_v33  ;;  %v1876_v33 = vunpack.c.l.bf16 %v1530_v20  ;;  %v1536_v43 = vld [vmem:[%s4911_s5 + $0x45c] sm:$0xff] }
 0x23c   : > { %v1879_v41 = vunpack.c.l.bf16 %v1532_v28  ;;  %v1880_v42 = vunpack.c.h.bf16 %v1532_v28 }
 0x23d   : > { %v2074_v56 = vadd.f32 %v2073_v49, %v1852_v37  ;;  %v2201_v57 = vadd.f32 %v2200_v50, %v1853_v38  ;;  %v2328_v58 = vadd.f32 %v2327_v51, %v1854_v40  ;;  %v1535_v40 = vld [vmem:[%s4911_s5 + $0x458] ss:$12 sps:$4 sm:$0xff]   ;;  %v1883_v49 = vunpack.c.h.bf16 %v1534_v35  ;;  %v1538_v50 = vld [vmem:[%s4911_s5 + $0x468] sm:$0xff] }
 0x23e   : > { %v1884_v51 = vunpack.c.l.bf16 %v1535_v40  ;;  %v1887_v59 = vunpack.c.h.bf16 %v1535_v40 }
 0x23f   : > { %v2075_v0 = vadd.f32 %v2074_v56, %v1855_v45  ;;  %v2202_v1 = vadd.f32 %v2201_v57, %v1856_v46  ;;  %v2329_v2 = vadd.f32 %v2328_v58, %v1857_v48  ;;  %v1882_v48 = vunpack.c.l.bf16 %v1534_v35  ;;  %v1540_v58 = vld [vmem:[%s4911_s5 + $0x474] sm:$0xff] }
 0x240   : > { %v1885_v56 = vunpack.c.l.bf16 %v1536_v43  ;;  %v1886_v57 = vunpack.c.h.bf16 %v1536_v43 }
 0x241   : > { %v2076_v7 = vadd.f32 %v2075_v0, %v1858_v52  ;;  %v2203_v8 = vadd.f32 %v2202_v1, %v1859_v53  ;;  %v2330_v9 = vadd.f32 %v2329_v2, %v1860_v55  ;;  %v1539_v55 = vld [vmem:[%s4911_s5 + $0x470] ss:$12 sps:$4 sm:$0xff]   ;;  %v1889_v0 = vunpack.c.h.bf16 %v1538_v50  ;;  %v1542_v1 = vld [vmem:[%s4911_s5 + $0x480] sm:$0xff] }
 0x242   : > { %v1890_v2 = vunpack.c.l.bf16 %v1539_v55  ;;  %v1893_v10 = vunpack.c.h.bf16 %v1539_v55 }
 0x243   : > { %v2077_v15 = vadd.f32 %v2076_v7, %v1861_v60  ;;  %v2204_v16 = vadd.f32 %v2203_v8, %v1862_v61  ;;  %v2331_v17 = vadd.f32 %v2330_v9, %v1863_v63  ;;  %v1888_v63 = vunpack.c.l.bf16 %v1538_v50  ;;  %v1544_v9 = vld [vmem:[%s4911_s5 + $0x48c] sm:$0xff] }
 0x244   : > { %v1891_v7 = vunpack.c.l.bf16 %v1540_v58  ;;  %v1892_v8 = vunpack.c.h.bf16 %v1540_v58 }
 0x245   : > { %v2078_v22 = vadd.f32 %v2077_v15, %v1864_v3  ;;  %v2205_v23 = vadd.f32 %v2204_v16, %v1865_v4  ;;  %v2332_v24 = vadd.f32 %v2331_v17, %v1866_v6  ;;  %v1543_v6 = vld [vmem:[%s4911_s5 + $0x488] ss:$12 sps:$4 sm:$0xff]   ;;  %v1895_v15 = vunpack.c.h.bf16 %v1542_v1  ;;  %v1546_v16 = vld [vmem:[%s4911_s5 + $0x498] sm:$0xff] }
 0x246   : > { %v1896_v17 = vunpack.c.l.bf16 %v1543_v6  ;;  %v1899_v25 = vunpack.c.h.bf16 %v1543_v6 }
 0x247   : > { %v2079_v30 = vadd.f32 %v2078_v22, %v1867_v11  ;;  %v2206_v31 = vadd.f32 %v2205_v23, %v1868_v12  ;;  %v2333_v32 = vadd.f32 %v2332_v24, %v1869_v14  ;;  %v1894_v14 = vunpack.c.l.bf16 %v1542_v1  ;;  %v1548_v24 = vld [vmem:[%s4911_s5 + $0x4a4] sm:$0xff] }
 0x248   : > { %v1897_v22 = vunpack.c.l.bf16 %v1544_v9  ;;  %v1898_v23 = vunpack.c.h.bf16 %v1544_v9 }
 0x249   : > { %v2080_v37 = vadd.f32 %v2079_v30, %v1870_v18  ;;  %v2207_v38 = vadd.f32 %v2206_v31, %v1871_v19  ;;  %v2334_v39 = vadd.f32 %v2333_v32, %v1872_v21  ;;  %v1547_v21 = vld [vmem:[%s4911_s5 + $0x4a0] ss:$12 sps:$4 sm:$0xff]   ;;  %v1901_v30 = vunpack.c.h.bf16 %v1546_v16  ;;  %v1550_v31 = vld [vmem:[%s4911_s5 + $0x4b0] sm:$0xff] }
 0x24a   : > { %v1902_v32 = vunpack.c.l.bf16 %v1547_v21  ;;  %v1905_v40 = vunpack.c.h.bf16 %v1547_v21 }
 0x24b   : > { %v2081_v45 = vadd.f32 %v2080_v37, %v1873_v26  ;;  %v2208_v46 = vadd.f32 %v2207_v38, %v1874_v27  ;;  %v2335_v47 = vadd.f32 %v2334_v39, %v1875_v29  ;;  %v1900_v29 = vunpack.c.l.bf16 %v1546_v16  ;;  %v1552_v39 = vld [vmem:[%s4911_s5 + $0x4bc] sm:$0xff] }
 0x24c   : > { %v1903_v37 = vunpack.c.l.bf16 %v1548_v24  ;;  %v1904_v38 = vunpack.c.h.bf16 %v1548_v24 }
 0x24d   : > { %v2082_v52 = vadd.f32 %v2081_v45, %v1876_v33  ;;  %v2209_v53 = vadd.f32 %v2208_v46, %v1877_v34  ;;  %v2336_v54 = vadd.f32 %v2335_v47, %v1878_v36  ;;  %v1551_v36 = vld [vmem:[%s4911_s5 + $0x4b8] ss:$12 sps:$4 sm:$0xff]   ;;  %v1907_v45 = vunpack.c.h.bf16 %v1550_v31  ;;  %v1554_v46 = vld [vmem:[%s4911_s5 + $0x4c8] sm:$0xff] }
 0x24e   : > { %v1908_v47 = vunpack.c.l.bf16 %v1551_v36  ;;  %v1911_v55 = vunpack.c.h.bf16 %v1551_v36 }
 0x24f   : > { %v2083_v60 = vadd.f32 %v2082_v52, %v1879_v41  ;;  %v2210_v61 = vadd.f32 %v2209_v53, %v1880_v42  ;;  %v2337_v62 = vadd.f32 %v2336_v54, %v1881_v44  ;;  %v1906_v44 = vunpack.c.l.bf16 %v1550_v31  ;;  %v1556_v54 = vld [vmem:[%s4911_s5 + $0x4d4] sm:$0xff] }
 0x250   : > { %v1909_v52 = vunpack.c.l.bf16 %v1552_v39  ;;  %v1910_v53 = vunpack.c.h.bf16 %v1552_v39 }
 0x251   : > { %v2084_v3 = vadd.f32 %v2083_v60, %v1882_v48  ;;  %v2211_v4 = vadd.f32 %v2210_v61, %v1883_v49  ;;  %v2338_v5 = vadd.f32 %v2337_v62, %v1884_v51  ;;  %v1555_v51 = vld [vmem:[%s4911_s5 + $0x4d0] ss:$12 sps:$4 sm:$0xff]   ;;  %v1913_v60 = vunpack.c.h.bf16 %v1554_v46  ;;  %v1558_v61 = vld [vmem:[%s4911_s5 + $0x4e0] sm:$0xff] }
 0x252   : > { %v1914_v62 = vunpack.c.l.bf16 %v1555_v51  ;;  %v1917_v6 = vunpack.c.h.bf16 %v1555_v51 }
 0x253   : > { %v2085_v11 = vadd.f32 %v2084_v3, %v1885_v56  ;;  %v2212_v12 = vadd.f32 %v2211_v4, %v1886_v57  ;;  %v2339_v13 = vadd.f32 %v2338_v5, %v1887_v59  ;;  %v1912_v59 = vunpack.c.l.bf16 %v1554_v46  ;;  %v1560_v5 = vld [vmem:[%s4911_s5 + $0x4ec] sm:$0xff] }
 0x254   : > { %v1915_v3 = vunpack.c.l.bf16 %v1556_v54  ;;  %v1916_v4 = vunpack.c.h.bf16 %v1556_v54 }
 0x255   : > { %v2086_v18 = vadd.f32 %v2085_v11, %v1888_v63  ;;  %v2213_v19 = vadd.f32 %v2212_v12, %v1889_v0  ;;  %v2340_v20 = vadd.f32 %v2339_v13, %v1890_v2  ;;  %v1559_v2 = vld [vmem:[%s4911_s5 + $0x4e8] ss:$12 sps:$4 sm:$0xff]   ;;  %v1919_v11 = vunpack.c.h.bf16 %v1558_v61  ;;  %v1562_v12 = vld [vmem:[%s4911_s5 + $0x4f8] sm:$0xff] }
 0x256   : > { %v1920_v13 = vunpack.c.l.bf16 %v1559_v2  ;;  %v1923_v21 = vunpack.c.h.bf16 %v1559_v2 }
 0x257   : > { %v2087_v26 = vadd.f32 %v2086_v18, %v1891_v7  ;;  %v2214_v27 = vadd.f32 %v2213_v19, %v1892_v8  ;;  %v2341_v28 = vadd.f32 %v2340_v20, %v1893_v10  ;;  %v1918_v10 = vunpack.c.l.bf16 %v1558_v61  ;;  %v1564_v20 = vld [vmem:[%s4911_s5 + $0x504] sm:$0xff] }
 0x258   : > { %v1921_v18 = vunpack.c.l.bf16 %v1560_v5  ;;  %v1922_v19 = vunpack.c.h.bf16 %v1560_v5 }
 0x259   : > { %v2088_v33 = vadd.f32 %v2087_v26, %v1894_v14  ;;  %v2215_v34 = vadd.f32 %v2214_v27, %v1895_v15  ;;  %v2342_v35 = vadd.f32 %v2341_v28, %v1896_v17  ;;  %v1563_v17 = vld [vmem:[%s4911_s5 + $0x500] ss:$12 sps:$4 sm:$0xff]   ;;  %v1925_v26 = vunpack.c.h.bf16 %v1562_v12  ;;  %v1566_v27 = vld [vmem:[%s4911_s5 + $0x510] sm:$0xff] }
 0x25a   : > { %v1926_v28 = vunpack.c.l.bf16 %v1563_v17  ;;  %v1929_v36 = vunpack.c.h.bf16 %v1563_v17 }
 0x25b   : > { %v2089_v41 = vadd.f32 %v2088_v33, %v1897_v22  ;;  %v2216_v42 = vadd.f32 %v2215_v34, %v1898_v23  ;;  %v2343_v43 = vadd.f32 %v2342_v35, %v1899_v25  ;;  %v1924_v25 = vunpack.c.l.bf16 %v1562_v12  ;;  %v1568_v35 = vld [vmem:[%s4911_s5 + $0x51c] sm:$0xff] }
 0x25c   : > { %v1927_v33 = vunpack.c.l.bf16 %v1564_v20  ;;  %v1928_v34 = vunpack.c.h.bf16 %v1564_v20 }
 0x25d   : > { %v2090_v48 = vadd.f32 %v2089_v41, %v1900_v29  ;;  %v2217_v49 = vadd.f32 %v2216_v42, %v1901_v30  ;;  %v2344_v50 = vadd.f32 %v2343_v43, %v1902_v32  ;;  %v1567_v32 = vld [vmem:[%s4911_s5 + $0x518] ss:$12 sps:$4 sm:$0xff]   ;;  %v1931_v41 = vunpack.c.h.bf16 %v1566_v27  ;;  %v1570_v42 = vld [vmem:[%s4911_s5 + $0x528] sm:$0xff] }
 0x25e   : > { %v1932_v43 = vunpack.c.l.bf16 %v1567_v32  ;;  %v1935_v51 = vunpack.c.h.bf16 %v1567_v32 }
 0x25f   : > { %v2091_v56 = vadd.f32 %v2090_v48, %v1903_v37  ;;  %v2218_v57 = vadd.f32 %v2217_v49, %v1904_v38  ;;  %v2345_v58 = vadd.f32 %v2344_v50, %v1905_v40  ;;  %v1930_v40 = vunpack.c.l.bf16 %v1566_v27  ;;  %v1572_v50 = vld [vmem:[%s4911_s5 + $0x534] sm:$0xff] }
 0x260   : > { %v1933_v48 = vunpack.c.l.bf16 %v1568_v35  ;;  %v1934_v49 = vunpack.c.h.bf16 %v1568_v35 }
 0x261   : > { %v2092_v63 = vadd.f32 %v2091_v56, %v1906_v44  ;;  %v2219_v0 = vadd.f32 %v2218_v57, %v1907_v45  ;;  %v2346_v1 = vadd.f32 %v2345_v58, %v1908_v47  ;;  %v1571_v47 = vld [vmem:[%s4911_s5 + $0x530] ss:$12 sps:$4 sm:$0xff]   ;;  %v1937_v56 = vunpack.c.h.bf16 %v1570_v42  ;;  %v1574_v57 = vld [vmem:[%s4911_s5 + $0x540] sm:$0xff] }
 0x262   : > { %v1938_v58 = vunpack.c.l.bf16 %v1571_v47  ;;  %v1941_v2 = vunpack.c.h.bf16 %v1571_v47 }
 0x263   : > { %v2093_v7 = vadd.f32 %v2092_v63, %v1909_v52  ;;  %v2220_v8 = vadd.f32 %v2219_v0, %v1910_v53  ;;  %v2347_v9 = vadd.f32 %v2346_v1, %v1911_v55  ;;  %v1936_v55 = vunpack.c.l.bf16 %v1570_v42  ;;  %v1576_v1 = vld [vmem:[%s4911_s5 + $0x54c] sm:$0xff] }
 0x264   : > { %v1939_v63 = vunpack.c.l.bf16 %v1572_v50  ;;  %v1940_v0 = vunpack.c.h.bf16 %v1572_v50 }
 0x265   : > { %v2094_v14 = vadd.f32 %v2093_v7, %v1912_v59  ;;  %v2221_v15 = vadd.f32 %v2220_v8, %v1913_v60  ;;  %v2348_v16 = vadd.f32 %v2347_v9, %v1914_v62  ;;  %v1575_v62 = vld [vmem:[%s4911_s5 + $0x548] ss:$12 sps:$4 sm:$0xff]   ;;  %v1943_v7 = vunpack.c.h.bf16 %v1574_v57  ;;  %v1578_v8 = vld [vmem:[%s4911_s5 + $0x558] sm:$0xff] }
 0x266   : > { %v1944_v9 = vunpack.c.l.bf16 %v1575_v62  ;;  %v1947_v17 = vunpack.c.h.bf16 %v1575_v62 }
 0x267   : > { %v2095_v22 = vadd.f32 %v2094_v14, %v1915_v3  ;;  %v2222_v23 = vadd.f32 %v2221_v15, %v1916_v4  ;;  %v2349_v24 = vadd.f32 %v2348_v16, %v1917_v6  ;;  %v1942_v6 = vunpack.c.l.bf16 %v1574_v57  ;;  %v1580_v16 = vld [vmem:[%s4911_s5 + $0x564] sm:$0xff] }
 0x268   : > { %v1945_v14 = vunpack.c.l.bf16 %v1576_v1  ;;  %v1946_v15 = vunpack.c.h.bf16 %v1576_v1 }
 0x269   : > { %v2096_v29 = vadd.f32 %v2095_v22, %v1918_v10  ;;  %v2223_v30 = vadd.f32 %v2222_v23, %v1919_v11  ;;  %v2350_v31 = vadd.f32 %v2349_v24, %v1920_v13  ;;  %v1579_v13 = vld [vmem:[%s4911_s5 + $0x560] ss:$12 sps:$4 sm:$0xff]   ;;  %v1949_v22 = vunpack.c.h.bf16 %v1578_v8  ;;  %v1582_v23 = vld [vmem:[%s4911_s5 + $0x570] sm:$0xff] }
 0x26a   : > { %v1950_v24 = vunpack.c.l.bf16 %v1579_v13  ;;  %v1953_v32 = vunpack.c.h.bf16 %v1579_v13 }
 0x26b   : > { %v2097_v37 = vadd.f32 %v2096_v29, %v1921_v18  ;;  %v2224_v38 = vadd.f32 %v2223_v30, %v1922_v19  ;;  %v2351_v39 = vadd.f32 %v2350_v31, %v1923_v21  ;;  %v1948_v21 = vunpack.c.l.bf16 %v1578_v8  ;;  %v1584_v31 = vld [vmem:[%s4911_s5 + $0x57c] sm:$0xff] }
 0x26c   : > { %v1951_v29 = vunpack.c.l.bf16 %v1580_v16  ;;  %v1952_v30 = vunpack.c.h.bf16 %v1580_v16 }
 0x26d   : > { %v2098_v44 = vadd.f32 %v2097_v37, %v1924_v25  ;;  %v2225_v45 = vadd.f32 %v2224_v38, %v1925_v26  ;;  %v2352_v46 = vadd.f32 %v2351_v39, %v1926_v28  ;;  %v1583_v28 = vld [vmem:[%s4911_s5 + $0x578] ss:$12 sps:$4 sm:$0xff]   ;;  %v1955_v37 = vunpack.c.h.bf16 %v1582_v23  ;;  %v1586_v38 = vld [vmem:[%s4911_s5 + $0x588] sm:$0xff] }
 0x26e   : > { %v1956_v39 = vunpack.c.l.bf16 %v1583_v28  ;;  %v1959_v47 = vunpack.c.h.bf16 %v1583_v28 }
 0x26f   : > { %v2099_v52 = vadd.f32 %v2098_v44, %v1927_v33  ;;  %v2226_v53 = vadd.f32 %v2225_v45, %v1928_v34  ;;  %v2353_v54 = vadd.f32 %v2352_v46, %v1929_v36  ;;  %v1954_v36 = vunpack.c.l.bf16 %v1582_v23  ;;  %v1588_v46 = vld [vmem:[%s4911_s5 + $0x594] sm:$0xff] }
 0x270   : > { %v1957_v44 = vunpack.c.l.bf16 %v1584_v31  ;;  %v1958_v45 = vunpack.c.h.bf16 %v1584_v31 }
 0x271   : > { %v2100_v59 = vadd.f32 %v2099_v52, %v1930_v40  ;;  %v2227_v60 = vadd.f32 %v2226_v53, %v1931_v41  ;;  %v2354_v61 = vadd.f32 %v2353_v54, %v1932_v43  ;;  %v1587_v43 = vld [vmem:[%s4911_s5 + $0x590] ss:$12 sps:$4 sm:$0xff]   ;;  %v1961_v52 = vunpack.c.h.bf16 %v1586_v38  ;;  %v1590_v53 = vld [vmem:[%s4911_s5 + $0x5a0] sm:$0xff] }
 0x272   : > { %v1962_v54 = vunpack.c.l.bf16 %v1587_v43  ;;  %v1965_v62 = vunpack.c.h.bf16 %v1587_v43 }
 0x273   : > { %v2101_v3 = vadd.f32 %v2100_v59, %v1933_v48  ;;  %v2228_v4 = vadd.f32 %v2227_v60, %v1934_v49  ;;  %v2355_v5 = vadd.f32 %v2354_v61, %v1935_v51  ;;  %v1960_v51 = vunpack.c.l.bf16 %v1586_v38  ;;  %v1592_v61 = vld [vmem:[%s4911_s5 + $0x5ac] sm:$0xff] }
 0x274   : > { %v1963_v59 = vunpack.c.l.bf16 %v1588_v46  ;;  %v1964_v60 = vunpack.c.h.bf16 %v1588_v46 }
 0x275   : > { %v2102_v10 = vadd.f32 %v2101_v3, %v1936_v55  ;;  %v2229_v11 = vadd.f32 %v2228_v4, %v1937_v56  ;;  %v2356_v12 = vadd.f32 %v2355_v5, %v1938_v58  ;;  %v1591_v58 = vld [vmem:[%s4911_s5 + $0x5a8] ss:$12 sps:$4 sm:$0xff]   ;;  %v1967_v3 = vunpack.c.h.bf16 %v1590_v53  ;;  %v1594_v4 = vld [vmem:[%s4911_s5 + $0x5b8] sm:$0xff] }
 0x276   : > { %v1968_v5 = vunpack.c.l.bf16 %v1591_v58  ;;  %v1971_v13 = vunpack.c.h.bf16 %v1591_v58 }
 0x277   : > { %v2103_v18 = vadd.f32 %v2102_v10, %v1939_v63  ;;  %v2230_v19 = vadd.f32 %v2229_v11, %v1940_v0  ;;  %v2357_v20 = vadd.f32 %v2356_v12, %v1941_v2  ;;  %v1966_v2 = vunpack.c.l.bf16 %v1590_v53  ;;  %v1596_v12 = vld [vmem:[%s4911_s5 + $0x5c4] sm:$0xff] }
 0x278   : > { %v1969_v10 = vunpack.c.l.bf16 %v1592_v61  ;;  %v1970_v11 = vunpack.c.h.bf16 %v1592_v61 }
 0x279   : > { %v2104_v25 = vadd.f32 %v2103_v18, %v1942_v6  ;;  %v2231_v26 = vadd.f32 %v2230_v19, %v1943_v7  ;;  %v2358_v27 = vadd.f32 %v2357_v20, %v1944_v9  ;;  %v1595_v9 = vld [vmem:[%s4911_s5 + $0x5c0] ss:$12 sps:$4 sm:$0xff]   ;;  %v1973_v18 = vunpack.c.h.bf16 %v1594_v4  ;;  %v1598_v19 = vld [vmem:[%s4911_s5 + $0x5d0] sm:$0xff] }
 0x27a   : > { %v1974_v20 = vunpack.c.l.bf16 %v1595_v9  ;;  %v1977_v28 = vunpack.c.h.bf16 %v1595_v9 }
 0x27b   : > { %v2105_v33 = vadd.f32 %v2104_v25, %v1945_v14  ;;  %v2232_v34 = vadd.f32 %v2231_v26, %v1946_v15  ;;  %v2359_v35 = vadd.f32 %v2358_v27, %v1947_v17  ;;  %v1972_v17 = vunpack.c.l.bf16 %v1594_v4  ;;  %v1600_v27 = vld [vmem:[%s4911_s5 + $0x5dc] sm:$0xff] }
 0x27c   : > { %v1975_v25 = vunpack.c.l.bf16 %v1596_v12  ;;  %v1976_v26 = vunpack.c.h.bf16 %v1596_v12 }
 0x27d   : > { %v2106_v40 = vadd.f32 %v2105_v33, %v1948_v21  ;;  %v2233_v41 = vadd.f32 %v2232_v34, %v1949_v22  ;;  %v2360_v42 = vadd.f32 %v2359_v35, %v1950_v24  ;;  %v1599_v24 = vld [vmem:[%s4911_s5 + $0x5d8] ss:$12 sps:$4 sm:$0xff]   ;;  %v1979_v33 = vunpack.c.h.bf16 %v1598_v19  ;;  %v1602_v34 = vld [vmem:[%s4911_s5 + $0x5e8] sm:$0xff] }
 0x27e   : > { %v1980_v35 = vunpack.c.l.bf16 %v1599_v24  ;;  %v1983_v43 = vunpack.c.h.bf16 %v1599_v24 }
 0x27f   : > { %v2107_v48 = vadd.f32 %v2106_v40, %v1951_v29  ;;  %v2234_v49 = vadd.f32 %v2233_v41, %v1952_v30  ;;  %v2361_v50 = vadd.f32 %v2360_v42, %v1953_v32  ;;  %v1978_v32 = vunpack.c.l.bf16 %v1598_v19  ;;  %v1604_v42 = vld [vmem:[%s4911_s5 + $0x5f4] sm:$0xff] }
 0x280   : > { %v1981_v40 = vunpack.c.l.bf16 %v1600_v27  ;;  %v1982_v41 = vunpack.c.h.bf16 %v1600_v27  ;;  %v1987_v53 = vunpack.c.l.bf16 %v1604_v42 }
 0x281   : > { %v2108_v55 = vadd.f32 %v2107_v48, %v1954_v36  ;;  %v2235_v56 = vadd.f32 %v2234_v49, %v1955_v37  ;;  %v2362_v57 = vadd.f32 %v2361_v50, %v1956_v39  ;;  %v1603_v39 = vld [vmem:[%s4911_s5 + $0x5f0] ss:$12 sps:$4 sm:$0xff]   ;;  %v1985_v48 = vunpack.c.h.bf16 %v1602_v34 }
 0x282   : > { %v1986_v49 = vunpack.c.l.bf16 %v1603_v39 }
 0x283   : > { %v2109_v63 = vadd.f32 %v2108_v55, %v1957_v44  ;;  %v2236_v0 = vadd.f32 %v2235_v56, %v1958_v45  ;;  %v2363_v1 = vadd.f32 %v2362_v57, %v1959_v47  ;;  %v1984_v47 = vunpack.c.l.bf16 %v1602_v34 }
 0x284   : > { %v1989_v55 = vunpack.c.h.bf16 %v1603_v39 }
 0x285   : > { %v2110_v6 = vadd.f32 %v2109_v63, %v1960_v51  ;;  %v2237_v7 = vadd.f32 %v2236_v0, %v1961_v52  ;;  %v2364_v8 = vadd.f32 %v2363_v1, %v1962_v54  ;;  %v1988_v54 = vunpack.c.h.bf16 %v1604_v42  ;;  %v1991_v63 = vld [vmem:[%s4927_s28 + $0x8] sm:$0xff]  ;;  %v1992_v0 = vld [vmem:[%s4927_s28 + $0x10] sm:$0xff] }
 0x287   : > { %v2111_v14 = vadd.f32 %v2110_v6, %v1963_v59  ;;  %v2238_v15 = vadd.f32 %v2237_v7, %v1964_v60  ;;  %v2365_v16 = vadd.f32 %v2364_v8, %v1965_v62  ;;  %v1990_v62 = vld [vmem:[%s4927_s28] sm:$0xff] }
 0x289   : > { %v2112_v21 = vadd.f32 %v2111_v14, %v1966_v2  ;;  %v2239_v22 = vadd.f32 %v2238_v15, %v1967_v3  ;;  %v2366_v23 = vadd.f32 %v2365_v16, %v1968_v5 }
 0x28b   : > { %v2113_v29 = vadd.f32 %v2112_v21, %v1969_v10  ;;  %v2240_v30 = vadd.f32 %v2239_v22, %v1970_v11  ;;  %v2367_v31 = vadd.f32 %v2366_v23, %v1971_v13 }
 0x28d   : > { %v2114_v36 = vadd.f32 %v2113_v29, %v1972_v17  ;;  %v2241_v37 = vadd.f32 %v2240_v30, %v1973_v18  ;;  %v2368_v38 = vadd.f32 %v2367_v31, %v1974_v20 }
 0x28f   : > { %v2115_v44 = vadd.f32 %v2114_v36, %v1975_v25  ;;  %v2242_v45 = vadd.f32 %v2241_v37, %v1976_v26  ;;  %v2369_v46 = vadd.f32 %v2368_v38, %v1977_v28 }
 0x291   : > { %v2116_v50 = vadd.f32 %v2115_v44, %v1978_v32  ;;  %v2243_v51 = vadd.f32 %v2242_v45, %v1979_v33  ;;  %v2370_v52 = vadd.f32 %v2369_v46, %v1980_v35 }
 0x293   : > { %v2117_v56 = vadd.f32 %v2116_v50, %v1981_v40  ;;  %v2244_v57 = vadd.f32 %v2243_v51, %v1982_v41  ;;  %v2371_v58 = vadd.f32 %v2370_v52, %v1983_v43 }
 0x295   : > { %v2118_v59 = vadd.f32 %v2117_v56, %v1984_v47  ;;  %v2245_v60 = vadd.f32 %v2244_v57, %v1985_v48  ;;  %v2372_v61 = vadd.f32 %v2371_v58, %v1986_v49 }
 0x297   : > { %v2119_v1 = vadd.f32 %v2118_v59, %v1987_v53  ;;  %v2246_v2 = vadd.f32 %v2245_v60, %v1988_v54  ;;  %v2373_v3 = vadd.f32 %v2372_v61, %v1989_v55 }
 0x299   : > { %v2374_v4 = vadd.f32 %v2119_v1, %v1990_v62  ;;  %v2375_v5 = vadd.f32 %v2246_v2, %v1991_v63  ;;  %v2376_v6 = vadd.f32 %v2373_v3, %v1992_v0 }
 0x29b   : > { %2377 = vst [vmem:[%s4927_s28] sm:$0xff] %v2374_v4  ;;  %2378 = vst [vmem:[%s4927_s28 + $0x8] sm:$0xff] %v2375_v5 }
 0x29c   : > { %2379 = vst [vmem:[%s4927_s28 + $0x10] sm:$0xff] %v2376_v6 }
 0x29d PF: > { %p4250_p8 = scmp.ne.s32.totalorder %s4923_s7, 1 }
 0x29e   : > { %v2384_v7 = vld [vmem:[%s4911_s5] sm:$0xff] (!%p4250_p8)  ;;  %v2385_v8 = vld [vmem:[%s4911_s5 + $0x8] ss:$12 sps:$4 sm:$0xff] (!%p4250_p8)   ;;  %v2386_v9 = vld [vmem:[%s4911_s5 + $0xc] sm:$0xff] (!%p4250_p8) }
 0x29f   : > { %2383 = sbr.rel (%p4250_p8) target bundleno = 804 (0x324), region = 52  ;;  %v2388_v10 = vld [vmem:[%s4911_s5 + $0x18] sm:$0xff] (!%p4250_p8)  ;;  %v2389_v11 = vld [vmem:[%s4911_s5 + $0x20] ss:$12 sps:$4 sm:$0xff] (!%p4250_p8)   ;;  %v2640_v12 = vunpack.c.l.bf16 (!%p4250_p8), %v2384_v7  ;;  %v2641_v13 = vunpack.c.h.bf16 (!%p4250_p8), %v2384_v7  ;;  %v2390_v14 = vld [vmem:[%s4911_s5 + $0x24] sm:$0xff] (!%p4250_p8)  ;;  %v2642_v15 = vunpack.c.l.bf16 (!%p4250_p8), %v2385_v8  ;;  %v2643_v16 = vunpack.c.l.bf16 (!%p4250_p8), %v2386_v9 }
 0x2a0   : > { %v2644_v17 = vunpack.c.h.bf16 (!%p4250_p8), %v2386_v9  ;;  %v2645_v18 = vunpack.c.h.bf16 (!%p4250_p8), %v2385_v8  ;;  %v2392_v19 = vld [vmem:[%s4911_s5 + $0x30] sm:$0xff] (!%p4250_p8)  ;;  %v2646_v20 = vunpack.c.l.bf16 (!%p4250_p8), %v2388_v10  ;;  %v2647_v21 = vunpack.c.h.bf16 (!%p4250_p8), %v2388_v10  ;;  %v2393_v23 = vld [vmem:[%s4911_s5 + $0x38] ss:$12 sps:$4 sm:$0xff] (!%p4250_p8)   ;;  %v2394_v26 = vld [vmem:[%s4911_s5 + $0x3c] sm:$0xff] (!%p4250_p8) }
 0x2a1   : > { %v2648_v22 = vunpack.c.l.bf16 (!%p4250_p8), %v2389_v11  ;;  %v2649_v24 = vunpack.c.l.bf16 (!%p4250_p8), %v2390_v14  ;;  %v2650_v25 = vunpack.c.h.bf16 (!%p4250_p8), %v2390_v14  ;;  %v2651_v27 = vunpack.c.h.bf16 (!%p4250_p8), %v2389_v11  ;;  %v2396_v33 = vld [vmem:[%s4911_s5 + $0x48] sm:$0xff] (!%p4250_p8)  ;;  %v2397_v38 = vld [vmem:[%s4911_s5 + $0x50] ss:$12 sps:$4 sm:$0xff] (!%p4250_p8)   ;;  %v2398_v41 = vld [vmem:[%s4911_s5 + $0x54] sm:$0xff] (!%p4250_p8) }
 0x2a2   : > { %v3668_v28 = vadd.f32 (!%p4250_p8), %v2643_v16, %v2640_v12  ;;  %v3795_v29 = vadd.f32 (!%p4250_p8), %v2644_v17, %v2641_v13  ;;  %v3922_v30 = vadd.f32 (!%p4250_p8), %v2645_v18, %v2642_v15  ;;  %v2652_v31 = vunpack.c.l.bf16 (!%p4250_p8), %v2392_v19  ;;  %v2400_v48 = vld [vmem:[%s4911_s5 + $0x60] sm:$0xff] (!%p4250_p8)  ;;  %v2401_v53 = vld [vmem:[%s4911_s5 + $0x68] ss:$12 sps:$4 sm:$0xff] (!%p4250_p8)   ;;  %v2402_v56 = vld [vmem:[%s4911_s5 + $0x6c] sm:$0xff] (!%p4250_p8) }
 0x2a3   : > { %v2653_v32 = vunpack.c.h.bf16 (!%p4250_p8), %v2392_v19  ;;  %v2654_v34 = vunpack.c.l.bf16 (!%p4250_p8), %v2393_v23  ;;  %v2655_v39 = vunpack.c.l.bf16 (!%p4250_p8), %v2394_v26  ;;  %v2656_v40 = vunpack.c.h.bf16 (!%p4250_p8), %v2394_v26  ;;  %v2404_v63 = vld [vmem:[%s4911_s5 + $0x78] sm:$0xff] (!%p4250_p8)  ;;  %v2405_v4 = vld [vmem:[%s4911_s5 + $0x80] ss:$12 sps:$4 sm:$0xff] (!%p4250_p8)   ;;  %v2406_v7 = vld [vmem:[%s4911_s5 + $0x84] sm:$0xff] (!%p4250_p8) }
 0x2a4   : > { %v3669_v35 = vadd.f32 (!%p4250_p8), %v3668_v28, %v2646_v20  ;;  %v3796_v36 = vadd.f32 (!%p4250_p8), %v3795_v29, %v2647_v21  ;;  %v3923_v37 = vadd.f32 (!%p4250_p8), %v3922_v30, %v2648_v22  ;;  %v2657_v42 = vunpack.c.h.bf16 (!%p4250_p8), %v2393_v23  ;;  %v2408_v14 = vld [vmem:[%s4911_s5 + $0x90] sm:$0xff] (!%p4250_p8)  ;;  %v2409_v19 = vld [vmem:[%s4911_s5 + $0x98] ss:$12 sps:$4 sm:$0xff] (!%p4250_p8)   ;;  %v2410_v22 = vld [vmem:[%s4911_s5 + $0x9c] sm:$0xff] (!%p4250_p8) }
 0x2a5   : > { %v2658_v46 = vunpack.c.l.bf16 (!%p4250_p8), %v2396_v33  ;;  %v2659_v47 = vunpack.c.h.bf16 (!%p4250_p8), %v2396_v33  ;;  %v2660_v49 = vunpack.c.l.bf16 (!%p4250_p8), %v2397_v38  ;;  %v2661_v54 = vunpack.c.l.bf16 (!%p4250_p8), %v2398_v41  ;;  %v2412_v29 = vld [vmem:[%s4911_s5 + $0xa8] sm:$0xff] (!%p4250_p8) }
 0x2a6   : > { %v3670_v43 = vadd.f32 %v3669_v35, %v2649_v24  ;;  %v3797_v44 = vadd.f32 %v3796_v36, %v2650_v25  ;;  %v3924_v45 = vadd.f32 %v3923_v37, %v2651_v27  ;;  %v2662_v55 = vunpack.c.h.bf16 %v2398_v41  ;;  %v2414_v37 = vld [vmem:[%s4911_s5 + $0xb4] sm:$0xff] }
 0x2a7   : > { %v2663_v57 = vunpack.c.h.bf16 %v2397_v38  ;;  %v2664_v61 = vunpack.c.l.bf16 %v2400_v48  ;;  %v2665_v62 = vunpack.c.h.bf16 %v2400_v48  ;;  %v2666_v0 = vunpack.c.l.bf16 %v2401_v53 }
 0x2a8   : > { %v3671_v50 = vadd.f32 %v3670_v43, %v2652_v31  ;;  %v3798_v51 = vadd.f32 %v3797_v44, %v2653_v32  ;;  %v3925_v52 = vadd.f32 %v3924_v45, %v2654_v34  ;;  %v2667_v5 = vunpack.c.l.bf16 %v2402_v56  ;;  %v2413_v34 = vld [vmem:[%s4911_s5 + $0xb0] ss:$12 sps:$4 sm:$0xff]   ;;  %v2416_v44 = vld [vmem:[%s4911_s5 + $0xc0] sm:$0xff] }
 0x2a9   : > { %v2668_v6 = vunpack.c.h.bf16 %v2402_v56  ;;  %v2669_v8 = vunpack.c.h.bf16 %v2401_v53  ;;  %v2670_v12 = vunpack.c.l.bf16 %v2404_v63  ;;  %v2671_v13 = vunpack.c.h.bf16 %v2404_v63 }
 0x2aa   : > { %v3672_v58 = vadd.f32 %v3671_v50, %v2655_v39  ;;  %v3799_v59 = vadd.f32 %v3798_v51, %v2656_v40  ;;  %v3926_v60 = vadd.f32 %v3925_v52, %v2657_v42  ;;  %v2672_v15 = vunpack.c.l.bf16 %v2405_v4  ;;  %v2418_v52 = vld [vmem:[%s4911_s5 + $0xcc] sm:$0xff] }
 0x2ab   : > { %v2673_v20 = vunpack.c.l.bf16 %v2406_v7  ;;  %v2674_v21 = vunpack.c.h.bf16 %v2406_v7  ;;  %v2675_v23 = vunpack.c.h.bf16 %v2405_v4  ;;  %v2676_v27 = vunpack.c.l.bf16 %v2408_v14 }
 0x2ac   : > { %v3673_v1 = vadd.f32 %v3672_v58, %v2658_v46  ;;  %v3800_v2 = vadd.f32 %v3799_v59, %v2659_v47  ;;  %v3927_v3 = vadd.f32 %v3926_v60, %v2660_v49  ;;  %v2677_v28 = vunpack.c.h.bf16 %v2408_v14  ;;  %v2417_v49 = vld [vmem:[%s4911_s5 + $0xc8] ss:$12 sps:$4 sm:$0xff]   ;;  %v2420_v59 = vld [vmem:[%s4911_s5 + $0xd8] sm:$0xff] }
 0x2ad   : > { %v2678_v30 = vunpack.c.l.bf16 %v2409_v19  ;;  %v2679_v35 = vunpack.c.l.bf16 %v2410_v22  ;;  %v2680_v36 = vunpack.c.h.bf16 %v2410_v22  ;;  %v2681_v38 = vunpack.c.h.bf16 %v2409_v19 }
 0x2ae   : > { %v3674_v9 = vadd.f32 %v3673_v1, %v2661_v54  ;;  %v3801_v10 = vadd.f32 %v3800_v2, %v2662_v55  ;;  %v3928_v11 = vadd.f32 %v3927_v3, %v2663_v57  ;;  %v2682_v42 = vunpack.c.l.bf16 %v2412_v29  ;;  %v2422_v3 = vld [vmem:[%s4911_s5 + $0xe4] sm:$0xff] }
 0x2af   : > { %v2683_v43 = vunpack.c.h.bf16 %v2412_v29  ;;  %v2684_v45 = vunpack.c.l.bf16 %v2413_v34  ;;  %v2685_v50 = vunpack.c.l.bf16 %v2414_v37  ;;  %v2686_v51 = vunpack.c.h.bf16 %v2414_v37 }
 0x2b0   : > { %v3675_v16 = vadd.f32 %v3674_v9, %v2664_v61  ;;  %v3802_v17 = vadd.f32 %v3801_v10, %v2665_v62  ;;  %v3929_v18 = vadd.f32 %v3928_v11, %v2666_v0  ;;  %v2687_v53 = vunpack.c.h.bf16 %v2413_v34  ;;  %v2421_v0 = vld [vmem:[%s4911_s5 + $0xe0] ss:$12 sps:$4 sm:$0xff]   ;;  %v2424_v10 = vld [vmem:[%s4911_s5 + $0xf0] sm:$0xff] }
 0x2b1   : > { %v2688_v57 = vunpack.c.l.bf16 %v2416_v44  ;;  %v2689_v58 = vunpack.c.h.bf16 %v2416_v44  ;;  %v2690_v60 = vunpack.c.l.bf16 %v2417_v49  ;;  %v2691_v1 = vunpack.c.l.bf16 %v2418_v52 }
 0x2b2   : > { %v3676_v24 = vadd.f32 %v3675_v16, %v2667_v5  ;;  %v3803_v25 = vadd.f32 %v3802_v17, %v2668_v6  ;;  %v3930_v26 = vadd.f32 %v3929_v18, %v2669_v8  ;;  %v2692_v2 = vunpack.c.h.bf16 %v2418_v52  ;;  %v2426_v18 = vld [vmem:[%s4911_s5 + $0xfc] sm:$0xff] }
 0x2b3   : > { %v2693_v4 = vunpack.c.h.bf16 %v2417_v49  ;;  %v2694_v8 = vunpack.c.l.bf16 %v2420_v59  ;;  %v2695_v9 = vunpack.c.h.bf16 %v2420_v59  ;;  %v2696_v11 = vunpack.c.l.bf16 %v2421_v0 }
 0x2b4   : > { %v3677_v31 = vadd.f32 %v3676_v24, %v2670_v12  ;;  %v3804_v32 = vadd.f32 %v3803_v25, %v2671_v13  ;;  %v3931_v33 = vadd.f32 %v3930_v26, %v2672_v15  ;;  %v2425_v15 = vld [vmem:[%s4911_s5 + $0xf8] ss:$12 sps:$4 sm:$0xff]   ;;  %v2697_v16 = vunpack.c.l.bf16 %v2422_v3  ;;  %v2428_v25 = vld [vmem:[%s4911_s5 + $0x108] sm:$0xff] }
 0x2b5   : > { %v2698_v17 = vunpack.c.h.bf16 %v2422_v3  ;;  %v2699_v19 = vunpack.c.h.bf16 %v2421_v0  ;;  %v2701_v24 = vunpack.c.h.bf16 %v2424_v10  ;;  %v2702_v26 = vunpack.c.l.bf16 %v2425_v15 }
 0x2b6   : > { %v3678_v39 = vadd.f32 %v3677_v31, %v2673_v20  ;;  %v3805_v40 = vadd.f32 %v3804_v32, %v2674_v21  ;;  %v3932_v41 = vadd.f32 %v3931_v33, %v2675_v23  ;;  %v2700_v23 = vunpack.c.l.bf16 %v2424_v10  ;;  %v2430_v33 = vld [vmem:[%s4911_s5 + $0x114] sm:$0xff] }
 0x2b7   : > { %v2703_v31 = vunpack.c.l.bf16 %v2426_v18  ;;  %v2704_v32 = vunpack.c.h.bf16 %v2426_v18  ;;  %v2705_v34 = vunpack.c.h.bf16 %v2425_v15 }
 0x2b8   : > { %v3679_v46 = vadd.f32 %v3678_v39, %v2676_v27  ;;  %v3806_v47 = vadd.f32 %v3805_v40, %v2677_v28  ;;  %v3933_v48 = vadd.f32 %v3932_v41, %v2678_v30  ;;  %v2429_v30 = vld [vmem:[%s4911_s5 + $0x110] ss:$12 sps:$4 sm:$0xff]   ;;  %v2707_v39 = vunpack.c.h.bf16 %v2428_v25  ;;  %v2432_v40 = vld [vmem:[%s4911_s5 + $0x120] sm:$0xff] }
 0x2b9   : > { %v2708_v41 = vunpack.c.l.bf16 %v2429_v30  ;;  %v2711_v49 = vunpack.c.h.bf16 %v2429_v30 }
 0x2ba   : > { %v3680_v54 = vadd.f32 %v3679_v46, %v2679_v35  ;;  %v3807_v55 = vadd.f32 %v3806_v47, %v2680_v36  ;;  %v3934_v56 = vadd.f32 %v3933_v48, %v2681_v38  ;;  %v2706_v38 = vunpack.c.l.bf16 %v2428_v25  ;;  %v2434_v48 = vld [vmem:[%s4911_s5 + $0x12c] sm:$0xff] }
 0x2bb   : > { %v2709_v46 = vunpack.c.l.bf16 %v2430_v33  ;;  %v2710_v47 = vunpack.c.h.bf16 %v2430_v33 }
 0x2bc   : > { %v3681_v61 = vadd.f32 %v3680_v54, %v2682_v42  ;;  %v3808_v62 = vadd.f32 %v3807_v55, %v2683_v43  ;;  %v3935_v63 = vadd.f32 %v3934_v56, %v2684_v45  ;;  %v2433_v45 = vld [vmem:[%s4911_s5 + $0x128] ss:$12 sps:$4 sm:$0xff]   ;;  %v2713_v54 = vunpack.c.h.bf16 %v2432_v40  ;;  %v2436_v55 = vld [vmem:[%s4911_s5 + $0x138] sm:$0xff] }
 0x2bd   : > { %v2714_v56 = vunpack.c.l.bf16 %v2433_v45  ;;  %v2717_v0 = vunpack.c.h.bf16 %v2433_v45 }
 0x2be   : > { %v3682_v5 = vadd.f32 %v3681_v61, %v2685_v50  ;;  %v3809_v6 = vadd.f32 %v3808_v62, %v2686_v51  ;;  %v3936_v7 = vadd.f32 %v3935_v63, %v2687_v53  ;;  %v2712_v53 = vunpack.c.l.bf16 %v2432_v40  ;;  %v2438_v63 = vld [vmem:[%s4911_s5 + $0x144] sm:$0xff] }
 0x2bf   : > { %v2715_v61 = vunpack.c.l.bf16 %v2434_v48  ;;  %v2716_v62 = vunpack.c.h.bf16 %v2434_v48 }
 0x2c0   : > { %v3683_v12 = vadd.f32 %v3682_v5, %v2688_v57  ;;  %v3810_v13 = vadd.f32 %v3809_v6, %v2689_v58  ;;  %v3937_v14 = vadd.f32 %v3936_v7, %v2690_v60  ;;  %v2437_v60 = vld [vmem:[%s4911_s5 + $0x140] ss:$12 sps:$4 sm:$0xff]   ;;  %v2719_v5 = vunpack.c.h.bf16 %v2436_v55  ;;  %v2440_v6 = vld [vmem:[%s4911_s5 + $0x150] sm:$0xff] }
 0x2c1   : > { %v2720_v7 = vunpack.c.l.bf16 %v2437_v60  ;;  %v2723_v15 = vunpack.c.h.bf16 %v2437_v60 }
 0x2c2   : > { %v3684_v20 = vadd.f32 %v3683_v12, %v2691_v1  ;;  %v3811_v21 = vadd.f32 %v3810_v13, %v2692_v2  ;;  %v3938_v22 = vadd.f32 %v3937_v14, %v2693_v4  ;;  %v2718_v4 = vunpack.c.l.bf16 %v2436_v55  ;;  %v2442_v14 = vld [vmem:[%s4911_s5 + $0x15c] sm:$0xff] }
 0x2c3   : > { %v2721_v12 = vunpack.c.l.bf16 %v2438_v63  ;;  %v2722_v13 = vunpack.c.h.bf16 %v2438_v63 }
 0x2c4   : > { %v3685_v27 = vadd.f32 %v3684_v20, %v2694_v8  ;;  %v3812_v28 = vadd.f32 %v3811_v21, %v2695_v9  ;;  %v3939_v29 = vadd.f32 %v3938_v22, %v2696_v11  ;;  %v2441_v11 = vld [vmem:[%s4911_s5 + $0x158] ss:$12 sps:$4 sm:$0xff]   ;;  %v2725_v20 = vunpack.c.h.bf16 %v2440_v6  ;;  %v2444_v21 = vld [vmem:[%s4911_s5 + $0x168] sm:$0xff] }
 0x2c5   : > { %v2726_v22 = vunpack.c.l.bf16 %v2441_v11  ;;  %v2729_v30 = vunpack.c.h.bf16 %v2441_v11 }
 0x2c6   : > { %v3686_v35 = vadd.f32 %v3685_v27, %v2697_v16  ;;  %v3813_v36 = vadd.f32 %v3812_v28, %v2698_v17  ;;  %v3940_v37 = vadd.f32 %v3939_v29, %v2699_v19  ;;  %v2724_v19 = vunpack.c.l.bf16 %v2440_v6  ;;  %v2446_v29 = vld [vmem:[%s4911_s5 + $0x174] sm:$0xff] }
 0x2c7   : > { %v2727_v27 = vunpack.c.l.bf16 %v2442_v14  ;;  %v2728_v28 = vunpack.c.h.bf16 %v2442_v14 }
 0x2c8   : > { %v3687_v42 = vadd.f32 %v3686_v35, %v2700_v23  ;;  %v3814_v43 = vadd.f32 %v3813_v36, %v2701_v24  ;;  %v3941_v44 = vadd.f32 %v3940_v37, %v2702_v26  ;;  %v2445_v26 = vld [vmem:[%s4911_s5 + $0x170] ss:$12 sps:$4 sm:$0xff]   ;;  %v2731_v35 = vunpack.c.h.bf16 %v2444_v21  ;;  %v2448_v36 = vld [vmem:[%s4911_s5 + $0x180] sm:$0xff] }
 0x2c9   : > { %v2732_v37 = vunpack.c.l.bf16 %v2445_v26  ;;  %v2735_v45 = vunpack.c.h.bf16 %v2445_v26 }
 0x2ca   : > { %v3688_v50 = vadd.f32 %v3687_v42, %v2703_v31  ;;  %v3815_v51 = vadd.f32 %v3814_v43, %v2704_v32  ;;  %v3942_v52 = vadd.f32 %v3941_v44, %v2705_v34  ;;  %v2730_v34 = vunpack.c.l.bf16 %v2444_v21  ;;  %v2450_v44 = vld [vmem:[%s4911_s5 + $0x18c] sm:$0xff] }
 0x2cb   : > { %v2733_v42 = vunpack.c.l.bf16 %v2446_v29  ;;  %v2734_v43 = vunpack.c.h.bf16 %v2446_v29 }
 0x2cc   : > { %v3689_v57 = vadd.f32 %v3688_v50, %v2706_v38  ;;  %v3816_v58 = vadd.f32 %v3815_v51, %v2707_v39  ;;  %v3943_v59 = vadd.f32 %v3942_v52, %v2708_v41  ;;  %v2449_v41 = vld [vmem:[%s4911_s5 + $0x188] ss:$12 sps:$4 sm:$0xff]   ;;  %v2737_v50 = vunpack.c.h.bf16 %v2448_v36  ;;  %v2452_v51 = vld [vmem:[%s4911_s5 + $0x198] sm:$0xff] }
 0x2cd   : > { %v2738_v52 = vunpack.c.l.bf16 %v2449_v41  ;;  %v2741_v60 = vunpack.c.h.bf16 %v2449_v41 }
 0x2ce   : > { %v3690_v1 = vadd.f32 %v3689_v57, %v2709_v46  ;;  %v3817_v2 = vadd.f32 %v3816_v58, %v2710_v47  ;;  %v3944_v3 = vadd.f32 %v3943_v59, %v2711_v49  ;;  %v2736_v49 = vunpack.c.l.bf16 %v2448_v36  ;;  %v2454_v59 = vld [vmem:[%s4911_s5 + $0x1a4] sm:$0xff] }
 0x2cf   : > { %v2739_v57 = vunpack.c.l.bf16 %v2450_v44  ;;  %v2740_v58 = vunpack.c.h.bf16 %v2450_v44 }
 0x2d0   : > { %v3691_v8 = vadd.f32 %v3690_v1, %v2712_v53  ;;  %v3818_v9 = vadd.f32 %v3817_v2, %v2713_v54  ;;  %v3945_v10 = vadd.f32 %v3944_v3, %v2714_v56  ;;  %v2453_v56 = vld [vmem:[%s4911_s5 + $0x1a0] ss:$12 sps:$4 sm:$0xff]   ;;  %v2743_v1 = vunpack.c.h.bf16 %v2452_v51  ;;  %v2456_v2 = vld [vmem:[%s4911_s5 + $0x1b0] sm:$0xff] }
 0x2d1   : > { %v2744_v3 = vunpack.c.l.bf16 %v2453_v56  ;;  %v2747_v11 = vunpack.c.h.bf16 %v2453_v56 }
 0x2d2   : > { %v3692_v16 = vadd.f32 %v3691_v8, %v2715_v61  ;;  %v3819_v17 = vadd.f32 %v3818_v9, %v2716_v62  ;;  %v3946_v18 = vadd.f32 %v3945_v10, %v2717_v0  ;;  %v2742_v0 = vunpack.c.l.bf16 %v2452_v51  ;;  %v2458_v10 = vld [vmem:[%s4911_s5 + $0x1bc] sm:$0xff] }
 0x2d3   : > { %v2745_v8 = vunpack.c.l.bf16 %v2454_v59  ;;  %v2746_v9 = vunpack.c.h.bf16 %v2454_v59 }
 0x2d4   : > { %v3693_v23 = vadd.f32 %v3692_v16, %v2718_v4  ;;  %v3820_v24 = vadd.f32 %v3819_v17, %v2719_v5  ;;  %v3947_v25 = vadd.f32 %v3946_v18, %v2720_v7  ;;  %v2457_v7 = vld [vmem:[%s4911_s5 + $0x1b8] ss:$12 sps:$4 sm:$0xff]   ;;  %v2749_v16 = vunpack.c.h.bf16 %v2456_v2  ;;  %v2460_v17 = vld [vmem:[%s4911_s5 + $0x1c8] sm:$0xff] }
 0x2d5   : > { %v2750_v18 = vunpack.c.l.bf16 %v2457_v7  ;;  %v2753_v26 = vunpack.c.h.bf16 %v2457_v7 }
 0x2d6   : > { %v3694_v31 = vadd.f32 %v3693_v23, %v2721_v12  ;;  %v3821_v32 = vadd.f32 %v3820_v24, %v2722_v13  ;;  %v3948_v33 = vadd.f32 %v3947_v25, %v2723_v15  ;;  %v2748_v15 = vunpack.c.l.bf16 %v2456_v2  ;;  %v2462_v25 = vld [vmem:[%s4911_s5 + $0x1d4] sm:$0xff] }
 0x2d7   : > { %v2751_v23 = vunpack.c.l.bf16 %v2458_v10  ;;  %v2752_v24 = vunpack.c.h.bf16 %v2458_v10 }
 0x2d8   : > { %v3695_v38 = vadd.f32 %v3694_v31, %v2724_v19  ;;  %v3822_v39 = vadd.f32 %v3821_v32, %v2725_v20  ;;  %v3949_v40 = vadd.f32 %v3948_v33, %v2726_v22  ;;  %v2461_v22 = vld [vmem:[%s4911_s5 + $0x1d0] ss:$12 sps:$4 sm:$0xff]   ;;  %v2755_v31 = vunpack.c.h.bf16 %v2460_v17  ;;  %v2464_v32 = vld [vmem:[%s4911_s5 + $0x1e0] sm:$0xff] }
 0x2d9   : > { %v2756_v33 = vunpack.c.l.bf16 %v2461_v22  ;;  %v2759_v41 = vunpack.c.h.bf16 %v2461_v22 }
 0x2da   : > { %v3696_v46 = vadd.f32 %v3695_v38, %v2727_v27  ;;  %v3823_v47 = vadd.f32 %v3822_v39, %v2728_v28  ;;  %v3950_v48 = vadd.f32 %v3949_v40, %v2729_v30  ;;  %v2754_v30 = vunpack.c.l.bf16 %v2460_v17  ;;  %v2466_v40 = vld [vmem:[%s4911_s5 + $0x1ec] sm:$0xff] }
 0x2db   : > { %v2757_v38 = vunpack.c.l.bf16 %v2462_v25  ;;  %v2758_v39 = vunpack.c.h.bf16 %v2462_v25 }
 0x2dc   : > { %v3697_v53 = vadd.f32 %v3696_v46, %v2730_v34  ;;  %v3824_v54 = vadd.f32 %v3823_v47, %v2731_v35  ;;  %v3951_v55 = vadd.f32 %v3950_v48, %v2732_v37  ;;  %v2465_v37 = vld [vmem:[%s4911_s5 + $0x1e8] ss:$12 sps:$4 sm:$0xff]   ;;  %v2761_v46 = vunpack.c.h.bf16 %v2464_v32  ;;  %v2468_v47 = vld [vmem:[%s4911_s5 + $0x1f8] sm:$0xff] }
 0x2dd   : > { %v2762_v48 = vunpack.c.l.bf16 %v2465_v37  ;;  %v2765_v56 = vunpack.c.h.bf16 %v2465_v37 }
 0x2de   : > { %v3698_v61 = vadd.f32 %v3697_v53, %v2733_v42  ;;  %v3825_v62 = vadd.f32 %v3824_v54, %v2734_v43  ;;  %v3952_v63 = vadd.f32 %v3951_v55, %v2735_v45  ;;  %v2760_v45 = vunpack.c.l.bf16 %v2464_v32  ;;  %v2470_v55 = vld [vmem:[%s4911_s5 + $0x204] sm:$0xff] }
 0x2df   : > { %v2763_v53 = vunpack.c.l.bf16 %v2466_v40  ;;  %v2764_v54 = vunpack.c.h.bf16 %v2466_v40 }
 0x2e0   : > { %v3699_v4 = vadd.f32 %v3698_v61, %v2736_v49  ;;  %v3826_v5 = vadd.f32 %v3825_v62, %v2737_v50  ;;  %v3953_v6 = vadd.f32 %v3952_v63, %v2738_v52  ;;  %v2469_v52 = vld [vmem:[%s4911_s5 + $0x200] ss:$12 sps:$4 sm:$0xff]   ;;  %v2767_v61 = vunpack.c.h.bf16 %v2468_v47  ;;  %v2472_v62 = vld [vmem:[%s4911_s5 + $0x210] sm:$0xff] }
 0x2e1   : > { %v2768_v63 = vunpack.c.l.bf16 %v2469_v52  ;;  %v2771_v7 = vunpack.c.h.bf16 %v2469_v52 }
 0x2e2   : > { %v3700_v12 = vadd.f32 %v3699_v4, %v2739_v57  ;;  %v3827_v13 = vadd.f32 %v3826_v5, %v2740_v58  ;;  %v3954_v14 = vadd.f32 %v3953_v6, %v2741_v60  ;;  %v2766_v60 = vunpack.c.l.bf16 %v2468_v47  ;;  %v2474_v6 = vld [vmem:[%s4911_s5 + $0x21c] sm:$0xff] }
 0x2e3   : > { %v2769_v4 = vunpack.c.l.bf16 %v2470_v55  ;;  %v2770_v5 = vunpack.c.h.bf16 %v2470_v55 }
 0x2e4   : > { %v3701_v19 = vadd.f32 %v3700_v12, %v2742_v0  ;;  %v3828_v20 = vadd.f32 %v3827_v13, %v2743_v1  ;;  %v3955_v21 = vadd.f32 %v3954_v14, %v2744_v3  ;;  %v2473_v3 = vld [vmem:[%s4911_s5 + $0x218] ss:$12 sps:$4 sm:$0xff]   ;;  %v2773_v12 = vunpack.c.h.bf16 %v2472_v62  ;;  %v2476_v13 = vld [vmem:[%s4911_s5 + $0x228] sm:$0xff] }
 0x2e5   : > { %v2774_v14 = vunpack.c.l.bf16 %v2473_v3  ;;  %v2777_v22 = vunpack.c.h.bf16 %v2473_v3 }
 0x2e6   : > { %v3702_v27 = vadd.f32 %v3701_v19, %v2745_v8  ;;  %v3829_v28 = vadd.f32 %v3828_v20, %v2746_v9  ;;  %v3956_v29 = vadd.f32 %v3955_v21, %v2747_v11  ;;  %v2772_v11 = vunpack.c.l.bf16 %v2472_v62  ;;  %v2478_v21 = vld [vmem:[%s4911_s5 + $0x234] sm:$0xff] }
 0x2e7   : > { %v2775_v19 = vunpack.c.l.bf16 %v2474_v6  ;;  %v2776_v20 = vunpack.c.h.bf16 %v2474_v6 }
 0x2e8   : > { %v3703_v34 = vadd.f32 %v3702_v27, %v2748_v15  ;;  %v3830_v35 = vadd.f32 %v3829_v28, %v2749_v16  ;;  %v3957_v36 = vadd.f32 %v3956_v29, %v2750_v18  ;;  %v2477_v18 = vld [vmem:[%s4911_s5 + $0x230] ss:$12 sps:$4 sm:$0xff]   ;;  %v2779_v27 = vunpack.c.h.bf16 %v2476_v13  ;;  %v2480_v28 = vld [vmem:[%s4911_s5 + $0x240] sm:$0xff] }
 0x2e9   : > { %v2780_v29 = vunpack.c.l.bf16 %v2477_v18  ;;  %v2783_v37 = vunpack.c.h.bf16 %v2477_v18 }
 0x2ea   : > { %v3704_v42 = vadd.f32 %v3703_v34, %v2751_v23  ;;  %v3831_v43 = vadd.f32 %v3830_v35, %v2752_v24  ;;  %v3958_v44 = vadd.f32 %v3957_v36, %v2753_v26  ;;  %v2778_v26 = vunpack.c.l.bf16 %v2476_v13  ;;  %v2482_v36 = vld [vmem:[%s4911_s5 + $0x24c] sm:$0xff] }
 0x2eb   : > { %v2781_v34 = vunpack.c.l.bf16 %v2478_v21  ;;  %v2782_v35 = vunpack.c.h.bf16 %v2478_v21 }
 0x2ec   : > { %v3705_v49 = vadd.f32 %v3704_v42, %v2754_v30  ;;  %v3832_v50 = vadd.f32 %v3831_v43, %v2755_v31  ;;  %v3959_v51 = vadd.f32 %v3958_v44, %v2756_v33  ;;  %v2481_v33 = vld [vmem:[%s4911_s5 + $0x248] ss:$12 sps:$4 sm:$0xff]   ;;  %v2785_v42 = vunpack.c.h.bf16 %v2480_v28  ;;  %v2484_v43 = vld [vmem:[%s4911_s5 + $0x258] sm:$0xff] }
 0x2ed   : > { %v2786_v44 = vunpack.c.l.bf16 %v2481_v33  ;;  %v2789_v52 = vunpack.c.h.bf16 %v2481_v33 }
 0x2ee   : > { %v3706_v57 = vadd.f32 %v3705_v49, %v2757_v38  ;;  %v3833_v58 = vadd.f32 %v3832_v50, %v2758_v39  ;;  %v3960_v59 = vadd.f32 %v3959_v51, %v2759_v41  ;;  %v2784_v41 = vunpack.c.l.bf16 %v2480_v28  ;;  %v2486_v51 = vld [vmem:[%s4911_s5 + $0x264] sm:$0xff] }
 0x2ef   : > { %v2787_v49 = vunpack.c.l.bf16 %v2482_v36  ;;  %v2788_v50 = vunpack.c.h.bf16 %v2482_v36 }
 0x2f0   : > { %v3707_v0 = vadd.f32 %v3706_v57, %v2760_v45  ;;  %v3834_v1 = vadd.f32 %v3833_v58, %v2761_v46  ;;  %v3961_v2 = vadd.f32 %v3960_v59, %v2762_v48  ;;  %v2485_v48 = vld [vmem:[%s4911_s5 + $0x260] ss:$12 sps:$4 sm:$0xff]   ;;  %v2791_v57 = vunpack.c.h.bf16 %v2484_v43  ;;  %v2488_v58 = vld [vmem:[%s4911_s5 + $0x270] sm:$0xff] }
 0x2f1   : > { %v2792_v59 = vunpack.c.l.bf16 %v2485_v48  ;;  %v2795_v3 = vunpack.c.h.bf16 %v2485_v48 }
 0x2f2   : > { %v3708_v8 = vadd.f32 %v3707_v0, %v2763_v53  ;;  %v3835_v9 = vadd.f32 %v3834_v1, %v2764_v54  ;;  %v3962_v10 = vadd.f32 %v3961_v2, %v2765_v56  ;;  %v2790_v56 = vunpack.c.l.bf16 %v2484_v43  ;;  %v2490_v2 = vld [vmem:[%s4911_s5 + $0x27c] sm:$0xff] }
 0x2f3   : > { %v2793_v0 = vunpack.c.l.bf16 %v2486_v51  ;;  %v2794_v1 = vunpack.c.h.bf16 %v2486_v51 }
 0x2f4   : > { %v3709_v15 = vadd.f32 %v3708_v8, %v2766_v60  ;;  %v3836_v16 = vadd.f32 %v3835_v9, %v2767_v61  ;;  %v3963_v17 = vadd.f32 %v3962_v10, %v2768_v63  ;;  %v2489_v63 = vld [vmem:[%s4911_s5 + $0x278] ss:$12 sps:$4 sm:$0xff]   ;;  %v2797_v8 = vunpack.c.h.bf16 %v2488_v58  ;;  %v2492_v9 = vld [vmem:[%s4911_s5 + $0x288] sm:$0xff] }
 0x2f5   : > { %v2798_v10 = vunpack.c.l.bf16 %v2489_v63  ;;  %v2801_v18 = vunpack.c.h.bf16 %v2489_v63 }
 0x2f6   : > { %v3710_v23 = vadd.f32 %v3709_v15, %v2769_v4  ;;  %v3837_v24 = vadd.f32 %v3836_v16, %v2770_v5  ;;  %v3964_v25 = vadd.f32 %v3963_v17, %v2771_v7  ;;  %v2796_v7 = vunpack.c.l.bf16 %v2488_v58  ;;  %v2494_v17 = vld [vmem:[%s4911_s5 + $0x294] sm:$0xff] }
 0x2f7   : > { %v2799_v15 = vunpack.c.l.bf16 %v2490_v2  ;;  %v2800_v16 = vunpack.c.h.bf16 %v2490_v2 }
 0x2f8   : > { %v3711_v30 = vadd.f32 %v3710_v23, %v2772_v11  ;;  %v3838_v31 = vadd.f32 %v3837_v24, %v2773_v12  ;;  %v3965_v32 = vadd.f32 %v3964_v25, %v2774_v14  ;;  %v2493_v14 = vld [vmem:[%s4911_s5 + $0x290] ss:$12 sps:$4 sm:$0xff]   ;;  %v2803_v23 = vunpack.c.h.bf16 %v2492_v9  ;;  %v2496_v24 = vld [vmem:[%s4911_s5 + $0x2a0] sm:$0xff] }
 0x2f9   : > { %v2804_v25 = vunpack.c.l.bf16 %v2493_v14  ;;  %v2807_v33 = vunpack.c.h.bf16 %v2493_v14 }
 0x2fa   : > { %v3712_v38 = vadd.f32 %v3711_v30, %v2775_v19  ;;  %v3839_v39 = vadd.f32 %v3838_v31, %v2776_v20  ;;  %v3966_v40 = vadd.f32 %v3965_v32, %v2777_v22  ;;  %v2802_v22 = vunpack.c.l.bf16 %v2492_v9  ;;  %v2498_v32 = vld [vmem:[%s4911_s5 + $0x2ac] sm:$0xff] }
 0x2fb   : > { %v2805_v30 = vunpack.c.l.bf16 %v2494_v17  ;;  %v2806_v31 = vunpack.c.h.bf16 %v2494_v17 }
 0x2fc   : > { %v3713_v45 = vadd.f32 %v3712_v38, %v2778_v26  ;;  %v3840_v46 = vadd.f32 %v3839_v39, %v2779_v27  ;;  %v3967_v47 = vadd.f32 %v3966_v40, %v2780_v29  ;;  %v2497_v29 = vld [vmem:[%s4911_s5 + $0x2a8] ss:$12 sps:$4 sm:$0xff]   ;;  %v2809_v38 = vunpack.c.h.bf16 %v2496_v24  ;;  %v2500_v39 = vld [vmem:[%s4911_s5 + $0x2b8] sm:$0xff] }
 0x2fd   : > { %v2810_v40 = vunpack.c.l.bf16 %v2497_v29  ;;  %v2813_v48 = vunpack.c.h.bf16 %v2497_v29 }
 0x2fe   : > { %v3714_v53 = vadd.f32 %v3713_v45, %v2781_v34  ;;  %v3841_v54 = vadd.f32 %v3840_v46, %v2782_v35  ;;  %v3968_v55 = vadd.f32 %v3967_v47, %v2783_v37  ;;  %v2808_v37 = vunpack.c.l.bf16 %v2496_v24  ;;  %v2502_v47 = vld [vmem:[%s4911_s5 + $0x2c4] sm:$0xff] }
 0x2ff   : > { %v2811_v45 = vunpack.c.l.bf16 %v2498_v32  ;;  %v2812_v46 = vunpack.c.h.bf16 %v2498_v32 }
 0x300   : > { %v3715_v60 = vadd.f32 %v3714_v53, %v2784_v41  ;;  %v3842_v61 = vadd.f32 %v3841_v54, %v2785_v42  ;;  %v3969_v62 = vadd.f32 %v3968_v55, %v2786_v44  ;;  %v2501_v44 = vld [vmem:[%s4911_s5 + $0x2c0] ss:$12 sps:$4 sm:$0xff]   ;;  %v2815_v53 = vunpack.c.h.bf16 %v2500_v39  ;;  %v2504_v54 = vld [vmem:[%s4911_s5 + $0x2d0] sm:$0xff] }
 0x301   : > { %v2816_v55 = vunpack.c.l.bf16 %v2501_v44  ;;  %v2819_v63 = vunpack.c.h.bf16 %v2501_v44 }
 0x302   : > { %v3716_v4 = vadd.f32 %v3715_v60, %v2787_v49  ;;  %v3843_v5 = vadd.f32 %v3842_v61, %v2788_v50  ;;  %v3970_v6 = vadd.f32 %v3969_v62, %v2789_v52  ;;  %v2814_v52 = vunpack.c.l.bf16 %v2500_v39  ;;  %v2506_v62 = vld [vmem:[%s4911_s5 + $0x2dc] sm:$0xff] }
 0x303   : > { %v2817_v60 = vunpack.c.l.bf16 %v2502_v47  ;;  %v2818_v61 = vunpack.c.h.bf16 %v2502_v47 }
 0x304   : > { %v3717_v11 = vadd.f32 %v3716_v4, %v2790_v56  ;;  %v3844_v12 = vadd.f32 %v3843_v5, %v2791_v57  ;;  %v3971_v13 = vadd.f32 %v3970_v6, %v2792_v59  ;;  %v2505_v59 = vld [vmem:[%s4911_s5 + $0x2d8] ss:$12 sps:$4 sm:$0xff]   ;;  %v2821_v4 = vunpack.c.h.bf16 %v2504_v54  ;;  %v2508_v5 = vld [vmem:[%s4911_s5 + $0x2e8] sm:$0xff] }
 0x305   : > { %v2822_v6 = vunpack.c.l.bf16 %v2505_v59  ;;  %v2825_v14 = vunpack.c.h.bf16 %v2505_v59 }
 0x306   : > { %v3718_v19 = vadd.f32 %v3717_v11, %v2793_v0  ;;  %v3845_v20 = vadd.f32 %v3844_v12, %v2794_v1  ;;  %v3972_v21 = vadd.f32 %v3971_v13, %v2795_v3  ;;  %v2820_v3 = vunpack.c.l.bf16 %v2504_v54  ;;  %v2510_v13 = vld [vmem:[%s4911_s5 + $0x2f4] sm:$0xff] }
 0x307   : > { %v2823_v11 = vunpack.c.l.bf16 %v2506_v62  ;;  %v2824_v12 = vunpack.c.h.bf16 %v2506_v62  ;;  %v2829_v24 = vunpack.c.l.bf16 %v2510_v13 }
 0x308   : > { %v3719_v26 = vadd.f32 %v3718_v19, %v2796_v7  ;;  %v3846_v27 = vadd.f32 %v3845_v20, %v2797_v8  ;;  %v3973_v28 = vadd.f32 %v3972_v21, %v2798_v10  ;;  %v2509_v10 = vld [vmem:[%s4911_s5 + $0x2f0] ss:$12 sps:$4 sm:$0xff]   ;;  %v2827_v19 = vunpack.c.h.bf16 %v2508_v5 }
 0x309   : > { %v2828_v20 = vunpack.c.l.bf16 %v2509_v10 }
 0x30a   : > { %v3720_v34 = vadd.f32 %v3719_v26, %v2799_v15  ;;  %v3847_v35 = vadd.f32 %v3846_v27, %v2800_v16  ;;  %v3974_v36 = vadd.f32 %v3973_v28, %v2801_v18  ;;  %v2826_v18 = vunpack.c.l.bf16 %v2508_v5 }
 0x30b   : > { %v2831_v26 = vunpack.c.h.bf16 %v2509_v10 }
 0x30c   : > { %v3721_v41 = vadd.f32 %v3720_v34, %v2802_v22  ;;  %v3848_v42 = vadd.f32 %v3847_v35, %v2803_v23  ;;  %v3975_v43 = vadd.f32 %v3974_v36, %v2804_v25  ;;  %v2830_v25 = vunpack.c.h.bf16 %v2510_v13  ;;  %v3666_v34 = vld [vmem:[%s4927_s28 + $0x8] sm:$0xff]  ;;  %v3667_v35 = vld [vmem:[%s4927_s28 + $0x10] sm:$0xff] }
 0x30e   : > { %v3722_v49 = vadd.f32 %v3721_v41, %v2805_v30  ;;  %v3849_v50 = vadd.f32 %v3848_v42, %v2806_v31  ;;  %v3976_v51 = vadd.f32 %v3975_v43, %v2807_v33  ;;  %v3665_v33 = vld [vmem:[%s4927_s28] sm:$0xff] }
 0x310   : > { %v3723_v56 = vadd.f32 %v3722_v49, %v2808_v37  ;;  %v3850_v57 = vadd.f32 %v3849_v50, %v2809_v38  ;;  %v3977_v58 = vadd.f32 %v3976_v51, %v2810_v40 }
 0x312   : > { %v3724_v0 = vadd.f32 %v3723_v56, %v2811_v45  ;;  %v3851_v1 = vadd.f32 %v3850_v57, %v2812_v46  ;;  %v3978_v2 = vadd.f32 %v3977_v58, %v2813_v48 }
 0x314   : > { %v3725_v7 = vadd.f32 %v3724_v0, %v2814_v52  ;;  %v3852_v8 = vadd.f32 %v3851_v1, %v2815_v53  ;;  %v3979_v9 = vadd.f32 %v3978_v2, %v2816_v55 }
 0x316   : > { %v3726_v15 = vadd.f32 %v3725_v7, %v2817_v60  ;;  %v3853_v16 = vadd.f32 %v3852_v8, %v2818_v61  ;;  %v3980_v17 = vadd.f32 %v3979_v9, %v2819_v63 }
 0x318   : > { %v3727_v21 = vadd.f32 %v3726_v15, %v2820_v3  ;;  %v3854_v22 = vadd.f32 %v3853_v16, %v2821_v4  ;;  %v3981_v23 = vadd.f32 %v3980_v17, %v2822_v6 }
 0x31a   : > { %v3728_v27 = vadd.f32 %v3727_v21, %v2823_v11  ;;  %v3855_v28 = vadd.f32 %v3854_v22, %v2824_v12  ;;  %v3982_v29 = vadd.f32 %v3981_v23, %v2825_v14 }
 0x31c   : > { %v3729_v30 = vadd.f32 %v3728_v27, %v2826_v18  ;;  %v3856_v31 = vadd.f32 %v3855_v28, %v2827_v19  ;;  %v3983_v32 = vadd.f32 %v3982_v29, %v2828_v20 }
 0x31e   : > { %v3730_v36 = vadd.f32 %v3729_v30, %v2829_v24  ;;  %v3857_v37 = vadd.f32 %v3856_v31, %v2830_v25  ;;  %v3984_v38 = vadd.f32 %v3983_v32, %v2831_v26 }
 0x320   : > { %v4049_v39 = vadd.f32 %v3730_v36, %v3665_v33  ;;  %v4050_v40 = vadd.f32 %v3857_v37, %v3666_v34  ;;  %v4051_v41 = vadd.f32 %v3984_v38, %v3667_v35 }
 0x322   : > { %4052 = vst [vmem:[%s4927_s28] sm:$0xff] %v4049_v39  ;;  %4053 = vst [vmem:[%s4927_s28 + $0x8] sm:$0xff] %v4050_v40 }
 0x323   : > { %4054 = vst [vmem:[%s4927_s28 + $0x10] sm:$0xff] %v4051_v41 }
 0x324 PF: > { %s4262_s21 = smul.u32 384, %s4622_s22  ;;  %s4075_s18 = sshll.u32 %s4925_s24, 4  ;;  %s4076_s18 = int_to_ptr.vmem [resolvable:$true] %s4075_s18 }
 0x325   : > { %s4056_s30 = scalar_lea.sflag [#allocation4], %s4918_s23  ;;  %s4452_s4 = scalar_lea.vmem %s4076_s18, 384 }
 0x326   : > { %s5444_s29 = scalar_lea.hbm %s5544_s2, %s4262_s21  ;;  %p4453_p9 = scmp.ne.s32.totalorder %s4076_s18, %s4452_s4 }
 0x327   : > { %p5576_p10 = scmp.ne.s32.totalorder %s5571_s10, 0  ;;  %s4643_s15 = smov [#allocation7]  }
 0x328   : > { %s4456_s20 = sshll.u32 %s4643_s15, 4  ;;  %s4457_s20 = int_to_ptr.vmem [resolvable:$false] %s4456_s20 }
 0x329   : > { %p4454_p1 = pnand %p4453_p9, %p5576_p10  ;;  %s4458_s26 = scalar_lea.vmem %s4457_s20, 768 }
 0x32a   : > { %p4459_p12 = scmp.lt.s32.totalorder %s4076_s18, %s4457_s20  ;;  %p4460_p4 = scmp.lt.s32.totalorder %s4458_s26, %s4452_s4 }
 0x32b   : > { %p4455_p3 = pneg %p4454_p1 }
 0x32c   : > { %p4461_p6 = por %p4460_p4, %p4459_p12 }
 0x32e   : > { %p4462_p11 = pnand %p4461_p6, %p4455_p3 }
 0x330   : > { %4465 = shalt.err (!%p4462_p11)
}
 0x331   : > { %s4466_s27 = scalar_lea.hbm %s5444_s29, 384  ;;  %s4470_s3 = scalar_lea.hbm %s5544_s2, 768 }
 0x332   : > { %p4467_p7 = scmp.ne.s32.totalorder %s5444_s29, %s4466_s27  ;;  %p4471_p0 = scmp.lt.u32.totalorder %s5444_s29, %s5544_s2 }
 0x333   : > { %p4472_p2 = scmp.lt.u32.totalorder %s4470_s3, %s4466_s27  ;;  %p4474_p9 = scmp.lt.u32.totalorder %s4466_s27, %s5444_s29 }
 0x334   : > { %p4468_p5 = pnand %p4467_p7, %p5576_p10 }
 0x335   : > { %p4473_p8 = por %p4472_p2, %p4471_p0 }
 0x336   : > { %p4469_p13 = pneg %p4468_p5 }
 0x337   : > { %p4475_p1 = por %p4474_p9, %p4473_p8 }
 0x339   : > { %p4476_p3 = pnand %p4475_p1, %p4469_p13 }
 0x33b   : > { %4479 = shalt.err (!%p4476_p3)
}
 0x33c   : > { %4267 = dma.vmem_to_hbm [thread:$0]  (%p5576_p10), %s4076_s18, 384, %s5444_s29, %s4056_s30  }
 0x33d   : > { %s5577_s4 = sld [smem:[#allocation22_spill]]  ;;  %s4089_s20 = sshll.u32 %s4927_s28, 4  ;;  %s4090_s20 = int_to_ptr.vmem [resolvable:$true] %s4089_s20 }
 0x33e   : > { %s4061_s26 = scalar_lea.sflag [#allocation9], %s4918_s23  ;;  %s4480_s27 = scalar_lea.vmem %s4090_s20, 384 }
 0x33f   : > { %p4481_p12 = scmp.ne.s32.totalorder %s4090_s20, %s4480_s27  ;;  %s4644_s5 = smov [#allocation8]  }
 0x340   : > { %s4484_s11 = sshll.u32 %s4644_s5, 4  ;;  %s4485_s11 = int_to_ptr.vmem [resolvable:$false] %s4484_s11 }
 0x341   : > { %p4482_p4 = pnand %p4481_p12, %p5576_p10  ;;  %s4486_s3 = scalar_lea.vmem %s4485_s11, 768 }
 0x342   : > { %p4487_p11 = scmp.lt.s32.totalorder %s4090_s20, %s4485_s11  ;;  %p4488_p7 = scmp.lt.s32.totalorder %s4486_s3, %s4480_s27 }
 0x343   : > { %s5469_s15 = scalar_lea.hbm %s5577_s4, %s4262_s21  ;;  %p4483_p6 = pneg %p4482_p4 }
 0x344   : > { %p4489_p5 = por %p4488_p7, %p4487_p11 }
 0x346   : > { %p4490_p13 = pnand %p4489_p5, %p4483_p6 }
 0x348   : > { %4493 = shalt.err (!%p4490_p13)
}
 0x349   : > { %s4494_s22 = scalar_lea.hbm %s5469_s15, 384  ;;  %s4498_s21 = scalar_lea.hbm %s5577_s4, 768 }
 0x34a   : > { %p4495_p0 = scmp.ne.s32.totalorder %s5469_s15, %s4494_s22  ;;  %p4499_p9 = scmp.lt.u32.totalorder %s5469_s15, %s5577_s4 }
 0x34b   : > { %p4500_p1 = scmp.lt.u32.totalorder %s4498_s21, %s4494_s22  ;;  %p4502_p12 = scmp.lt.u32.totalorder %s4494_s22, %s5469_s15 }
 0x34c   : > { %p4496_p2 = pnand %p4495_p0, %p5576_p10 }
 0x34d   : > { %p4501_p3 = por %p4500_p1, %p4499_p9 }
 0x34e   : > { %p4497_p8 = pneg %p4496_p2 }
 0x34f   : > { %p4503_p4 = por %p4502_p12, %p4501_p3 }
 0x351   : > { %p4504_p6 = pnand %p4503_p4, %p4497_p8 }
 0x353   : > { %4507 = shalt.err (!%p4504_p6)
}
 0x354   : > { %4268 = dma.vmem_to_hbm [thread:$0]  (%p5576_p10), %s4090_s20, 384, %s5469_s15, %s4061_s26  }
 0x355 PF: > { %p4278_p11 = scmp.ge.s32.totalorder %s4634_s25, 2  ;;  %s4101_s30 = sand.u32 1, %s4582_s12  }
 0x356   : > { %p5578_p7 = scmp.ne.s32.totalorder %s5573_s9, 0  ;;  %s4102_s7 = scalar_lea.sflag [#allocation4], %s4101_s30 }
 0x358   : > { %p4272_p5 = pnand %p4278_p11, %p5578_p7 }
 0x35a   : > { %4573 = dma.done.wait (!%p4272_p5), %s4102_s7, 384  }
 0x35b   : > { %4575 = vsyncadd (!%p4272_p5), %s4102_s7, 4294966912  ;;  %s4111_s24 = scalar_lea.sflag [#allocation9], %s4101_s30 }
 0x35c   : > { %4577 = dma.done.wait (!%p4272_p5), %s4111_s24, 384  }
 0x35d   : > { %4579 = vsyncadd (!%p4272_p5), %s4111_s24, 4294966912  ;;  %s26_s25 = sadd.s32 1, %s4634_s25   ;;  %s5580_s8 = sld [smem:[#allocation21_spill]] }
 0x35e   : > { %p5495_p13 = scmp.ge.s32.totalorder %s26_s25, 6   ;;  %s5581_s6 = sld [smem:[#allocation20_spill]] }
 0x35f   : > { %s5582_s9 = sld [smem:[#allocation14_spill]]  ;;  %s5583_s20 = sld [smem:[#allocation19_spill]] }
 0x360   : > { %s5584_s21 = sld [smem:[#allocation15_spill]]  ;;  %s5585_s22 = sld [smem:[#allocation16_spill]] }
 0x361   : > { %s5586_s23 = sld [smem:[#allocation17_spill]]  ;;  %s5587_s24 = sld [smem:[#allocation18_spill]] }
 0x362   : > { %s5588_s12 = smov %s4586_s13  ;;  %s5589_s13 = smov %s4590_s14 }
 0x363   : > { %s5590_s14 = smov %s5580_s8  ;;  %s5591_s15 = smov %s4598_s16 }
 0x364   : > { %s5592_s16 = smov %s4602_s17  ;;  %s5593_s17 = smov %s5581_s6 }
 0x365   : > { %s5594_s18 = smov %s4610_s19  ;;  %s5595_s19 = smov %s5582_s9 }
 0x366   :  { %25 = sbr.rel (!%p5495_p13) target bundleno = 16 (0x10), region = 119 }
 0x36d   :  { %4116 = vsyncpa [#allocation3], 1 }
 0x36e   :  { %4118 = vsyncpa [#allocation3 + $0x1], 1 }
 0x36f   :  { %4119 = vsyncpa [#allocation6], 1 }
 0x370   :  { %4121 = vsyncpa [#allocation6 + $0x1], 1 }
 0x371   :  { %4122 = vsyncpa [#allocation4], 1 }
 0x372   :  { %4124 = vsyncpa [#allocation4 + $0x1], 1 }
 0x373   :  { %4125 = vsyncpa [#allocation9], 1 }
 0x374   :  { %4127 = vsyncpa [#allocation9 + $0x1], 1 }

</bundles_post_ra>
